<compile_context>
chip_gen: v7x
topology: tpu7x:2x2x1
jax: 0.10.0
libtpu: 0.0.40
codegen_flags: <defaults>
</compile_context>

<pallas_src>
import numpy as np
import jax
import jax.numpy as jnp
from jax import lax
from jax.experimental import pallas as pl
from jax.experimental.pallas import tpu as pltpu

PREC = lax.Precision.HIGHEST  # reference only


def _round_up(n, m):
    return ((n + m - 1) // m) * m


def _make_kernel(H, W, TQ):
    """Kernel closure over the static image geometry."""
    HW = H * W
    f32 = jnp.float32
    bf16 = jnp.bfloat16

    def kernel(x_ref, m_ref, wq_ref, wk_ref, wv_ref,
               qs_ref, qsh_ref, ks_ref, ksh_ref, bv_ref, gamma_ref,
               out_ref, q_scr, k_scr, v_scr):
        qt = pl.program_id(1)

        # ---- shared per-image projections: computed once per batch element --
        @pl.when(qt == 0)
        def _():
            x_bf = x_ref[...]                           # (HW, CP) bf16
            xf = x_bf.astype(f32)
            m = m_ref[...]                              # (HW, 4) {0,1} f32 tap masks
            # Shifted conv taps built in-kernel (XLU sublane rolls) + boundary
            # masks.  Shifts are given as positive equivalents mod HW.
            xl = (pltpu.roll(xf, shift=1,      axis=0) * m[:, 0:1]).astype(bf16)  # x[h, w-1]
            xr = (pltpu.roll(xf, shift=HW - 1, axis=0) * m[:, 1:2]).astype(bf16)  # x[h, w+1]
            xu = (pltpu.roll(xf, shift=W,      axis=0) * m[:, 2:3]).astype(bf16)  # x[h-1, w]
            xd = (pltpu.roll(xf, shift=HW - W, axis=0) * m[:, 3:4]).astype(bf16)  # x[h+1, w]

            # query branch: (1,3) conv as 3 accumulated K=C matmuls -> BN -> ReLU
            q = (jnp.dot(xl,   wq_ref[0], preferred_element_type=f32)
                 + jnp.dot(x_bf, wq_ref[1], preferred_element_type=f32)
                 + jnp.dot(xr,   wq_ref[2], preferred_element_type=f32))
            q = jnp.maximum(q * qs_ref[...] + qsh_ref[...], 0.0)      # (HW, KP)

            # key branch: (3,1) conv as 3 accumulated K=C matmuls -> BN -> ReLU
            k = (jnp.dot(xu,   wk_ref[0], preferred_element_type=f32)
                 + jnp.dot(x_bf, wk_ref[1], preferred_element_type=f32)
                 + jnp.dot(xd,   wk_ref[2], preferred_element_type=f32))
            k = jnp.maximum(k * ks_ref[...] + ksh_ref[...], 0.0)      # (HW, KP)

            # value branch: 1x1 conv (channel matmul) + bias
            v = jnp.dot(x_bf, wv_ref[...], preferred_element_type=f32) + bv_ref[...]

            q_scr[...] = q.astype(bf16)
            k_scr[...] = k.astype(bf16)
            v_scr[...] = v.astype(bf16)

        # ---- per-query-tile attention ---------------------------------------
        s = pl.multiple_of(qt * TQ, TQ)
        q_t = q_scr[pl.ds(s, TQ), :]                    # (TQ, KP) bf16
        # affinity[i, j] = <q_i, k_j>; zero-padded head lanes contribute exactly 0
        aff = lax.dot_general(q_t, k_scr[...], (((1,), (1,)), ((), ())),
                              preferred_element_type=f32)             # (TQ, HW)
        # fused max-subtract + exp: only one (TQ, HW) f32 temporary stays live
        e = jnp.exp(aff - jnp.max(aff, axis=-1, keepdims=True))
        r = jnp.sum(e, axis=-1, keepdims=True)                        # (TQ, 1)
        # deferred softmax normalization: (e @ v) * reciprocal(rowsum) on the EUP
        wgt = jnp.dot(e.astype(bf16), v_scr[...], preferred_element_type=f32)
        wgt = wgt * pl.reciprocal(r, approx=True)                     # (TQ, CP)

        x_t = x_ref[pl.ds(s, TQ), :].astype(f32)        # residual tile
        out_ref[...] = (gamma_ref[0] * wgt + x_t).astype(out_ref.dtype)

    return kernel


def spatial_attention_block(x_nhwc, wq, wk, wv,
                            q_scale, q_shift, k_scale, k_shift, bv, gamma):
    """x_nhwc: (B, H, W, C) float32, C divisible by 8. Returns (B, H, W, C)."""
    B, H, W, C = x_nhwc.shape
    assert C % 8 == 0
    C8 = C // 8
    HW = H * W
    assert HW % 8 == 0
    KP = _round_up(C8, 128)               # padded query/key head dim (lane-dense)
    CP = _round_up(C, 128)                # padded value/output channel dim
    TQ = 128 if HW % 128 == 0 else HW     # query-tile rows per grid step
    NQ = HW // TQ

    # ---- XLA-side glue: single bf16 stream, static tap masks, weight pads ----
    x_flat = x_nhwc.reshape(B, HW, C)
    if CP != C:
        x_flat = jnp.pad(x_flat, ((0, 0), (0, 0), (0, CP - C)))
    x_bf = x_flat.astype(jnp.bfloat16)

    # conv-tap validity masks [left, right, up, down] (static, 4*HW floats)
    hw = np.arange(HW)
    wpos, hpos = hw % W, hw // W
    tap_mask = jnp.asarray(
        np.stack([wpos > 0, wpos < W - 1, hpos > 0, hpos < H - 1],
                 axis=1).astype(np.float32))                         # (HW, 4)

    # padded bf16 weights (padded rows/cols are exact zeros -> ReLU(0) = 0, so
    # the padded head lanes / channels provably contribute nothing)
    wq_p = jnp.pad(wq, ((0, 0), (0, CP - C), (0, KP - C8))).astype(jnp.bfloat16)
    wk_p = jnp.pad(wk, ((0, 0), (0, CP - C), (0, KP - C8))).astype(jnp.bfloat16)
    wv_p = jnp.pad(wv, ((0, CP - C), (0, CP - C))).astype(jnp.bfloat16)
    qs = jnp.pad(q_scale, (0, KP - C8)).reshape(1, KP)
    qsh = jnp.pad(q_shift, (0, KP - C8)).reshape(1, KP)
    ks = jnp.pad(k_scale, (0, KP - C8)).reshape(1, KP)
    ksh = jnp.pad(k_shift, (0, KP - C8)).reshape(1, KP)
    bv_p = jnp.pad(bv, (0, CP - C)).reshape(1, CP)

    kernel = _make_kernel(H, W, TQ)

    out = pl.pallas_call(
        kernel,
        out_shape=jax.ShapeDtypeStruct((B, HW, CP), jnp.float32),
        grid=(B, NQ),
        in_specs=[
            pl.BlockSpec((None, HW, CP), lambda b, q: (b, 0, 0)),    # x (bf16)
            pl.BlockSpec((HW, 4), lambda b, q: (0, 0)),              # tap masks
            pl.BlockSpec((3, CP, KP), lambda b, q: (0, 0, 0)),       # wq taps
            pl.BlockSpec((3, CP, KP), lambda b, q: (0, 0, 0)),       # wk taps
            pl.BlockSpec((CP, CP), lambda b, q: (0, 0)),             # wv
            pl.BlockSpec((1, KP), lambda b, q: (0, 0)),              # q_scale
            pl.BlockSpec((1, KP), lambda b, q: (0, 0)),              # q_shift
            pl.BlockSpec((1, KP), lambda b, q: (0, 0)),              # k_scale
            pl.BlockSpec((1, KP), lambda b, q: (0, 0)),              # k_shift
            pl.BlockSpec((1, CP), lambda b, q: (0, 0)),              # bv
            pl.BlockSpec(memory_space=pltpu.MemorySpace.SMEM),       # gamma (1,)
        ],
        out_specs=pl.BlockSpec((None, TQ, CP), lambda b, q: (b, q, 0)),
        scratch_shapes=[
            pltpu.VMEM((HW, KP), jnp.bfloat16),   # q (whole image)
            pltpu.VMEM((HW, KP), jnp.bfloat16),   # k (whole image)
            pltpu.VMEM((HW, CP), jnp.bfloat16),   # v (whole image)
        ],
        compiler_params=pltpu.CompilerParams(
            dimension_semantics=("parallel", "arbitrary"),
        ),
    )(x_bf, tap_mask, wq_p, wk_p, wv_p, qs, qsh, ks, ksh, bv_p, gamma)

    out = out.reshape(B, H, W, CP)
    return out if CP == C else out[..., :C]


def reference_forward(x, wq, wk, wv, q_scale, q_shift, k_scale, k_shift, bv, gamma):
    """Pure-JAX f32/HIGHEST reference mirroring the PyTorch forward (NHWC)."""
    B, H, W, C = x.shape
    C8 = C // 8
    q = lax.conv_general_dilated(x, wq[None], (1, 1), ((0, 0), (1, 1)),
                                 dimension_numbers=('NHWC', 'HWIO', 'NHWC'),
                                 precision=PREC)
    q = jnp.maximum(q * q_scale + q_shift, 0.0)
    k = lax.conv_general_dilated(x, wk[:, None], (1, 1), ((1, 1), (0, 0)),
                                 dimension_numbers=('NHWC', 'HWIO', 'NHWC'),
                                 precision=PREC)
    k = jnp.maximum(k * k_scale + k_shift, 0.0)
    qf = q.reshape(B, H * W, C8)
    kf = k.reshape(B, H * W, C8)
    aff = jax.nn.softmax(jnp.einsum('bid,bjd->bij', qf, kf, precision=PREC), axis=-1)
    v = jnp.einsum('bhwc,cd->bhwd', x, wv, precision=PREC).reshape(B, H * W, C) + bv
    out = gamma[0] * jnp.einsum('bij,bjc->bic', aff, v, precision=PREC) \
        + x.reshape(B, H * W, C)
    return out.reshape(B, H, W, C)


if __name__ == "__main__":
    # C = 128 keeps the value/output channel dim exactly lane-dense (no padded
    # stores, no post-kernel slice); the module only requires C % 8 == 0.
    B, C, H, W = 2, 128, 16, 16
    C8 = C // 8
    keys = jax.random.split(jax.random.PRNGKey(0), 15)

    x_nchw = jax.random.normal(keys[0], (B, C, H, W), jnp.float32)   # torch-style input
    x = jnp.transpose(x_nchw, (0, 2, 3, 1))                          # -> NHWC for the kernel

    # deterministic parameter init (shapes from the module's __init__)
    wq = 0.05 * jax.random.normal(keys[1], (3, C, C8), jnp.float32)  # Conv2d(C, C//8, (1,3))
    wk = 0.05 * jax.random.normal(keys[2], (3, C, C8), jnp.float32)  # Conv2d(C, C//8, (3,1))
    wv = 0.05 * jax.random.normal(keys[3], (C, C), jnp.float32)      # Conv2d(C, C, 1)
    bq = 0.05 * jax.random.normal(keys[4], (C8,), jnp.float32)
    bk = 0.05 * jax.random.normal(keys[5], (C8,), jnp.float32)
    bv = 0.05 * jax.random.normal(keys[6], (C,), jnp.float32)

    # BatchNorm (inference semantics) folded into per-channel scale/shift
    eps = 1e-5
    bn_q_w = jax.random.uniform(keys[7], (C8,), jnp.float32, 0.5, 1.5)
    bn_q_b = 0.1 * jax.random.normal(keys[8], (C8,), jnp.float32)
    bn_q_m = 0.1 * jax.random.normal(keys[9], (C8,), jnp.float32)
    bn_q_v = jax.random.uniform(keys[10], (C8,), jnp.float32, 0.5, 1.5)
    bn_k_w = jax.random.uniform(keys[11], (C8,), jnp.float32, 0.5, 1.5)
    bn_k_b = 0.1 * jax.random.normal(keys[12], (C8,), jnp.float32)
    bn_k_m = 0.1 * jax.random.normal(keys[13], (C8,), jnp.float32)
    bn_k_v = jax.random.uniform(keys[14], (C8,), jnp.float32, 0.5, 1.5)

    q_scale = bn_q_w / jnp.sqrt(bn_q_v + eps)
    q_shift = bn_q_b + (bq - bn_q_m) * q_scale
    k_scale = bn_k_w / jnp.sqrt(bn_k_v + eps)
    k_shift = bn_k_b + (bk - bn_k_m) * k_scale

    # TODO(synk): torch __init__ sets gamma = 0 (output would equal x exactly);
    # a nonzero value is used so the attention path is actually exercised.
    gamma = jnp.array([0.5], jnp.float32)

    out = spatial_attention_block(x, wq, wk, wv,
                                  q_scale, q_shift, k_scale, k_shift, bv, gamma)
    out = jax.block_until_ready(out)

    ref = reference_forward(x, wq, wk, wv,
                            q_scale, q_shift, k_scale, k_shift, bv, gamma)
    # Kernel uses bf16 MXU operands (f32 accumulation) and an approx EUP
    # reciprocal; the reference is full f32/HIGHEST, so the tolerance is the
    # bf16 matmul budget.
    np.testing.assert_allclose(np.asarray(out), np.asarray(ref), rtol=3e-2, atol=3e-2)
    print("KERNEL_OK")
</pallas_src>

<mosaic_0001>
module attributes {stable_mosaic.version = 11 : i64} {
  func.func @kernel(%arg0: i32, %arg1: i32, %arg2: memref<1x256x128xbf16, #tpu.memory_space<vmem>>, %arg3: memref<256x4xf32, #tpu.memory_space<vmem>>, %arg4: memref<3x128x128xbf16, #tpu.memory_space<vmem>>, %arg5: memref<3x128x128xbf16, #tpu.memory_space<vmem>>, %arg6: memref<128x128xbf16, #tpu.memory_space<vmem>>, %arg7: memref<1x128xf32, #tpu.memory_space<vmem>>, %arg8: memref<1x128xf32, #tpu.memory_space<vmem>>, %arg9: memref<1x128xf32, #tpu.memory_space<vmem>>, %arg10: memref<1x128xf32, #tpu.memory_space<vmem>>, %arg11: memref<1x128xf32, #tpu.memory_space<vmem>>, %arg12: memref<1xf32, #tpu.memory_space<smem>>, %arg13: memref<1x128x128xf32, #tpu.memory_space<vmem>>, %arg14: memref<256x128xbf16, #tpu.memory_space<vmem>>, %arg15: memref<256x128xbf16, #tpu.memory_space<vmem>>, %arg16: memref<256x128xbf16, #tpu.memory_space<vmem>>) attributes {dimension_semantics = [#tpu.dimension_semantics<parallel>, #tpu.dimension_semantics<arbitrary>], iteration_bounds = array<i64: 2, 2>, scalar_prefetch = 0 : i64, scratch_operands = 3 : i64, tpu.core_type = #tpu.core_type<tc>, window_params = [{transform_indices = @transform_0, window_bounds = array<i64: 1, 256, 128>}, {pipeline_mode = #tpu.pipeline_mode<synchronous>, transform_indices = @transform_1, window_bounds = array<i64: 256, 4>}, {pipeline_mode = #tpu.pipeline_mode<synchronous>, transform_indices = @transform_2, window_bounds = array<i64: 3, 128, 128>}, {pipeline_mode = #tpu.pipeline_mode<synchronous>, transform_indices = @transform_3, window_bounds = array<i64: 3, 128, 128>}, {pipeline_mode = #tpu.pipeline_mode<synchronous>, transform_indices = @transform_4, window_bounds = array<i64: 128, 128>}, {pipeline_mode = #tpu.pipeline_mode<synchronous>, transform_indices = @transform_5, window_bounds = array<i64: 1, 128>}, {pipeline_mode = #tpu.pipeline_mode<synchronous>, transform_indices = @transform_6, window_bounds = array<i64: 1, 128>}, {pipeline_mode = #tpu.pipeline_mode<synchronous>, transform_indices = @transform_7, window_bounds = array<i64: 1, 128>}, {pipeline_mode = #tpu.pipeline_mode<synchronous>, transform_indices = @transform_8, window_bounds = array<i64: 1, 128>}, {pipeline_mode = #tpu.pipeline_mode<synchronous>, transform_indices = @transform_9, window_bounds = array<i64: 1, 128>}, {transform_indices = @transform_10, window_bounds = array<i64: 1>}, {transform_indices = @transform_11, window_bounds = array<i64: 1, 128, 128>}]} {
    %c0_i32 = arith.constant 0 : i32
    %0 = arith.cmpi eq, %arg1, %c0_i32 : i32
    %1 = arith.extui %0 : i1 to i32
    %c0_i32_0 = arith.constant 0 : i32
    %2 = arith.cmpi ne, %1, %c0_i32_0 : i32
    scf.if %2 {
      %c0_14 = arith.constant 0 : index
      %c0_15 = arith.constant 0 : index
      %c0_16 = arith.constant 0 : index
      %33 = vector.load %arg2[%c0_14, %c0_15, %c0_16] : memref<1x256x128xbf16, #tpu.memory_space<vmem>>, vector<1x256x128xbf16>
      %34 = vector.shape_cast %33 : vector<1x256x128xbf16> to vector<256x128xbf16>
      %35 = arith.extf %34 : vector<256x128xbf16> to vector<256x128xf32>
      %c0_17 = arith.constant 0 : index
      %c0_18 = arith.constant 0 : index
      %36 = vector.load %arg3[%c0_17, %c0_18] : memref<256x4xf32, #tpu.memory_space<vmem>>, vector<256x4xf32>
      %c1_i32 = arith.constant 1 : i32
      %37 = tpu.dynamic_rotate %35 by %c1_i32 dim 0 : vector<256x128xf32>, i32 -> vector<256x128xf32>
      %38 = vector.extract_strided_slice %36 {offsets = [0, 0], sizes = [256, 1], strides = [1, 1]} : vector<256x4xf32> to vector<256x1xf32>
      %39 = vector.broadcast %38 : vector<256x1xf32> to vector<256x128xf32>
      %40 = arith.mulf %37, %39 : vector<256x128xf32>
      %41 = arith.truncf %40 : vector<256x128xf32> to vector<256x128xbf16>
      %c255_i32 = arith.constant 255 : i32
      %42 = tpu.dynamic_rotate %35 by %c255_i32 dim 0 : vector<256x128xf32>, i32 -> vector<256x128xf32>
      %43 = vector.extract_strided_slice %36 {offsets = [0, 1], sizes = [256, 1], strides = [1, 1]} : vector<256x4xf32> to vector<256x1xf32>
      %44 = vector.broadcast %43 : vector<256x1xf32> to vector<256x128xf32>
      %45 = arith.mulf %42, %44 : vector<256x128xf32>
      %46 = arith.truncf %45 : vector<256x128xf32> to vector<256x128xbf16>
      %c16_i32 = arith.constant 16 : i32
      %47 = tpu.dynamic_rotate %35 by %c16_i32 dim 0 : vector<256x128xf32>, i32 -> vector<256x128xf32>
      %48 = vector.extract_strided_slice %36 {offsets = [0, 2], sizes = [256, 1], strides = [1, 1]} : vector<256x4xf32> to vector<256x1xf32>
      %49 = vector.broadcast %48 : vector<256x1xf32> to vector<256x128xf32>
      %50 = arith.mulf %47, %49 : vector<256x128xf32>
      %51 = arith.truncf %50 : vector<256x128xf32> to vector<256x128xbf16>
      %c240_i32 = arith.constant 240 : i32
      %52 = tpu.dynamic_rotate %35 by %c240_i32 dim 0 : vector<256x128xf32>, i32 -> vector<256x128xf32>
      %53 = vector.extract_strided_slice %36 {offsets = [0, 3], sizes = [256, 1], strides = [1, 1]} : vector<256x4xf32> to vector<256x1xf32>
      %54 = vector.broadcast %53 : vector<256x1xf32> to vector<256x128xf32>
      %55 = arith.mulf %52, %54 : vector<256x128xf32>
      %56 = arith.truncf %55 : vector<256x128xf32> to vector<256x128xbf16>
      %c0_19 = arith.constant 0 : index
      %c0_20 = arith.constant 0 : index
      %c0_21 = arith.constant 0 : index
      %57 = vector.load %arg4[%c0_19, %c0_20, %c0_21] : memref<3x128x128xbf16, #tpu.memory_space<vmem>>, vector<1x128x128xbf16>
      %58 = vector.shape_cast %57 : vector<1x128x128xbf16> to vector<128x128xbf16>
      %cst_22 = arith.constant dense<0.000000e+00> : vector<256x128xf32>
      %59 = tpu.matmul %41, %58, %cst_22 {dimension_numbers = #tpu.dot_dimension_numbers<[1], [0], [0], [1], [0, 0, 1, 1], [], []>} : vector<256x128xbf16>, vector<128x128xbf16>, vector<256x128xf32> -> vector<256x128xf32>
      %c1 = arith.constant 1 : index
      %c0_23 = arith.constant 0 : index
      %c0_24 = arith.constant 0 : index
      %60 = vector.load %arg4[%c1, %c0_23, %c0_24] : memref<3x128x128xbf16, #tpu.memory_space<vmem>>, vector<1x128x128xbf16>
      %61 = vector.shape_cast %60 : vector<1x128x128xbf16> to vector<128x128xbf16>
      %cst_25 = arith.constant dense<0.000000e+00> : vector<256x128xf32>
      %62 = tpu.matmul %34, %61, %cst_25 {dimension_numbers = #tpu.dot_dimension_numbers<[1], [0], [0], [1], [0, 0, 1, 1], [], []>} : vector<256x128xbf16>, vector<128x128xbf16>, vector<256x128xf32> -> vector<256x128xf32>
      %63 = arith.addf %59, %62 : vector<256x128xf32>
      %c2 = arith.constant 2 : index
      %c0_26 = arith.constant 0 : index
      %c0_27 = arith.constant 0 : index
      %64 = vector.load %arg4[%c2, %c0_26, %c0_27] : memref<3x128x128xbf16, #tpu.memory_space<vmem>>, vector<1x128x128xbf16>
      %65 = vector.shape_cast %64 : vector<1x128x128xbf16> to vector<128x128xbf16>
      %cst_28 = arith.constant dense<0.000000e+00> : vector<256x128xf32>
      %66 = tpu.matmul %46, %65, %cst_28 {dimension_numbers = #tpu.dot_dimension_numbers<[1], [0], [0], [1], [0, 0, 1, 1], [], []>} : vector<256x128xbf16>, vector<128x128xbf16>, vector<256x128xf32> -> vector<256x128xf32>
      %67 = arith.addf %63, %66 : vector<256x128xf32>
      %c0_29 = arith.constant 0 : index
      %c0_30 = arith.constant 0 : index
      %68 = vector.load %arg7[%c0_29, %c0_30] : memref<1x128xf32, #tpu.memory_space<vmem>>, vector<1x128xf32>
      %69 = vector.broadcast %68 : vector<1x128xf32> to vector<256x128xf32>
      %70 = arith.mulf %67, %69 : vector<256x128xf32>
      %c0_31 = arith.constant 0 : index
      %c0_32 = arith.constant 0 : index
      %71 = vector.load %arg8[%c0_31, %c0_32] : memref<1x128xf32, #tpu.memory_space<vmem>>, vector<1x128xf32>
      %72 = vector.broadcast %71 : vector<1x128xf32> to vector<256x128xf32>
      %73 = arith.addf %70, %72 : vector<256x128xf32>
      %cst_33 = arith.constant 0.000000e+00 : f32
      %74 = vector.broadcast %cst_33 : f32 to vector<256x128xf32>
      %75 = arith.maximumf %73, %74 : vector<256x128xf32>
      %c0_34 = arith.constant 0 : index
      %c0_35 = arith.constant 0 : index
      %c0_36 = arith.constant 0 : index
      %76 = vector.load %arg5[%c0_34, %c0_35, %c0_36] : memref<3x128x128xbf16, #tpu.memory_space<vmem>>, vector<1x128x128xbf16>
      %77 = vector.shape_cast %76 : vector<1x128x128xbf16> to vector<128x128xbf16>
      %cst_37 = arith.constant dense<0.000000e+00> : vector<256x128xf32>
      %78 = tpu.matmul %51, %77, %cst_37 {dimension_numbers = #tpu.dot_dimension_numbers<[1], [0], [0], [1], [0, 0, 1, 1], [], []>} : vector<256x128xbf16>, vector<128x128xbf16>, vector<256x128xf32> -> vector<256x128xf32>
      %c1_38 = arith.constant 1 : index
      %c0_39 = arith.constant 0 : index
      %c0_40 = arith.constant 0 : index
      %79 = vector.load %arg5[%c1_38, %c0_39, %c0_40] : memref<3x128x128xbf16, #tpu.memory_space<vmem>>, vector<1x128x128xbf16>
      %80 = vector.shape_cast %79 : vector<1x128x128xbf16> to vector<128x128xbf16>
      %cst_41 = arith.constant dense<0.000000e+00> : vector<256x128xf32>
      %81 = tpu.matmul %34, %80, %cst_41 {dimension_numbers = #tpu.dot_dimension_numbers<[1], [0], [0], [1], [0, 0, 1, 1], [], []>} : vector<256x128xbf16>, vector<128x128xbf16>, vector<256x128xf32> -> vector<256x128xf32>
      %82 = arith.addf %78, %81 : vector<256x128xf32>
      %c2_42 = arith.constant 2 : index
      %c0_43 = arith.constant 0 : index
      %c0_44 = arith.constant 0 : index
      %83 = vector.load %arg5[%c2_42, %c0_43, %c0_44] : memref<3x128x128xbf16, #tpu.memory_space<vmem>>, vector<1x128x128xbf16>
      %84 = vector.shape_cast %83 : vector<1x128x128xbf16> to vector<128x128xbf16>
      %cst_45 = arith.constant dense<0.000000e+00> : vector<256x128xf32>
      %85 = tpu.matmul %56, %84, %cst_45 {dimension_numbers = #tpu.dot_dimension_numbers<[1], [0], [0], [1], [0, 0, 1, 1], [], []>} : vector<256x128xbf16>, vector<128x128xbf16>, vector<256x128xf32> -> vector<256x128xf32>
      %86 = arith.addf %82, %85 : vector<256x128xf32>
      %c0_46 = arith.constant 0 : index
      %c0_47 = arith.constant 0 : index
      %87 = vector.load %arg9[%c0_46, %c0_47] : memref<1x128xf32, #tpu.memory_space<vmem>>, vector<1x128xf32>
      %88 = vector.broadcast %87 : vector<1x128xf32> to vector<256x128xf32>
      %89 = arith.mulf %86, %88 : vector<256x128xf32>
      %c0_48 = arith.constant 0 : index
      %c0_49 = arith.constant 0 : index
      %90 = vector.load %arg10[%c0_48, %c0_49] : memref<1x128xf32, #tpu.memory_space<vmem>>, vector<1x128xf32>
      %91 = vector.broadcast %90 : vector<1x128xf32> to vector<256x128xf32>
      %92 = arith.addf %89, %91 : vector<256x128xf32>
      %cst_50 = arith.constant 0.000000e+00 : f32
      %93 = vector.broadcast %cst_50 : f32 to vector<256x128xf32>
      %94 = arith.maximumf %92, %93 : vector<256x128xf32>
      %c0_51 = arith.constant 0 : index
      %c0_52 = arith.constant 0 : index
      %95 = vector.load %arg6[%c0_51, %c0_52] : memref<128x128xbf16, #tpu.memory_space<vmem>>, vector<128x128xbf16>
      %cst_53 = arith.constant dense<0.000000e+00> : vector<256x128xf32>
      %96 = tpu.matmul %34, %95, %cst_53 {dimension_numbers = #tpu.dot_dimension_numbers<[1], [0], [0], [1], [0, 0, 1, 1], [], []>} : vector<256x128xbf16>, vector<128x128xbf16>, vector<256x128xf32> -> vector<256x128xf32>
      %c0_54 = arith.constant 0 : index
      %c0_55 = arith.constant 0 : index
      %97 = vector.load %arg11[%c0_54, %c0_55] : memref<1x128xf32, #tpu.memory_space<vmem>>, vector<1x128xf32>
      %98 = vector.broadcast %97 : vector<1x128xf32> to vector<256x128xf32>
      %99 = arith.addf %96, %98 : vector<256x128xf32>
      %100 = arith.truncf %75 : vector<256x128xf32> to vector<256x128xbf16>
      %c0_56 = arith.constant 0 : index
      %c0_57 = arith.constant 0 : index
      %101 = vector.load %arg14[%c0_56, %c0_57] : memref<256x128xbf16, #tpu.memory_space<vmem>>, vector<256x128xbf16>
      tpu.vector_store %arg14[%c0_56, %c0_57], %100 {strides = array<i32>} : memref<256x128xbf16, #tpu.memory_space<vmem>>, vector<256x128xbf16>,
      %102 = arith.truncf %94 : vector<256x128xf32> to vector<256x128xbf16>
      %c0_58 = arith.constant 0 : index
      %c0_59 = arith.constant 0 : index
      %103 = vector.load %arg15[%c0_58, %c0_59] : memref<256x128xbf16, #tpu.memory_space<vmem>>, vector<256x128xbf16>
      tpu.vector_store %arg15[%c0_58, %c0_59], %102 {strides = array<i32>} : memref<256x128xbf16, #tpu.memory_space<vmem>>, vector<256x128xbf16>,
      %104 = arith.truncf %99 : vector<256x128xf32> to vector<256x128xbf16>
      %c0_60 = arith.constant 0 : index
      %c0_61 = arith.constant 0 : index
      %105 = vector.load %arg16[%c0_60, %c0_61] : memref<256x128xbf16, #tpu.memory_space<vmem>>, vector<256x128xbf16>
      tpu.vector_store %arg16[%c0_60, %c0_61], %104 {strides = array<i32>} : memref<256x128xbf16, #tpu.memory_space<vmem>>, vector<256x128xbf16>,
    } else {
    }
    %c128_i32 = arith.constant 128 : i32
    %3 = arith.muli %arg1, %c128_i32 : i32
    %4 = tpu.assume_multiple %3, 128 : i32
    %5 = arith.index_cast %4 : i32 to index
    %c0 = arith.constant 0 : index
    %6 = vector.load %arg14[%5, %c0] : memref<256x128xbf16, #tpu.memory_space<vmem>>, vector<128x128xbf16>
    %c0_1 = arith.constant 0 : index
    %c0_2 = arith.constant 0 : index
    %7 = vector.load %arg15[%c0_1, %c0_2] : memref<256x128xbf16, #tpu.memory_space<vmem>>, vector<256x128xbf16>
    %cst = arith.constant dense<0.000000e+00> : vector<128x256xf32>
    %8 = tpu.matmul %6, %7, %cst {dimension_numbers = #tpu.dot_dimension_numbers<[1], [1], [0], [0], [0, 0, 1, 0], [], []>} : vector<128x128xbf16>, vector<256x128xbf16>, vector<128x256xf32> -> vector<128x256xf32>
    %cst_3 = arith.constant dense<0xFF800000> : vector<128xf32>
    %9 = vector.multi_reduction <maximumf>, %8, %cst_3 [1] : vector<128x256xf32> to vector<128xf32>
    %10 = vector.shape_cast %9 : vector<128xf32> to vector<128x1xf32>
    %11 = vector.broadcast %10 : vector<128x1xf32> to vector<128x256xf32>
    %12 = arith.subf %8, %11 : vector<128x256xf32>
    %13 = math.exp %12 : vector<128x256xf32>
    %cst_4 = arith.constant dense<0.000000e+00> : vector<128xf32>
    %14 = vector.multi_reduction <add>, %13, %cst_4 [1] : vector<128x256xf32> to vector<128xf32>
    %15 = vector.shape_cast %14 : vector<128xf32> to vector<128x1xf32>
    %16 = arith.truncf %13 : vector<128x256xf32> to vector<128x256xbf16>
    %c0_5 = arith.constant 0 : index
    %c0_6 = arith.constant 0 : index
    %17 = vector.load %arg16[%c0_5, %c0_6] : memref<256x128xbf16, #tpu.memory_space<vmem>>, vector<256x128xbf16>
    %cst_7 = arith.constant dense<0.000000e+00> : vector<128x128xf32>
    %18 = tpu.matmul %16, %17, %cst_7 {dimension_numbers = #tpu.dot_dimension_numbers<[1], [0], [0], [1], [0, 0, 1, 1], [], []>} : vector<128x256xbf16>, vector<256x128xbf16>, vector<128x128xf32> -> vector<128x128xf32>
    %19 = tpu.reciprocal %15 {approx = true} : vector<128x1xf32> -> vector<128x1xf32>
    %20 = vector.broadcast %19 : vector<128x1xf32> to vector<128x128xf32>
    %21 = arith.mulf %18, %20 : vector<128x128xf32>
    %c0_8 = arith.constant 0 : index
    %22 = arith.index_cast %4 : i32 to index
    %c0_9 = arith.constant 0 : index
    %23 = vector.load %arg2[%c0_8, %22, %c0_9] : memref<1x256x128xbf16, #tpu.memory_space<vmem>>, vector<1x128x128xbf16>
    %24 = vector.shape_cast %23 : vector<1x128x128xbf16> to vector<128x128xbf16>
    %25 = arith.extf %24 : vector<128x128xbf16> to vector<128x128xf32>
    %c0_10 = arith.constant 0 : index
    %26 = memref.load %arg12[%c0_10] : memref<1xf32, #tpu.memory_space<smem>>
    %27 = vector.broadcast %26 : f32 to vector<128x128xf32>
    %28 = arith.mulf %27, %21 : vector<128x128xf32>
    %29 = arith.addf %28, %25 : vector<128x128xf32>
    %c0_11 = arith.constant 0 : index
    %c0_12 = arith.constant 0 : index
    %c0_13 = arith.constant 0 : index
    %30 = vector.load %arg13[%c0_11, %c0_12, %c0_13] : memref<1x128x128xf32, #tpu.memory_space<vmem>>, vector<1x128x128xf32>
    %31 = vector.shape_cast %30 : vector<1x128x128xf32> to vector<128x128xf32>
    %32 = vector.shape_cast %29 : vector<128x128xf32> to vector<1x128x128xf32>
    tpu.vector_store %arg13[%c0_11, %c0_12, %c0_13], %32 {strides = array<i32>} : memref<1x128x128xf32, #tpu.memory_space<vmem>>, vector<1x128x128xf32>,
    return
  }
  func.func @transform_0(%arg0: i32, %arg1: i32) -> (i32, i32, i32) {
    %c0_i32 = arith.constant 0 : i32
    %c0_i32_0 = arith.constant 0 : i32
    %c0_i32_1 = arith.constant 0 : i32
    return %arg0, %c0_i32, %c0_i32_0 : i32, i32, i32
  }
  func.func @transform_1(%arg0: i32, %arg1: i32) -> (i32, i32) {
    %c0_i32 = arith.constant 0 : i32
    %c0_i32_0 = arith.constant 0 : i32
    %c0_i32_1 = arith.constant 0 : i32
    return %c0_i32, %c0_i32_0 : i32, i32
  }
  func.func @transform_2(%arg0: i32, %arg1: i32) -> (i32, i32, i32) {
    %c0_i32 = arith.constant 0 : i32
    %c0_i32_0 = arith.constant 0 : i32
    %c0_i32_1 = arith.constant 0 : i32
    %c0_i32_2 = arith.constant 0 : i32
    return %c0_i32, %c0_i32_0, %c0_i32_1 : i32, i32, i32
  }
  func.func @transform_3(%arg0: i32, %arg1: i32) -> (i32, i32, i32) {
    %c0_i32 = arith.constant 0 : i32
    %c0_i32_0 = arith.constant 0 : i32
    %c0_i32_1 = arith.constant 0 : i32
    %c0_i32_2 = arith.constant 0 : i32
    return %c0_i32, %c0_i32_0, %c0_i32_1 : i32, i32, i32
  }
  func.func @transform_4(%arg0: i32, %arg1: i32) -> (i32, i32) {
    %c0_i32 = arith.constant 0 : i32
    %c0_i32_0 = arith.constant 0 : i32
    %c0_i32_1 = arith.constant 0 : i32
    return %c0_i32, %c0_i32_0 : i32, i32
  }
  func.func @transform_5(%arg0: i32, %arg1: i32) -> (i32, i32) {
    %c0_i32 = arith.constant 0 : i32
    %c0_i32_0 = arith.constant 0 : i32
    %c0_i32_1 = arith.constant 0 : i32
    return %c0_i32, %c0_i32_0 : i32, i32
  }
  func.func @transform_6(%arg0: i32, %arg1: i32) -> (i32, i32) {
    %c0_i32 = arith.constant 0 : i32
    %c0_i32_0 = arith.constant 0 : i32
    %c0_i32_1 = arith.constant 0 : i32
    return %c0_i32, %c0_i32_0 : i32, i32
  }
  func.func @transform_7(%arg0: i32, %arg1: i32) -> (i32, i32) {
    %c0_i32 = arith.constant 0 : i32
    %c0_i32_0 = arith.constant 0 : i32
    %c0_i32_1 = arith.constant 0 : i32
    return %c0_i32, %c0_i32_0 : i32, i32
  }
  func.func @transform_8(%arg0: i32, %arg1: i32) -> (i32, i32) {
    %c0_i32 = arith.constant 0 : i32
    %c0_i32_0 = arith.constant 0 : i32
    %c0_i32_1 = arith.constant 0 : i32
    return %c0_i32, %c0_i32_0 : i32, i32
  }
  func.func @transform_9(%arg0: i32, %arg1: i32) -> (i32, i32) {
    %c0_i32 = arith.constant 0 : i32
    %c0_i32_0 = arith.constant 0 : i32
    %c0_i32_1 = arith.constant 0 : i32
    return %c0_i32, %c0_i32_0 : i32, i32
  }
  func.func @transform_10(%arg0: i32, %arg1: i32) -> i32 {
    %c0_i32 = arith.constant 0 : i32
    %c0_i32_0 = arith.constant 0 : i32
    return %c0_i32 : i32
  }
  func.func @transform_11(%arg0: i32, %arg1: i32) -> (i32, i32, i32) {
    %c0_i32 = arith.constant 0 : i32
    %c0_i32_0 = arith.constant 0 : i32
    return %arg0, %arg1, %c0_i32 : i32, i32, i32
  }
}

</mosaic_0001>

<bundles_post_ra>
// kernel: tpu_custom_call.1
= control target key start
LH: loop header
LB: loop body
LE: loop exit
PB: predicated region body
PF: predicated region fallthrough
CT: control target
= control target key end

     0   :  { %s7220_s0 = inlined_call_operand.vmem [shape: bf16[2,256,128], index: 0, kind: input, shape index: {}]   ;;  %s7221_s1 = inlined_call_operand.vmem [shape: f32[256,4], index: 1, kind: input, shape index: {}]   ;;  %s7222_s2 = inlined_call_operand.hbm [shape: bf16[3,128,128], index: 2, kind: input, shape index: {}]   ;;  %s7223_s3 = inlined_call_operand.hbm [shape: bf16[3,128,128], index: 3, kind: input, shape index: {}]   ;;  %s7224_s4 = inlined_call_operand.hbm [shape: bf16[128,128], index: 4, kind: input, shape index: {}]   ;;  %s7225_s5 = inlined_call_operand.vmem [shape: f32[1,128], index: 5, kind: input, shape index: {}]   ;;  %s7226_s6 = inlined_call_operand.vmem [shape: f32[1,128], index: 6, kind: input, shape index: {}]   ;;  %s7227_s7 = inlined_call_operand.vmem [shape: f32[1,128], index: 7, kind: input, shape index: {}]   ;;  %s7228_s8 = inlined_call_operand.vmem [shape: f32[1,128], index: 8, kind: input, shape index: {}]   ;;  %s7229_s9 = inlined_call_operand.vmem [shape: f32[1,128], index: 9, kind: input, shape index: {}]   ;;  %s7230_s10 = inlined_call_operand.<no memory space> [shape: f32[1], index: 10, kind: input, shape index: {}]   ;;  %s7231_s11 = inlined_call_operand.hbm [shape: f32[2,256,128], index: 11, kind: output, shape index: {}]  }
   0x1   :  { %7273 = sst [smem:[#allocation51_spill]] %s7231_s11 }
   0x2   :  { %16 = sst [smem:[#allocation5]] %s7230_s10 }
   0x3   :  { %17 = vsyncpa [#allocation7], 0 }
   0x4   :  { %18 = vsyncpa [#allocation10], 0 }
   0x5   :  { %19 = vsyncpa [#allocation8], 0 }
   0x6   :  { %21 = vsyncpa [#allocation8 + $0x1], 0  ;;  %s5680_s19 = smov 0   ;;  %s5682_s20 = smov 0  }
   0x7   :  { %s5684_s21 = smov 0   ;;  %s5686_s22 = smov 0  }
   0x8   :  { %s5688_s23 = smov 0   ;;  %s5690_s24 = smov 0  }
   0x9   :  { %s5692_s25 = smov 0   ;;  %s5694_s26 = smov 0  }
   0xa LB: > { %7274 = sst [smem:[#allocation16_spill]] %s5575_s19  ;;  %s4184_s10 = sadd.s32 4294967295, %s5603_s26   ;;  %s5603_s26 = sphi %s5694_s26, %s27_s26   ;;  %s5599_s25 = sphi %s5692_s25, %s7360_s25   ;;  %s5595_s24 = sphi %s5690_s24, %s7359_s24   ;;  %s5591_s23 = sphi %s5688_s23, %s7358_s23   ;;  %s5587_s22 = sphi %s5686_s22, %s7357_s22   ;;  %s5583_s21 = sphi %s5684_s21, %s7356_s21   ;;  %s5579_s20 = sphi %s5682_s20, %s7362_s20   ;;  %s5575_s19 = sphi %s5680_s19, %s7361_s19  }
   0xb   : > { %7275 = sst [smem:[#allocation17_spill]] %s5583_s21  ;;  %s4185_s27 = sadd.s32 4294967294, %s5603_s26  }
   0xc   : > { %7276 = sst [smem:[#allocation18_spill]] %s5595_s24  ;;  %s36_s28 = sadd.s32 1, %s5595_s24 }
   0xd   : > { %7277 = sst [smem:[#allocation19_spill]] %s5599_s25  ;;  %s39_s29 = sadd.s32 1, %s5599_s25 }
   0xe   : > { %7278 = sst [smem:[#allocation20_spill]] %s5603_s26  ;;  %p37_p0 = scmp.ge.s32.totalorder %s36_s28, 2 }
   0xf   : > { %s284_s30 = sadd.s32 1, %s5583_s21  ;;  %p294_p1 = scmp.ne.s32.totalorder %s5583_s21, %s5579_s20 }
  0x10   : > { %p295_p2 = scmp.eq.s32.totalorder %s4184_s10, 3  ;;  %s7364_s28 = smov (%p37_p0, %s36_s28), 0 }
  0x11   : > { %7279 = sst [smem:[#allocation21_spill]] %s7364_s28  ;;  %s7366_s29 = smov (!%p37_p0, %s39_s29), %s5599_s25 }
  0x12   : > { %s280_s12 = ssub.s32 %s5595_s24, %s7364_s28  ;;  %p5732_p3 = por %p295_p2, %p294_p1 }
  0x13   : > { %p41_p4 = scmp.ge.s32.totalorder %s7366_s29, 2  ;;  %p300_p5 = scmp.ne.s32.totalorder %s5579_s20, %s5575_s19 }
  0x14   : > { %s7280_s13 = scalar_select %p5732_p3, 1, 0 }
  0x15   : > { %p301_p6 = scmp.eq.s32.totalorder %s4185_s27, 3  ;;  %p4186_p7 = scmp.ge.s32.totalorder %s5603_s26, 1 }
  0x16   : > { %7281 = sst [smem:[#allocation22_spill]] %s7280_s13  ;;  %s7368_s29 = smov (%p41_p4, %s7366_s29), 0 }
  0x17   : > { %7282 = sst [smem:[#allocation23_spill]] %s7368_s29  ;;  %p5741_p8 = por %p301_p6, %p300_p5 }
  0x18   : > { %p308_p9 = scmp.lt.s32.totalorder %s5603_s26, 5  ;;  %s279_s15 = ssub.s32 %s5599_s25, %s7368_s29 }
  0x19   : > { %s7283_s14 = scalar_select %p5741_p8, 1, 0 }
  0x1a   : > { %s281_s16 = sor.u32 %s280_s12, %s279_s15  ;;  %p5748_p10 = pnand %p4186_p7, %p308_p9 }
  0x1b   : > { %7284 = sst [smem:[#allocation24_spill]] %s7283_s14  ;;  %p282_p11 = scmp.eq.s32.totalorder %s281_s16, 0 }
  0x1c   : > { %s7285_s17 = scalar_select %p5748_p10, 1, 0 }
  0x1d   : > { %p5752_p12 = scmp.eq.s32.totalorder %s4184_s10, 0  ;;  %p5083_p13 = pneg %p5748_p10 }
  0x1e   : > { %s5759_s27 = scalar_select %p282_p11, %s5583_s21, %s284_s30  }
  0x1f   : > { %s7286_s18 = scalar_select %p5752_p12, 1, 0 }
  0x20   : > { %7287 = sst [smem:[#allocation25_spill]] %s5759_s27  ;;  %p5763_p0 = pnand %p5752_p12, %p5083_p13 }
  0x21   : > { %s5605_s12 = smov [#allocation9]   ;;  %s5417_s10 = scalar_lea.hbm %s7223_s3, 3072 }
  0x22   : > { %s336_s15 = sshll.u32 %s5605_s12, 4  ;;  %p5418_p1 = scmp.ne.s32.totalorder %s7223_s3, %s5417_s10  ;;  %s337_s15 = int_to_ptr.vmem [resolvable:$true] %s336_s15 }
  0x23   : > { %p5775_p2 = pneg %p5763_p0  ;;  %p5424_p6 = scmp.lt.u32.totalorder %s5417_s10, %s7223_s3 }
  0x25   : > { %p5420_p4 = pnand %p5775_p2, %p5418_p1 }
  0x27   : > { %p5421_p5 = pneg %p5420_p4 }
  0x29   : > { %p5426_p7 = pnand %p5424_p6, %p5421_p5 }
  0x2b   : > { %5429 = shalt.err (!%p5426_p7)
}
  0x2c   : > { %s5430_s29 = scalar_lea.vmem %s337_s15, 3072  ;;  %p5438_p8 = scmp.lt.s32.totalorder %s337_s15, %s337_s15 }
  0x2d   : > { %p5431_p9 = scmp.ne.s32.totalorder %s337_s15, %s5430_s29  ;;  %p5439_p3 = scmp.lt.s32.totalorder %s5430_s29, %s5430_s29 }
  0x2f   : > { %p5433_p11 = pnand %p5431_p9, %p5775_p2  ;;  %p5440_p12 = por %p5439_p3, %p5438_p8 }
  0x31   : > { %p5434_p13 = pneg %p5433_p11 }
  0x33   : > { %p5441_p10 = pnand %p5440_p12, %p5434_p13 }
  0x35   : > { %5444 = shalt.err (!%p5441_p10)
}
  0x36   : > { %s5606_s24 = smov 64   ;;  %s5607_s25 = smov 4  }
  0x37   : > { %5089 = dma.hbm_to_vmem [thread:$0]  (!%p5763_p0), %s7223_s3, 3072, %s337_s15, [#allocation10], %s5606_s24, %s5606_s24, %s5607_s25  }
  0x38   : > { %s5608_s10 = smov [#allocation6]   ;;  %s5609_s21 = smov [#allocation11]  }
  0x39   : > { %s323_s12 = sshll.u32 %s5608_s10, 4  ;;  %s349_s14 = sshll.u32 %s5609_s21, 4  ;;  %s324_s12 = int_to_ptr.vmem [resolvable:$true] %s323_s12  ;;  %s5794_s14 = int_to_ptr.vmem [resolvable:$true] %s349_s14 }
  0x3a   : > { %s5445_s26 = scalar_lea.hbm %s7222_s2, 3072 }
  0x3b   : > { %p5446_p3 = scmp.ne.s32.totalorder %s7222_s2, %s5445_s26  ;;  %p5452_p12 = scmp.lt.u32.totalorder %s5445_s26, %s7222_s2 }
  0x3d   : > { %p5448_p8 = pnand %p5446_p3, %p5775_p2 }
  0x3f   : > { %p5449_p10 = pneg %p5448_p8 }
  0x41   : > { %p5454_p1 = pnand %p5452_p12, %p5449_p10 }
  0x43   : > { %5457 = shalt.err (!%p5454_p1)
}
  0x44   : > { %s5458_s21 = scalar_lea.vmem %s324_s12, 3072  ;;  %p5466_p7 = scmp.lt.s32.totalorder %s324_s12, %s324_s12 }
  0x45   : > { %p5459_p4 = scmp.ne.s32.totalorder %s324_s12, %s5458_s21  ;;  %p5467_p9 = scmp.lt.s32.totalorder %s5458_s21, %s5458_s21 }
  0x47   : > { %p5461_p5 = pnand %p5459_p4, %p5775_p2  ;;  %p5468_p11 = por %p5467_p9, %p5466_p7 }
  0x49   : > { %p5462_p6 = pneg %p5461_p5 }
  0x4b   : > { %p5469_p13 = pnand %p5468_p11, %p5462_p6 }
  0x4d   : > { %5472 = shalt.err (!%p5469_p13)
}
  0x4e   : > { %5086 = dma.hbm_to_vmem [thread:$0]  (!%p5763_p0), %s7222_s2, 3072, %s324_s12, [#allocation7], %s5606_s24, %s5606_s24, %s5607_s25  }
  0x4f   : > { %s5473_s16 = scalar_lea.hbm %s7224_s4, 1024 }
  0x50   : > { %p5474_p3 = scmp.ne.s32.totalorder %s7224_s4, %s5473_s16  ;;  %p5480_p12 = scmp.lt.u32.totalorder %s5473_s16, %s7224_s4 }
  0x52   : > { %p5476_p8 = pnand %p5474_p3, %p5775_p2 }
  0x54   : > { %p5477_p10 = pneg %p5476_p8 }
  0x56   : > { %p5482_p1 = pnand %p5480_p12, %p5477_p10 }
  0x58   : > { %5485 = shalt.err (!%p5482_p1)
}
  0x59   : > { %s5486_s12 = scalar_lea.vmem %s5794_s14, 1024  ;;  %p5494_p7 = scmp.lt.s32.totalorder %s5794_s14, %s5794_s14 }
  0x5a   : > { %p5487_p4 = scmp.ne.s32.totalorder %s5794_s14, %s5486_s12  ;;  %p5495_p9 = scmp.lt.s32.totalorder %s5486_s12, %s5486_s12 }
  0x5c   : > { %p5489_p5 = pnand %p5487_p4, %p5775_p2  ;;  %p5496_p11 = por %p5495_p9, %p5494_p7 }
  0x5e   : > { %p5490_p6 = pneg %p5489_p5 }
  0x60   : > { %p5497_p13 = pnand %p5496_p11, %p5490_p6 }
  0x62   : > { %5500 = shalt.err (!%p5497_p13)
}
  0x63   : > { %5092 = dma.hbm_to_vmem [thread:$0]  (!%p5763_p0), %s7224_s4, 1024, %s5794_s14, [#allocation10], %s5606_s24, %s5606_s24, %s5607_s25  }
  0x64   : > { %p7290_p3 = scmp.ne.s32.totalorder %s7285_s17, 0 }
  0x65   : > { %p7291_p2 = scmp.ne.s32.totalorder (!%p7290_p3), %s7286_s18, 0 }
  0x66   : > { %391 = sbr.rel (%p7290_p3) target bundleno = 1520 (0x5f0), region = 64 }
  0x6d   : > { %5562 = dma.done.wait (%p7291_p2), [#allocation7], 3072  }
  0x6e   : > { %5564 = vsyncadd (%p7291_p2), [#allocation7], 4294964224 }
  0x6f   : > { %5566 = dma.done.wait (%p7291_p2), [#allocation10], 4096  }
  0x70   : > { %5568 = vsyncadd (%p7291_p2), [#allocation10], 4294963200  ;;  %s436_s28 = sand.u32 1, %s5579_s20   ;;  %p439_p0 = scmp.lt.s32.totalorder %s5591_s23, 1 }
  0x71   : > { %s4195_s14 = sshll.u32 %s436_s28, 7  ;;  %p4198_p8 = scmp.ne.s32.totalorder %s5587_s22, 0 }
  0x72   : > { %s440_s17 = scalar_select %p439_p0, %s5591_s23, 1 }
  0x73   : > { %s5863_s26 = scalar_lea.vmem [#allocation12], %s4195_s14  ;;  %449 = sbr.rel (%p4198_p8) target bundleno = 781 (0x30d), region = 80 }
  0x74   : > { %s4285_s30 = sshll.u32 %s440_s17, 7 }
  0x75   : > { %s5861_s19 = scalar_lea.vmem %s7220_s0, %s4285_s30 }
  0x7a   : > { %v5869_v0 = vld [vmem:[%s7221_s1 + $0x10] sm:$0xff]  ;;  %v5874_v1 = vld [vmem:[%s7221_s1] sm:$0xff]  ;;  %v5610_v2 = vmov 0   ;;  %v5881_v3 = vld [vmem:[%s7221_s1 + $0x18] sm:$0xff] }
  0x7b   : > { %5180 = vset.pattern.permute.xlu1 %v5610_v2  ;;  %5179 = vset.pattern.permute.xlu0 %v5610_v2  ;;  %v5886_v4 = vld [vmem:[%s7221_s1 + $0x8] sm:$0xff]  ;;  %v5898_v6 = vld [vmem:[%s7221_s1 + $0x20] sm:$0xff]  ;;  %v5905_v7 = vld [vmem:[%s7221_s1 + $0x38] sm:$0xff] }
  0x7c   : > { %625 = vperm.xlu1 %5180, %v5869_v0   ;;  %615 = vperm.xlu0 %5179, %v5874_v1   ;;  %v5893_v5 = vld [vmem:[%s7221_s1 + $0x28] sm:$0xff]  ;;  %v5910_v8 = vld [vmem:[%s7221_s1 + $0x30] sm:$0xff]  ;;  %v5202_v9 = vld [vmem:[#allocation6 + $0x40] sm:$0xff]  }
  0x7d   : > { %v5203_v10 = vld [vmem:[#allocation6 + $0x48] sm:$0xff]   ;;  %4589 = vmatprep.subr.bf16.mxu0 %v5202_v9  ;;  %4925 = vmatprep.subr.bf16.mxu1 %v5202_v9  ;;  %v5922_v12 = vld [vmem:[%s7221_s1 + $0x40] sm:$0xff]  ;;  %v5204_v13 = vld [vmem:[#allocation6 + $0x50] sm:$0xff]  }
  0x7e   : > { %v5917_v11 = vld [vmem:[%s7221_s1 + $0x48] sm:$0xff]  ;;  %4590 = vmatpush3.bf16.msra.mxu0 %v5202_v9  ;;  %4933 = vmatpush3.bf16.msra.mxu1 %v5202_v9  ;;  %v5929_v14 = vld [vmem:[%s7221_s1 + $0x58] sm:$0xff]  ;;  %v5932_v15 = vld [vmem:[%s5861_s19] sm:$0xff]  }
  0x7f   : > { %4591 = vmatprep.subr.bf16.mxu0 %v5203_v10  ;;  %4926 = vmatprep.subr.bf16.mxu1 %v5203_v10  ;;  %7292 = vst [vmem:[#allocation26_spill] sm:$0xff] %v5932_v15  ;;  %v5937_v16 = vld [vmem:[%s7221_s1 + $0x50] sm:$0xff]  ;;  %v5205_v17 = vld [vmem:[#allocation6 + $0x58] sm:$0xff]   ;;  %v5945_v18 = vld [vmem:[%s7221_s1 + $0x68] sm:$0xff] }
  0x80   : > { %630 = vperm.xlu1 %5180, %v5881_v3   ;;  %620 = vperm.xlu0 %5179, %v5886_v4   ;;  %v5950_v19 = vld [vmem:[%s7221_s1 + $0x60] sm:$0xff]  ;;  %v5957_v21 = vld [vmem:[%s7221_s1 + $0x78] sm:$0xff]  ;;  %v5962_v22 = vld [vmem:[%s7221_s1 + $0x70] sm:$0xff] }
  0x81   : > { %4605 = vmatprep.mubr.bf16.mxu0 %v5932_v15  ;;  %v5206_v20 = vld [vmem:[#allocation6 + $0x60] sm:$0xff]   ;;  %v5207_v24 = vld [vmem:[#allocation6 + $0x68] sm:$0xff]   ;;  %v5208_v27 = vld [vmem:[#allocation6 + $0x70] sm:$0xff]  }
  0x82   : > { %4592 = vmatpush3.bf16.msra.mxu0 %v5203_v10  ;;  %4934 = vmatpush3.bf16.msra.mxu1 %v5203_v10  ;;  %v5965_v23 = vld [vmem:[%s5861_s19 + $0x40] sm:$0xff]   ;;  %v5972_v25 = vld [vmem:[%s7221_s1 + $0x88] sm:$0xff]  ;;  %v5985_v28 = vld [vmem:[%s7221_s1 + $0x98] sm:$0xff] }
  0x83   : > { %4593 = vmatprep.subr.bf16.mxu0 %v5204_v13  ;;  %4927 = vmatprep.subr.bf16.mxu1 %v5204_v13  ;;  %7293 = vst [vmem:[#allocation27_spill] sm:$0xff] %v5965_v23  ;;  %v5977_v26 = vld [vmem:[%s7221_s1 + $0x80] sm:$0xff]  ;;  %v5990_v29 = vld [vmem:[%s7221_s1 + $0x90] sm:$0xff]  ;;  %v5209_v30 = vld [vmem:[#allocation6 + $0x78] sm:$0xff]  }
  0x84   : > { %640 = vperm.xlu1 %5180, %v5893_v5   ;;  %635 = vperm.xlu0 %5179, %v5898_v6   ;;  %v5995_v31 = vld [vmem:[%s7221_s1 + $0xa8] sm:$0xff]  ;;  %v6000_v32 = vld [vmem:[%s7221_s1 + $0xa0] sm:$0xff]  ;;  %v6013_v37 = vld [vmem:[%s7221_s1 + $0xb8] sm:$0xff] }
  0x85   : > { %4621 = vmatprep.mubr.bf16.mxu1 %v5965_v23  ;;  %v6005_v33 = vld [vmem:[%s5861_s19 + $0x8] sm:$0xff]   ;;  %v5212_v34 = vld [vmem:[#allocation6] sm:$0xff]   ;;  %v6016_v38 = vld [vmem:[%s5861_s19 + $0x10] sm:$0xff]  }
  0x86   : > { %4594 = vmatpush3.bf16.msra.mxu0 %v5204_v13  ;;  %4935 = vmatpush3.bf16.msra.mxu1 %v5204_v13  ;;  %7294 = vst [vmem:[#allocation28_spill] sm:$0xff] %v6005_v33  ;;  %v5226_v35 = vld [vmem:[#allocation9 + $0x40] sm:$0xff]   ;;  %v6008_v36 = vld [vmem:[%s5861_s19 + $0x48] sm:$0xff]   ;;  %7296 = vst [vmem:[#allocation30_spill] sm:$0xff] %v6016_v38 }
  0x87   : > { %4595 = vmatprep.subr.bf16.mxu0 %v5205_v17  ;;  %4928 = vmatprep.subr.bf16.mxu1 %v5205_v17  ;;  %7295 = vst [vmem:[#allocation29_spill] sm:$0xff] %v6008_v36  ;;  %v6023_v39 = vld [vmem:[%s7221_s1 + $0xb0] sm:$0xff]  ;;  %v5213_v40 = vld [vmem:[#allocation6 + $0x8] sm:$0xff]   ;;  %v6036_v43 = vld [vmem:[%s7221_s1 + $0xc0] sm:$0xff] }
  0x88   : > { %650 = vperm.xlu1 %5180, %v5905_v7   ;;  %645 = vperm.xlu0 %5179, %v5910_v8   ;;  %v6026_v41 = vld [vmem:[%s5861_s19 + $0x50] sm:$0xff]   ;;  %v6031_v42 = vld [vmem:[%s7221_s1 + $0xc8] sm:$0xff]  ;;  %v6041_v45 = vld [vmem:[%s5861_s19 + $0x18] sm:$0xff]  }
  0x89   : > { %7297 = vst [vmem:[#allocation31_spill] sm:$0xff] %v6026_v41  ;;  %v5229_v44 = vld [vmem:[#allocation9 + $0x48] sm:$0xff]   ;;  %7298 = vst [vmem:[#allocation32_spill] sm:$0xff] %v6041_v45  ;;  %v5216_v46 = vld [vmem:[#allocation6 + $0x10] sm:$0xff]  }
  0x8a   : > { %4596 = vmatpush3.bf16.msra.mxu0 %v5205_v17  ;;  %4936 = vmatpush3.bf16.msra.mxu1 %v5205_v17  ;;  %v6045_v47 = vld [vmem:[%s5861_s19 + $0x20] sm:$0xff]   ;;  %v6049_v48 = vld [vmem:[%s5861_s19 + $0x58] sm:$0xff]   ;;  %v6060_v50 = vld [vmem:[%s7221_s1 + $0xd0] sm:$0xff]  ;;  %v7252_v17 = vmov 2  }
  0x8b   : > { %4597 = vmatprep.subr.bf16.mxu0 %v5206_v20  ;;  %4929 = vmatprep.subr.bf16.mxu1 %v5206_v20  ;;  %7299 = vst [vmem:[#allocation33_spill] sm:$0xff] %v6045_v47  ;;  %7300 = vst [vmem:[#allocation34_spill] sm:$0xff] %v6049_v48  ;;  %v6055_v49 = vld [vmem:[%s7221_s1 + $0xd8] sm:$0xff]  ;;  %v6066_v52 = vld [vmem:[%s5861_s19 + $0x60] sm:$0xff]  }
  0x8c   : > { %660 = vperm.xlu1 %5180, %v5917_v11   ;;  %655 = vperm.xlu0 %5179, %v5922_v12   ;;  %v5217_v51 = vld [vmem:[#allocation6 + $0x18] sm:$0xff]   ;;  %7301 = vst [vmem:[#allocation35_spill] sm:$0xff] %v6066_v52  ;;  %v6071_v53 = vld [vmem:[%s7221_s1 + $0xe8] sm:$0xff]  ;;  %v6076_v54 = vld [vmem:[%s7221_s1 + $0xe0] sm:$0xff] }
  0x8d   : > { %v5232_v55 = vld [vmem:[#allocation9 + $0x50] sm:$0xff]   ;;  %v6081_v56 = vld [vmem:[%s5861_s19 + $0x28] sm:$0xff]   ;;  %v5220_v57 = vld [vmem:[#allocation6 + $0x20] sm:$0xff]  }
  0x8e   : > { %4598 = vmatpush3.bf16.msra.mxu0 %v5206_v20  ;;  %4937 = vmatpush3.bf16.msra.mxu1 %v5206_v20  ;;  %7302 = vst [vmem:[#allocation36_spill] sm:$0xff] %v6081_v56  ;;  %v6085_v58 = vld [vmem:[%s5861_s19 + $0x30] sm:$0xff]   ;;  %v5233_v59 = vld [vmem:[#allocation9 + $0x58] sm:$0xff]   ;;  %v6102_v62 = vld [vmem:[%s5861_s19 + $0x68] sm:$0xff]   ;;  %v7249_v20 = vmov 1  }
  0x8f   : > { %4599 = vmatprep.subr.bf16.mxu0 %v5207_v24  ;;  %4930 = vmatprep.subr.bf16.mxu1 %v5207_v24  ;;  %7303 = vst [vmem:[#allocation37_spill] sm:$0xff] %v6085_v58  ;;  %v6092_v60 = vld [vmem:[%s7221_s1 + $0xf8] sm:$0xff]  ;;  %v6097_v61 = vld [vmem:[%s7221_s1 + $0xf0] sm:$0xff]  ;;  %7304 = vst [vmem:[#allocation38_spill] sm:$0xff] %v6102_v62 }
  0x90   : > { %670 = vperm.xlu1 %5180, %v5929_v14   ;;  %665 = vperm.xlu0 %5179, %v5937_v16   ;;  %v5221_v63 = vld [vmem:[#allocation6 + $0x28] sm:$0xff]   ;;  %v5236_v2 = vld [vmem:[#allocation9 + $0x60] sm:$0xff]   ;;  %v6108_v9 = vld [vmem:[%s5861_s19 + $0x70] sm:$0xff]  }
  0x91   : > { %7305 = vst [vmem:[#allocation39_spill] sm:$0xff] %v6108_v9  ;;  %v6112_v10 = vld [vmem:[%s5861_s19 + $0x38] sm:$0xff]   ;;  %v5225_v13 = vld [vmem:[#allocation6 + $0x30] sm:$0xff]  }
  0x92   : > { %4600 = vmatpush3.bf16.msra.mxu0 %v5207_v24  ;;  %4938 = vmatpush3.bf16.msra.mxu1 %v5207_v24  ;;  %7306 = vst [vmem:[#allocation40_spill] sm:$0xff] %v6112_v10  ;;  %v5237_v24 = vld [vmem:[#allocation9 + $0x68] sm:$0xff]  }
  0x93   : > { %4601 = vmatprep.subr.bf16.mxu0 %v5208_v27  ;;  %4931 = vmatprep.subr.bf16.mxu1 %v5208_v27 }
  0x94   : > { %680 = vperm.xlu1 %5180, %v5945_v18   ;;  %675 = vperm.xlu0 %5179, %v5950_v19  }
  0x96   : > { %4602 = vmatpush3.bf16.msra.mxu0 %v5208_v27  ;;  %4939 = vmatpush3.bf16.msra.mxu1 %v5208_v27  ;;  %v6121_v27 = vld [vmem:[%s5861_s19 + $0x78] sm:$0xff]  }
  0x97   : > { %4603 = vmatprep.subr.bf16.mxu0 %v5209_v30  ;;  %4932 = vmatprep.subr.bf16.mxu1 %v5209_v30  ;;  %7307 = vst [vmem:[#allocation41_spill] sm:$0xff] %v6121_v27 }
  0x98   : > { %690 = vperm.xlu1 %5180, %v5957_v21   ;;  %685 = vperm.xlu0 %5179, %v5962_v22  }
  0x9a   : > { %4604 = vmatpush3.bf16.msra.mxu0 %v5209_v30  ;;  %4940 = vmatpush3.bf16.msra.mxu1 %v5209_v30  ;;  %v5228_v30 = vld [vmem:[#allocation6 + $0x38] sm:$0xff]  }
  0x9b   : > { %4637 = vmatprep.subr.bf16.mxu0 %v5212_v34  ;;  %4733 = vmatprep.subr.bf16.mxu1 %v5226_v35 }
  0x9c   : > { %700 = vperm.xlu1 %5180, %v5972_v25   ;;  %695 = vperm.xlu0 %5179, %v5977_v26  }
  0x9d   : > { %4606 = vmatmul.mubr.bf16.vlgmr.msra.gmra.mrb[0].mxu0 %v6005_v33  ;;  %4622 = vmatmul.mubr.bf16.vlgmr.msra.gmra.mrb[0].mxu1 %v6008_v36 }
  0x9e   : > { %4638 = vmatpush3.bf16.msra.mxu0 %v5212_v34  ;;  %4609 = vmatprep.mubr.bf16.mxu0 %v6016_v38  ;;  %v5240_v34 = vld [vmem:[#allocation9 + $0x70] sm:$0xff]  }
  0x9f   : > { %4639 = vmatprep.subr.bf16.mxu0 %v5213_v40  ;;  %4734 = vmatpush3.bf16.msra.mxu1 %v5226_v35  ;;  %v6130_v35 = vld [vmem:[#allocation6 + $0x80] sm:$0xff]  }
  0xa0   : > { %710 = vperm.xlu1 %5180, %v5985_v28   ;;  %705 = vperm.xlu0 %5179, %v5990_v29  }
  0xa1   : > { %4735 = vmatprep.subr.bf16.mxu1 %v5229_v44  ;;  %4625 = vmatprep.mubr.bf16.mxu1 %v6026_v41 }
  0xa2   : > { %4640 = vmatpush3.bf16.msra.mxu0 %v5213_v40  ;;  %v5246_v40 = vld [vmem:[#allocation9] sm:$0xff]  }
  0xa3   : > { %4641 = vmatprep.subr.bf16.mxu0 %v5216_v46  ;;  %4736 = vmatpush3.bf16.msra.mxu1 %v5229_v44  ;;  %v5248_v44 = vld [vmem:[#allocation9 + $0x8] sm:$0xff]  }
  0xa4   : > { %720 = vperm.xlu1 %5180, %v5995_v31   ;;  %715 = vperm.xlu0 %5179, %v6000_v32  }
  0xa5   : > { %4610 = vmatmul.mubr.bf16.gmra.mrb[4].mxu0 %v6041_v45  ;;  %4626 = vmatmul.mubr.bf16.gmra.mrb[4].mxu1 %v6049_v48 }
  0xa6   : > { %4642 = vmatpush3.bf16.msra.mxu0 %v5216_v46  ;;  %4613 = vmatprep.mubr.bf16.mxu0 %v6045_v47  ;;  %v5250_v46 = vld [vmem:[#allocation9 + $0x10] sm:$0xff]  }
  0xa7   : > { %4643 = vmatprep.subr.bf16.mxu0 %v5217_v51  ;;  %4737 = vmatprep.subr.bf16.mxu1 %v5232_v55 }
  0xa8   : > { %730 = vperm.xlu1 %5180, %v6013_v37   ;;  %725 = vperm.xlu0 %5179, %v6023_v39  }
  0xa9   : > { %4738 = vmatpush3.bf16.msra.mxu1 %v5232_v55  ;;  %4629 = vmatprep.mubr.bf16.mxu1 %v6066_v52  ;;  %v6181_v55 = vunpack.c.l.bf16 %v6005_v33 }
  0xaa   : > { %4644 = vmatpush3.bf16.msra.mxu0 %v5217_v51  ;;  %4739 = vmatprep.subr.bf16.mxu1 %v5233_v59  ;;  %v5254_v51 = vld [vmem:[#allocation9 + $0x20] sm:$0xff]  }
  0xab   : > { %4645 = vmatprep.subr.bf16.mxu0 %v5220_v57 }
  0xac   : > { %740 = vperm.xlu1 %5180, %v6031_v42   ;;  %735 = vperm.xlu0 %5179, %v6036_v43  }
  0xad   : > { %4614 = vmatmul.mubr.bf16.gmra.mrb[8].mxu0 %v6081_v56  ;;  %4740 = vmatpush3.bf16.msra.mxu1 %v5233_v59 }
  0xae   : > { %4646 = vmatpush3.bf16.msra.mxu0 %v5220_v57  ;;  %4617 = vmatprep.mubr.bf16.mxu0 %v6085_v58  ;;  %v6184_v57 = vunpack.c.h.bf16 %v6005_v33 }
  0xaf   : > { %4647 = vmatprep.subr.bf16.mxu0 %v5221_v63  ;;  %4630 = vmatmul.mubr.bf16.gmra.mrb[8].mxu1 %v6102_v62 }
  0xb0   : > { %750 = vperm.xlu1 %5180, %v6055_v49   ;;  %745 = vperm.xlu0 %5179, %v6060_v50  }
  0xb1   : > { %4741 = vmatprep.subr.bf16.mxu1 %v5236_v2  ;;  %4633 = vmatprep.mubr.bf16.mxu1 %v6108_v9 }
  0xb2   : > { %4648 = vmatpush3.bf16.msra.mxu0 %v5221_v63  ;;  %4742 = vmatpush3.bf16.msra.mxu1 %v5236_v2 }
  0xb3   : > { %4649 = vmatprep.subr.bf16.mxu0 %v5225_v13  ;;  %4743 = vmatprep.subr.bf16.mxu1 %v5237_v24 }
  0xb4   : > { %760 = vperm.xlu1 %5180, %v6071_v53   ;;  %755 = vperm.xlu0 %5179, %v6076_v54  }
  0xb5   : > { %4618 = vmatmul.mubr.bf16.gmra.mrb[12].mxu0 %v6112_v10 }
  0xb6   : > { %4650 = vmatpush3.bf16.msra.mxu0 %v5225_v13  ;;  %4744 = vmatpush3.bf16.msra.mxu1 %v5237_v24  ;;  %v6196_v13 = vunpack.c.l.bf16 %v6016_v38  ;;  %v6199_v24 = vunpack.c.h.bf16 %v6016_v38 }
  0xb7   : > { %4651 = vmatprep.subr.bf16.mxu0 %v5228_v30  ;;  %4634 = vmatmul.mubr.bf16.gmra.mrb[12].mxu1 %v6121_v27 }
  0xb8   : > { %770 = vperm.xlu1 %5180, %v6092_v60   ;;  %765 = vperm.xlu0 %5179, %v6097_v61  }
  0xb9   : > { %4745 = vmatprep.subr.bf16.mxu1 %v5240_v34  ;;  %4749 = vmatprep.mubr.bf16.mxu1 %v5932_v15 }
  0xba   : > { %4652 = vmatpush3.bf16.msra.mxu0 %v5228_v30  ;;  %4746 = vmatpush3.bf16.msra.mxu1 %v5240_v34  ;;  %v549_v30 = vrot.slane %v6184_v57, 7 }
  0xbb   : > { %4685 = vmatprep.subr.bf16.mxu0 %v6130_v35 }
  0xbc   : > { %5181 = vset.pattern.permute.xlu1 %v7252_v17  ;;  %5183 = vset.pattern.permute.xlu0 %v7249_v20 }
  0xbd   : > { %1067 = vperm.xlu1 %5181, %v5886_v4   ;;  %891 = vperm.xlu0 %5183, %v5886_v4   ;;  %v5241_v4 = vld [vmem:[#allocation9 + $0x78] sm:$0xff]  }
  0xbe   : > { %4747 = vmatprep.subr.bf16.mxu1 %v5241_v4 }
  0xbf   : > { %4748 = vmatpush3.bf16.msra.mxu1 %v5241_v4 }
  0xc0   : > { %4781 = vmatprep.subr.bf16.mxu1 %v5246_v40 }
  0xc1   : > { %1071 = vperm.xlu1 %5181, %v5869_v0   ;;  %907 = vperm.xlu0 %5183, %v5893_v5  }
  0xc2   : > { %4750 = vmatmul.mubr.bf16.vlgmr.msra.gmra.mrb[16].mxu1 %v6005_v33 }
  0xc3   : > { %4753 = vmatprep.mubr.bf16.mxu1 %v6016_v38  ;;  %4782 = vmatpush3.bf16.msra.mxu1 %v5246_v40 }
  0xc4   : > { %4783 = vmatprep.subr.bf16.mxu1 %v5248_v44 }
  0xc5   : > { %5182 = vset.pattern.permute.xlu1 %v7249_v20  ;;  %923 = vperm.xlu0 %5183, %v5917_v11  }
  0xc6   : > { %887 = vperm.xlu1 %5182, %v5874_v1  }
  0xc7   : > { %4784 = vmatpush3.bf16.msra.mxu1 %v5248_v44  ;;  %v6211_v44 = vunpack.c.l.bf16 %v6041_v45 }
  0xc8   : > { %4785 = vmatprep.subr.bf16.mxu1 %v5250_v46 }
  0xc9   : > { %939 = vperm.xlu0 %5183, %v5945_v18  }
  0xca   : > { %895 = vperm.xlu1 %5182, %v5869_v0   ;;  %v5252_v0 = vld [vmem:[#allocation9 + $0x18] sm:$0xff]   ;;  %4754 = vmatmul.mubr.bf16.gmra.mrb[20].mxu1 %v6041_v45 }
  0xcb   : > { %4757 = vmatprep.mubr.bf16.mxu1 %v6045_v47  ;;  %4786 = vmatpush3.bf16.msra.mxu1 %v5250_v46  ;;  %v6214_v46 = vunpack.c.h.bf16 %v6041_v45 }
  0xcc   : > { %4787 = vmatprep.subr.bf16.mxu1 %v5252_v0 }
  0xcd   : > { %955 = vperm.xlu0 %5183, %v5972_v25  }
  0xce   : > { %899 = vperm.xlu1 %5182, %v5881_v3  }
  0xcf   : > { %4788 = vmatpush3.bf16.msra.mxu1 %v5252_v0 }
  0xd0   : > { %4789 = vmatprep.subr.bf16.mxu1 %v5254_v51 }
  0xd1   : > { %971 = vperm.xlu0 %5183, %v5995_v31  }
  0xd2   : > { %5184 = vset.pattern.permute.xlu1 %v7252_v17  ;;  %4758 = vmatmul.mubr.bf16.gmra.mrb[24].mxu1 %v6081_v56 }
  0xd3   : > { %1083 = vperm.xlu1 %5184, %v5893_v5   ;;  %v5255_v5 = vld [vmem:[#allocation9 + $0x28] sm:$0xff]   ;;  %4761 = vmatprep.mubr.bf16.mxu1 %v6085_v58 }
  0xd4   : > { %4790 = vmatpush3.bf16.msra.mxu1 %v5254_v51 }
  0xd5   : > { %5194 = vset.pattern.permute.xlu0 %v7252_v17  ;;  %4791 = vmatprep.subr.bf16.mxu1 %v5255_v5 }
  0xd6   : > { %1063 = vperm.xlu0 %5194, %v5874_v1   ;;  %v5256_v1 = vld [vmem:[#allocation9 + $0x30] sm:$0xff]  }
  0xd7   : > { %1087 = vperm.xlu1 %5184, %v5910_v8  }
  0xd8   : > { %4792 = vmatpush3.bf16.msra.mxu1 %v5255_v5  ;;  %v550_v5 = vrot.slane %v6196_v13, 7 }
  0xd9   : > { %4793 = vmatprep.subr.bf16.mxu1 %v5256_v1 }
  0xda   : > { %1075 = vperm.xlu0 %5194, %v5881_v3   ;;  %v5257_v3 = vld [vmem:[#allocation9 + $0x38] sm:$0xff]   ;;  %4762 = vmatmul.mubr.bf16.gmra.mrb[28].mxu1 %v6112_v10 }
  0xdb   : > { %5185 = vset.pattern.permute.xlu1 %v7249_v20  ;;  %4765 = vmatprep.mubr.bf16.mxu1 %v5965_v23 }
  0xdc   : > { %903 = vperm.xlu1 %5185, %v5898_v6   ;;  %4794 = vmatpush3.bf16.msra.mxu1 %v5256_v1  ;;  %v551_v1 = vrot.slane %v6199_v24, 7 }
  0xdd   : > { %4795 = vmatprep.subr.bf16.mxu1 %v5257_v3 }
  0xde   : > { %1079 = vperm.xlu0 %5194, %v5898_v6   ;;  %v578_v6 = vlaneseq }
  0xe0   : > { %911 = vperm.xlu1 %5185, %v5910_v8   ;;  %4796 = vmatpush3.bf16.msra.mxu1 %v5257_v3  ;;  %v6175_v8 = vunpack.c.h.bf16 %v6121_v27 }
  0xe2   : > { %1091 = vperm.xlu0 %5194, %v5905_v7   ;;  %4766 = vmatmul.mubr.bf16.gmra.mrb[32].mxu1 %v6008_v36  ;;  %7308 = vst [vmem:[#allocation42_spill] sm:$0xff] %v6175_v8  ;;  %v7248_v63 = vrot.slane %v6175_v8, 7 }
  0xe3   : > { %4769 = vmatprep.mubr.bf16.mxu1 %v6026_v41 }
  0xe4   : > { %915 = vperm.xlu1 %5185, %v5905_v7   ;;  %v6172_v7 = vunpack.c.l.bf16 %v5932_v15 }
  0xe6   : > { %1095 = vperm.xlu0 %5194, %v5922_v12   ;;  %v546_v59 = vrot.slane %v6172_v7, 7 }
  0xe8   : > { %5186 = vset.pattern.permute.xlu1 %v7252_v17 }
  0xe9   : > { %1099 = vperm.xlu1 %5186, %v5917_v11   ;;  %v6178_v11 = vunpack.c.h.bf16 %v5932_v15  ;;  %v5261_v15 = vld [vmem:[#allocation11 + $0x8] sm:$0xff]  }
  0xea   : > { %1107 = vperm.xlu0 %5194, %v5929_v14   ;;  %4770 = vmatmul.mubr.bf16.gmra.mrb[36].mxu1 %v6049_v48 }
  0xeb   : > { %v547_v2 = vrot.slane %v6178_v11, 7  ;;  %4773 = vmatprep.mubr.bf16.mxu1 %v6066_v52 }
  0xed   : > { %1103 = vperm.xlu1 %5186, %v5937_v16  }
  0xee   : > { %1111 = vperm.xlu0 %5194, %v5950_v19  }
  0xf1   : > { %5187 = vset.pattern.permute.xlu1 %v7249_v20 }
  0xf2   : > { %919 = vperm.xlu1 %5187, %v5922_v12   ;;  %1123 = vperm.xlu0 %5194, %v5957_v21   ;;  %v6187_v12 = vshrl.u32 %v578_v6, 7  ;;  %v6227_v6 = vunpack.c.l.bf16 %v6045_v47 }
  0xf3   : > { %4774 = vmatmul.mubr.bf16.gmra.mrb[40].mxu1 %v6102_v62 }
  0xf4   : > { %vm580_vm0 = vcmp.lt.s32.totalorder %v6187_v12, 1  ;;  %4777 = vmatprep.mubr.bf16.mxu1 %v6108_v9  ;;  %vm853_vm1 = vcmp.lt.s32.totalorder %v6187_v12, 7 }
  0xf5   : > { %v612_v40 = vsel %vm580_vm0, %v7248_v63, %v546_v59 }
  0xf6   : > { %927 = vperm.xlu1 %5187, %v5937_v16   ;;  %1127 = vperm.xlu0 %5194, %v5977_v26   ;;  %v548_v16 = vrot.slane %v6181_v55, 7 }
  0xf8   : > { %v610_v0 = vsel %vm580_vm0, %v547_v2, %v548_v16  ;;  %v609_v51 = vsel %vm580_vm0, %v548_v16, %v549_v30 }
  0xfa   : > { %931 = vperm.xlu1 %5187, %v5929_v14   ;;  %1139 = vperm.xlu0 %5194, %v5985_v28   ;;  %v611_v14 = vsel %vm580_vm0, %v546_v59, %v547_v2  ;;  %v6232_v2 = vunpack.c.h.bf16 %v6045_v47 }
  0xfb   : > { %v626_v34 = vpop.permute.xlu1 %625  ;;  %v616_v4 = vpop.permute.xlu0 %615  ;;  %4778 = vmatmul.mubr.bf16.gmra.mrb[44].mxu1 %v6121_v27 }
  0xfc   : > { %v773_v3 = vmul.f32 %v616_v4, %v612_v40  ;;  %v775_v16 = vmul.f32 %v626_v34, %v610_v0  ;;  %v608_v4 = vsel %vm580_vm0, %v549_v30, %v550_v5  ;;  %v552_v40 = vrot.slane %v6211_v44, 7  ;;  %v5243_v34 = vld [vmem:[#allocation6 + $0x88] sm:$0xff]  }
  0xfd   : > { %v6247_v0 = vunpack.c.h.bf16 %v6081_v56 }
  0xfe   : > { %5188 = vset.pattern.permute.xlu1 %v7252_v17  ;;  %1143 = vperm.xlu0 %5194, %v6000_v32   ;;  %v607_v32 = vsel %vm580_vm0, %v550_v5, %v551_v1  ;;  %v555_v5 = vrot.slane %v6232_v2, 7 }
  0xff   : > { %v631_v63 = vpop.permute.xlu1 %630  ;;  %1115 = vperm.xlu1 %5188, %v5945_v18   ;;  %v621_v59 = vpop.permute.xlu0 %620  ;;  %v553_v18 = vrot.slane %v6214_v46, 7 }
 0x100   : > { %v776_v20 = vmul.f32 %v631_v63, %v609_v51  ;;  %v774_v45 = vmul.f32 %v621_v59, %v611_v14  ;;  %v6244_v14 = vunpack.c.l.bf16 %v6081_v56 }
 0x102   : > { %v806_v17 = vpack.c.bf16 %v776_v20, %v775_v16  ;;  %v805_v38 = vpack.c.bf16 %v774_v45, %v773_v3  ;;  %1155 = vperm.xlu0 %5194, %v6013_v37   ;;  %v605_v45 = vsel %vm580_vm0, %v552_v40, %v553_v18  ;;  %v606_v37 = vsel %vm580_vm0, %v551_v1, %v552_v40 }
 0x103   : > { %v641_v47 = vpop.permute.xlu1 %640  ;;  %1119 = vperm.xlu1 %5188, %v5962_v22   ;;  %v636_v63 = vpop.permute.xlu0 %635  ;;  %v554_v20 = vrot.slane %v6227_v6, 7  ;;  %v6259_v16 = vunpack.c.l.bf16 %v6085_v58  ;;  %v6262_v1 = vunpack.c.h.bf16 %v6085_v58  ;;  %v556_v40 = vrot.slane %v6244_v14, 7 }
 0x104   : > { %v778_v30 = vmul.f32 %v641_v47, %v607_v32  ;;  %v777_v51 = vmul.f32 %v636_v63, %v608_v4  ;;  %4653 = vmatprep.mubr.bf16.mxu0 %v805_v38  ;;  %v7309_v47 = vmov 1   ;;  %v557_v63 = vrot.slane %v6247_v0, 7 }
 0x105   : > { %4654 = vmatmul.mubr.bf16.vlgmr.msra.gmra.mrb[0].mxu0 %v806_v17  ;;  %v5244_v17 = vld [vmem:[#allocation6 + $0x90] sm:$0xff]  }
 0x106   : > { %v807_v3 = vpack.c.bf16 %v778_v30, %v777_v51  ;;  %1159 = vperm.xlu0 %5194, %v6036_v43   ;;  %4686 = vmatpush3.bf16.msra.mxu0 %v6130_v35  ;;  %v603_v43 = vsel %vm580_vm0, %v554_v20, %v555_v5  ;;  %v604_v35 = vsel %vm580_vm0, %v553_v18, %v554_v20 }
 0x107   : > { %v651_v59 = vpop.permute.xlu1 %650  ;;  %5189 = vset.pattern.permute.xlu1 %v7309_v47  ;;  %v646_v38 = vpop.permute.xlu0 %645  ;;  %4687 = vmatprep.subr.bf16.mxu0 %v5243_v34 }
 0x108   : > { %v780_v32 = vmul.f32 %v651_v59, %v605_v45  ;;  %v779_v4 = vmul.f32 %v646_v38, %v606_v37  ;;  %935 = vperm.xlu1 %5189, %v5950_v19   ;;  %4657 = vmatprep.mubr.bf16.mxu0 %v807_v3  ;;  %v5245_v19 = vld [vmem:[#allocation6 + $0x98] sm:$0xff]   ;;  %v6274_v37 = vunpack.c.l.bf16 %v6112_v10  ;;  %v6277_v3 = vunpack.c.h.bf16 %v6112_v10 }
 0x109   : > { %v601_v59 = vsel %vm580_vm0, %v556_v40, %v557_v63  ;;  %v558_v38 = vrot.slane %v6259_v16, 7 }
 0x10a   : > { %v808_v30 = vpack.c.bf16 %v780_v32, %v779_v4  ;;  %1171 = vperm.xlu0 %5194, %v6055_v49   ;;  %4688 = vmatpush3.bf16.msra.mxu0 %v5243_v34  ;;  %v602_v34 = vsel %vm580_vm0, %v555_v5, %v556_v40  ;;  %v559_v32 = vrot.slane %v6262_v1, 7 }
 0x10b   : > { %v661_v51 = vpop.permute.xlu1 %660  ;;  %v656_v45 = vpop.permute.xlu0 %655  ;;  %4689 = vmatprep.subr.bf16.mxu0 %v5244_v17 }
 0x10c   : > { %v782_v18 = vmul.f32 %v661_v51, %v603_v43  ;;  %v781_v20 = vmul.f32 %v656_v45, %v604_v35  ;;  %943 = vperm.xlu1 %5189, %v5962_v22   ;;  %v5247_v35 = vld [vmem:[#allocation6 + $0xa0] sm:$0xff]   ;;  %v6288_v22 = vunpack.c.l.bf16 %v5965_v23  ;;  %v599_v40 = vsel %vm580_vm0, %v558_v38, %v559_v32 }
 0x10d   : > { %4658 = vmatmul.mubr.bf16.gmra.mrb[4].mxu0 %v808_v30  ;;  %v6291_v30 = vunpack.c.h.bf16 %v5965_v23  ;;  %v561_v45 = vrot.slane %v6277_v3, 7 }
 0x10e   : > { %v809_v4 = vpack.c.bf16 %v782_v18, %v781_v20  ;;  %1175 = vperm.xlu0 %5194, %v6076_v54   ;;  %4690 = vmatpush3.bf16.msra.mxu0 %v5244_v17  ;;  %v600_v54 = vsel %vm580_vm0, %v557_v63, %v558_v38  ;;  %v560_v17 = vrot.slane %v6274_v37, 7  ;;  %v7310_v38 = vmov 2  }
 0x10f   : > { %v671_v10 = vpop.permute.xlu1 %670  ;;  %v666_v43 = vpop.permute.xlu0 %665  ;;  %4691 = vmatprep.subr.bf16.mxu0 %v5245_v19 }
 0x110   : > { %v784_v51 = vmul.f32 %v671_v10, %v601_v59  ;;  %v783_v5 = vmul.f32 %v666_v43, %v602_v34  ;;  %947 = vperm.xlu1 %5189, %v5957_v21   ;;  %4661 = vmatprep.mubr.bf16.mxu0 %v809_v4  ;;  %v5249_v59 = vld [vmem:[#allocation6 + $0xa8] sm:$0xff]   ;;  %v6302_v21 = vunpack.c.l.bf16 %v6008_v36  ;;  %v6305_v34 = vunpack.c.h.bf16 %v6008_v36 }
 0x111   : > { %v598_v43 = vsel %vm580_vm0, %v559_v32, %v560_v17 }
 0x112   : > { %v810_v18 = vpack.c.bf16 %v784_v51, %v783_v5  ;;  %1187 = vperm.xlu0 %5194, %v6092_v60   ;;  %4692 = vmatpush3.bf16.msra.mxu0 %v5245_v19  ;;  %v597_v19 = vsel %vm580_vm0, %v560_v17, %v561_v45  ;;  %v562_v51 = vrot.slane %v6288_v22, 7  ;;  %v563_v5 = vrot.slane %v6291_v30, 7 }
 0x113   : > { %v681_v20 = vpop.permute.xlu1 %680  ;;  %v676_v10 = vpop.permute.xlu0 %675  ;;  %4693 = vmatprep.subr.bf16.mxu0 %v5247_v35 }
 0x114   : > { %v786_v4 = vmul.f32 %v681_v20, %v599_v40  ;;  %v785_v63 = vmul.f32 %v676_v10, %v600_v54  ;;  %5190 = vset.pattern.permute.xlu1 %v7310_v38  ;;  %v6321_v20 = vunpack.c.h.bf16 %v6026_v41  ;;  %v596_v10 = vsel %vm580_vm0, %v561_v45, %v562_v51 }
 0x115   : > { %1131 = vperm.xlu1 %5190, %v5972_v25   ;;  %4662 = vmatmul.mubr.bf16.gmra.mrb[8].mxu0 %v810_v18  ;;  %v5251_v25 = vld [vmem:[#allocation6 + $0xb0] sm:$0xff]   ;;  %v6318_v18 = vunpack.c.l.bf16 %v6026_v41  ;;  %v6331_v41 = vunpack.c.l.bf16 %v6049_v48 }
 0x116   : > { %v811_v23 = vpack.c.bf16 %v786_v4, %v785_v63  ;;  %5198 = vset.pattern.permute.xlu0 %v7309_v47  ;;  %4694 = vmatpush3.bf16.msra.mxu0 %v5247_v35  ;;  %v595_v35 = vsel %vm580_vm0, %v562_v51, %v563_v5  ;;  %v564_v4 = vrot.slane %v6302_v21, 7  ;;  %v565_v63 = vrot.slane %v6305_v34, 7 }
 0x117   : > { %v691_v40 = vpop.permute.xlu1 %690  ;;  %v686_v54 = vpop.permute.xlu0 %685  ;;  %987 = vperm.xlu0 %5198, %v6031_v42   ;;  %4695 = vmatprep.subr.bf16.mxu0 %v5249_v59 }
 0x118   : > { %v788_v32 = vmul.f32 %v691_v40, %v597_v19  ;;  %v787_v17 = vmul.f32 %v686_v54, %v598_v43  ;;  %4665 = vmatprep.mubr.bf16.mxu0 %v811_v23  ;;  %v5253_v23 = vld [vmem:[#allocation6 + $0xb8] sm:$0xff]   ;;  %v6335_v40 = vunpack.c.h.bf16 %v6049_v48  ;;  %v594_v51 = vsel %vm580_vm0, %v563_v5, %v564_v4 }
 0x119   : > { %1135 = vperm.xlu1 %5190, %v5990_v29  }
 0x11a   : > { %v812_v36 = vpack.c.bf16 %v788_v32, %v787_v17  ;;  %4696 = vmatpush3.bf16.msra.mxu0 %v5249_v59  ;;  %v593_v59 = vsel %vm580_vm0, %v564_v4, %v565_v63  ;;  %v566_v32 = vrot.slane %v6318_v18, 7  ;;  %v567_v17 = vrot.slane %v6321_v20, 7 }
 0x11b   : > { %v701_v19 = vpop.permute.xlu1 %700  ;;  %v696_v43 = vpop.permute.xlu0 %695  ;;  %1003 = vperm.xlu0 %5198, %v6071_v53   ;;  %4697 = vmatprep.subr.bf16.mxu0 %v5251_v25 }
 0x11c   : > { %v790_v54 = vmul.f32 %v701_v19, %v595_v35  ;;  %v789_v45 = vmul.f32 %v696_v43, %v596_v10  ;;  %v7262_v10 = vmov 3   ;;  %v6350_v19 = vunpack.c.h.bf16 %v6066_v52 }
 0x11d   : > { %5191 = vset.pattern.permute.xlu1 %v7309_v47  ;;  %4666 = vmatmul.mubr.bf16.gmra.mrb[12].mxu0 %v812_v36  ;;  %v6347_v36 = vunpack.c.l.bf16 %v6066_v52  ;;  %v592_v43 = vsel %vm580_vm0, %v565_v63, %v566_v32  ;;  %v5291_v63 = vld [vmem:[%s7221_s1 + $0x18] sm:$0xff] }
 0x11e   : > { %v813_v58 = vpack.c.bf16 %v790_v54, %v789_v45  ;;  %951 = vperm.xlu1 %5191, %v5977_v26   ;;  %4698 = vmatpush3.bf16.msra.mxu0 %v5251_v25  ;;  %v5290_v26 = vld [vmem:[%s7221_s1] sm:$0xff]  ;;  %v591_v25 = vsel %vm580_vm0, %v566_v32, %v567_v17  ;;  %v568_v54 = vrot.slane %v6331_v41, 7  ;;  %v569_v45 = vrot.slane %v6335_v40, 7 }
 0x11f   : > { %v711_v48 = vpop.permute.xlu1 %710  ;;  %v706_v35 = vpop.permute.xlu0 %705  ;;  %5200 = vset.pattern.permute.xlu0 %v7262_v10  ;;  %4699 = vmatprep.subr.bf16.mxu0 %v5253_v23  ;;  %v570_v32 = vrot.slane %v6347_v36, 7 }
 0x120   : > { %v792_v5 = vmul.f32 %v711_v48, %v593_v59  ;;  %v791_v4 = vmul.f32 %v706_v35, %v594_v51  ;;  %4669 = vmatprep.mubr.bf16.mxu0 %v813_v58  ;;  %1239 = vperm.xlu0 %5200, %v5290_v26   ;;  %v6363_v59 = vunpack.c.l.bf16 %v6102_v62  ;;  %v6366_v51 = vunpack.c.h.bf16 %v6102_v62 }
 0x121   : > { %v824_v62 = vrot.slane %v6184_v57, 1 }
 0x122   : > { %v814_v10 = vpack.c.bf16 %v792_v5, %v791_v4  ;;  %959 = vperm.xlu1 %5191, %v5990_v29   ;;  %4700 = vmatpush3.bf16.msra.mxu0 %v5253_v23  ;;  %v589_v29 = vsel %vm580_vm0, %v568_v54, %v569_v45  ;;  %v590_v23 = vsel %vm580_vm0, %v567_v17, %v568_v54  ;;  %v571_v5 = vrot.slane %v6350_v19, 7  ;;  %v5292_v17 = vld [vmem:[%s7221_s1 + $0x28] sm:$0xff] }
 0x123   : > { %v721_v48 = vpop.permute.xlu1 %720  ;;  %v716_v58 = vpop.permute.xlu0 %715 }
 0x124   : > { %v794_v35 = vmul.f32 %v721_v48, %v591_v25  ;;  %v793_v26 = vmul.f32 %v716_v58, %v592_v43  ;;  %1251 = vperm.xlu0 %5200, %v5291_v63   ;;  %v6379_v48 = vunpack.c.l.bf16 %v6108_v9  ;;  %v587_v54 = vsel %vm580_vm0, %v570_v32, %v571_v5 }
 0x125   : > { %4670 = vmatmul.mubr.bf16.gmra.mrb[16].mxu0 %v814_v10  ;;  %v6382_v10 = vunpack.c.h.bf16 %v6108_v9 }
 0x126   : > { %v815_v4 = vpack.c.bf16 %v794_v35, %v793_v26  ;;  %963 = vperm.xlu1 %5191, %v5985_v28   ;;  %v588_v28 = vsel %vm580_vm0, %v569_v45, %v570_v32  ;;  %v572_v35 = vrot.slane %v6363_v59, 7  ;;  %v573_v26 = vrot.slane %v6366_v51, 7  ;;  %v5293_v45 = vld [vmem:[%s7221_s1 + $0x38] sm:$0xff] }
 0x127   : > { %v731_v25 = vpop.permute.xlu1 %730  ;;  %v726_v43 = vpop.permute.xlu0 %725 }
 0x128   : > { %v796_v58 = vmul.f32 %v731_v25, %v589_v29  ;;  %v795_v63 = vmul.f32 %v726_v43, %v590_v23  ;;  %4673 = vmatprep.mubr.bf16.mxu0 %v815_v4  ;;  %1259 = vperm.xlu0 %5200, %v5292_v17   ;;  %v6396_v4 = vunpack.c.l.bf16 %v6121_v27  ;;  %v585_v32 = vsel %vm580_vm0, %v572_v35, %v573_v26 }
 0x12a   : > { %v816_v9 = vpack.c.bf16 %v796_v58, %v795_v63  ;;  %5192 = vset.pattern.permute.xlu1 %v7310_v38  ;;  %v586_v58 = vsel %vm580_vm0, %v571_v5, %v572_v35  ;;  %v575_v63 = vrot.slane %v6382_v10, 7 }
 0x12b   : > { %v741_v29 = vpop.permute.xlu1 %740  ;;  %1147 = vperm.xlu1 %5192, %v5995_v31   ;;  %v736_v23 = vpop.permute.xlu0 %735  ;;  %v574_v31 = vrot.slane %v6379_v48, 7 }
 0x12c   : > { %v798_v25 = vmul.f32 %v741_v29, %v587_v54  ;;  %v797_v43 = vmul.f32 %v736_v23, %v588_v28  ;;  %1267 = vperm.xlu0 %5200, %v5293_v45   ;;  %v576_v23 = vrot.slane %v6396_v4, 7 }
 0x12d   : > { %4674 = vmatmul.mubr.bf16.gmra.mrb[20].mxu0 %v816_v9  ;;  %v5294_v9 = vld [vmem:[%s7221_s1 + $0x48] sm:$0xff]  ;;  %v583_v5 = vsel %vm580_vm0, %v574_v31, %v575_v63  ;;  %v584_v35 = vsel %vm580_vm0, %v573_v26, %v574_v31  ;;  %v5296_v26 = vld [vmem:[%s7221_s1 + $0x58] sm:$0xff]  ;;  %v7311_v31 = vrot.slane %v6175_v8, 7 }
 0x12e   : > { %v817_v17 = vpack.c.bf16 %v798_v25, %v797_v43 }
 0x12f   : > { %v751_v27 = vpop.permute.xlu1 %750  ;;  %1151 = vperm.xlu1 %5192, %v6023_v39   ;;  %v746_v54 = vpop.permute.xlu0 %745 }
 0x130   : > { %v800_v28 = vmul.f32 %v751_v27, %v585_v32  ;;  %v799_v29 = vmul.f32 %v746_v54, %v586_v58  ;;  %4677 = vmatprep.mubr.bf16.mxu0 %v817_v17  ;;  %1275 = vperm.xlu0 %5200, %v5294_v9   ;;  %v6420_v58 = vld [vmem:[%s7221_s1 + $0xa0] sm:$0xff]  ;;  %v581_v17 = vsel %vm580_vm0, %v576_v23, %v7311_v31  ;;  %v5299_v31 = vld [vmem:[%s7221_s1 + $0x78] sm:$0xff] }
 0x131   : > { %v582_v54 = vsel %vm580_vm0, %v575_v63, %v576_v23  ;;  %v5298_v23 = vld [vmem:[%s7221_s1 + $0xb8] sm:$0xff] }
 0x132   : > { %v818_v25 = vpack.c.bf16 %v800_v28, %v799_v29  ;;  %v6432_v29 = vld [vmem:[#allocation9 + $0x80] sm:$0xff]  }
 0x133   : > { %v761_v43 = vpop.permute.xlu1 %760  ;;  %5193 = vset.pattern.permute.xlu1 %v7309_v47  ;;  %v756_v27 = vpop.permute.xlu0 %755  ;;  %4829 = vmatprep.subr.bf16.mxu1 %v6432_v29 }
 0x134   : > { %v802_v45 = vmul.f32 %v761_v43, %v583_v5  ;;  %v801_v32 = vmul.f32 %v756_v27, %v584_v35  ;;  %967 = vperm.xlu1 %5193, %v6420_v58   ;;  %1283 = vperm.xlu0 %5200, %v5296_v26   ;;  %v5259_v27 = vld [vmem:[#allocation11] sm:$0xff]  }
 0x135   : > { %4678 = vmatmul.mubr.bf16.gmra.mrb[24].mxu0 %v818_v25  ;;  %v5297_v25 = vld [vmem:[%s7221_s1 + $0x68] sm:$0xff]  ;;  %4877 = vmatprep.subr.bf16.mxu0 %v5259_v27 }
 0x136   : > { %v819_v28 = vpack.c.bf16 %v802_v45, %v801_v32  ;;  %v823_v32 = vrot.slane %v6181_v55, 1 }
 0x137   : > { %v771_v9 = vpop.permute.xlu1 %770  ;;  %v766_v5 = vpop.permute.xlu0 %765 }
 0x138   : > { %v804_v35 = vmul.f32 %v771_v9, %v581_v17  ;;  %v803_v43 = vmul.f32 %v766_v5, %v582_v54  ;;  %975 = vperm.xlu1 %5193, %v6023_v39   ;;  %4681 = vmatprep.mubr.bf16.mxu0 %v819_v28  ;;  %v822_v39 = vrot.slane %v6178_v11, 1  ;;  %v7268_v17 = vrot.slane %v6172_v7, 1  ;;  %v5300_v5 = vld [vmem:[%s7221_s1 + $0x88] sm:$0xff] }
 0x139   : > { %1291 = vperm.xlu0 %5200, %v5297_v25  }
 0x13a   : > { %v820_v26 = vpack.c.bf16 %v804_v35, %v803_v43  ;;  %v883_v9 = vsel %vm853_vm1, %v822_v39, %v823_v32  ;;  %v884_v35 = vsel %vm853_vm1, %v7268_v17, %v822_v39  ;;  %v5302_v39 = vld [vmem:[%s7221_s1 + $0xa8] sm:$0xff] }
 0x13c   : > { %v1068_v63 = vpop.permute.xlu1 %1067  ;;  %979 = vperm.xlu1 %5193, %v5298_v23   ;;  %v892_v45 = vpop.permute.xlu0 %891 }
 0x13d   : > { %4682 = vmatmul.mubr.bf16.gmra.mrb[28].mxu0 %v820_v26  ;;  %1299 = vperm.xlu0 %5200, %v5299_v31   ;;  %v1015_v43 = vmul.f32 %v892_v45, %v883_v9  ;;  %v6479_v9 = vld [vmem:[%s7221_s1 + $0xc0] sm:$0xff] }
 0x140   : > { %v6449_v54 = vpop.permute.xlu1 %1071  ;;  %5195 = vset.pattern.permute.xlu1 %v7310_v38  ;;  %v908_v28 = vpop.permute.xlu0 %907 }
 0x141   : > { %1163 = vperm.xlu1 %5195, %v6031_v42   ;;  %1307 = vperm.xlu0 %5200, %v5300_v5   ;;  %v5301_v42 = vld [vmem:[%s7221_s1 + $0x98] sm:$0xff]  ;;  %v825_v5 = vrot.slane %v6196_v13, 1 }
 0x144   : > { %v6462_v25 = vpop.permute.xlu0 %923 }
 0x145   : > { %1167 = vperm.xlu1 %5195, %v6060_v50   ;;  %v888_v26 = vpop.permute.xlu1 %887  ;;  %1315 = vperm.xlu0 %5200, %v5301_v42  }
 0x146   : > { %v1014_v31 = vmul.f32 %v888_v26, %v884_v35  ;;  %v882_v35 = vsel %vm853_vm1, %v823_v32, %v824_v62  ;;  %v826_v32 = vrot.slane %v6199_v24, 1 }
 0x148   : > { %v1046_v52 = vpack.c.bf16 %v1015_v43, %v1014_v31  ;;  %v6470_v56 = vpop.permute.xlu0 %939  ;;  %v881_v43 = vsel %vm853_vm1, %v824_v62, %v825_v5 }
 0x149   : > { %5196 = vset.pattern.permute.xlu1 %v7309_v47  ;;  %v896_v45 = vpop.permute.xlu1 %895  ;;  %1323 = vperm.xlu0 %5200, %v5302_v39  }
 0x14a   : > { %983 = vperm.xlu1 %5196, %v6479_v9   ;;  %4701 = vmatprep.mubr.bf16.mxu0 %v1046_v52  ;;  %v1016_v31 = vmul.f32 %v896_v45, %v882_v35  ;;  %v5304_v52 = vld [vmem:[%s7221_s1 + $0xc8] sm:$0xff]  ;;  %v5305_v35 = vld [vmem:[%s7221_s1 + $0xd8] sm:$0xff] }
 0x14c   : > { %v6486_v26 = vpop.permute.xlu0 %955 }
 0x14d   : > { %v900_v42 = vpop.permute.xlu1 %899  ;;  %1331 = vperm.xlu0 %5200, %v5298_v23   ;;  %v827_v23 = vrot.slane %v6211_v44, 1 }
 0x14e   : > { %v1017_v39 = vmul.f32 %v900_v42, %v881_v43  ;;  %991 = vperm.xlu1 %5196, %v6060_v50   ;;  %v5263_v50 = vld [vmem:[#allocation11 + $0x10] sm:$0xff]   ;;  %v1191_v43 = vmul.f32 %v1068_v63, %v6175_v8  ;;  %v1192_v63 = vmul.f32 %v6449_v54, %v6172_v7  ;;  %v828_v8 = vrot.slane %v6214_v46, 1 }
 0x150   : > { %v1047_v17 = vpack.c.bf16 %v1017_v39, %v1016_v31  ;;  %v6489_v33 = vpop.permute.xlu0 %971  ;;  %v5265_v31 = vld [vmem:[#allocation11 + $0x18] sm:$0xff]  }
 0x151   : > { %1339 = vperm.xlu0 %5200, %v5304_v52   ;;  %v880_v52 = vsel %vm853_vm1, %v825_v5, %v826_v32  ;;  %v829_v5 = vrot.slane %v6227_v6, 1 }
 0x152   : > { %995 = vperm.xlu1 %5196, %v6055_v49   ;;  %v1084_v62 = vpop.permute.xlu1 %1083  ;;  %4702 = vmatmul.mubr.bf16.vlgmr.msra.gmra.mrb[0].mxu0 %v1047_v17  ;;  %v879_v17 = vsel %vm853_vm1, %v826_v32, %v827_v23 }
 0x153   : > { %4878 = vmatpush3.bf16.msra.mxu0 %v5259_v27  ;;  %v1195_v54 = vmul.f32 %v1084_v62, %v6184_v57  ;;  %v878_v62 = vsel %vm853_vm1, %v827_v23, %v828_v8 }
 0x154   : > { %4879 = vmatprep.subr.bf16.mxu0 %v5261_v15 }
 0x155   : > { %v1064_v45 = vpop.permute.xlu0 %1063  ;;  %1347 = vperm.xlu0 %5200, %v5305_v35  }
 0x156   : > { %v1190_v42 = vmul.f32 %v1064_v45, %v6396_v4  ;;  %5197 = vset.pattern.permute.xlu1 %v7310_v38  ;;  %v1088_v49 = vpop.permute.xlu1 %1087  ;;  %v1019_v38 = vmul.f32 %v908_v28, %v879_v17 }
 0x157   : > { %1179 = vperm.xlu1 %5197, %v6071_v53   ;;  %4880 = vmatpush3.bf16.msra.mxu0 %v5261_v15 }
 0x158   : > { %v1222_v27 = vpack.c.bf16 %v1191_v43, %v1190_v42  ;;  %4881 = vmatprep.subr.bf16.mxu0 %v5263_v50 }
 0x159   : > { %v1076_v39 = vpop.permute.xlu0 %1075  ;;  %1355 = vperm.xlu0 %5200, %v6071_v53   ;;  %v5260_v53 = vld [vmem:[#allocation9 + $0x88] sm:$0xff]  }
 0x15a   : > { %v1193_v45 = vmul.f32 %v1076_v39, %v6178_v11  ;;  %4797 = vmatprep.mubr.bf16.mxu1 %v1222_v27  ;;  %v6523_v27 = vld [vmem:[%s7221_s1 + $0xe0] sm:$0xff] }
 0x15b   : > { %1183 = vperm.xlu1 %5197, %v6097_v61   ;;  %v904_v35 = vpop.permute.xlu1 %903  ;;  %4882 = vmatpush3.bf16.msra.mxu0 %v5263_v50  ;;  %v5267_v61 = vld [vmem:[#allocation11 + $0x20] sm:$0xff]  }
 0x15c   : > { %v1223_v15 = vpack.c.bf16 %v1193_v45, %v1192_v63  ;;  %v1018_v43 = vmul.f32 %v904_v35, %v880_v52  ;;  %4883 = vmatprep.subr.bf16.mxu0 %v5265_v31  ;;  %v5269_v63 = vld [vmem:[#allocation11 + $0x28] sm:$0xff]  }
 0x15d   : > { %v1080_v42 = vpop.permute.xlu0 %1079  ;;  %1363 = vperm.xlu0 %5200, %v6092_v60   ;;  %v5262_v60 = vld [vmem:[#allocation9 + $0x90] sm:$0xff]  }
 0x15e   : > { %v1048_v28 = vpack.c.bf16 %v1019_v38, %v1018_v43  ;;  %v1194_v32 = vmul.f32 %v1080_v42, %v6181_v55  ;;  %4798 = vmatmul.mubr.bf16.vlgmr.msra.gmra.mrb[16].mxu1 %v1223_v15  ;;  %v6537_v15 = vld [vmem:[%s7221_s1 + $0xf0] sm:$0xff]  ;;  %v5308_v42 = vld [vmem:[%s7221_s1 + $0xf8] sm:$0xff] }
 0x15f   : > { %5199 = vset.pattern.permute.xlu1 %v7309_v47  ;;  %v912_v50 = vpop.permute.xlu1 %911  ;;  %4830 = vmatpush3.bf16.msra.mxu1 %v6432_v29  ;;  %v877_v47 = vsel %vm853_vm1, %v828_v8, %v829_v5  ;;  %v1196_v29 = vmul.f32 %v1088_v49, %v6196_v13  ;;  %v5264_v49 = vld [vmem:[#allocation9 + $0x98] sm:$0xff]  }
 0x160   : > { %v1224_v17 = vpack.c.bf16 %v1195_v54, %v1194_v32  ;;  %999 = vperm.xlu1 %5199, %v6523_v27   ;;  %4705 = vmatprep.mubr.bf16.mxu0 %v1048_v28  ;;  %v1020_v45 = vmul.f32 %v912_v50, %v878_v62  ;;  %v5266_v54 = vld [vmem:[#allocation9 + $0xa0] sm:$0xff]   ;;  %v830_v28 = vrot.slane %v6232_v2, 1  ;;  %v831_v32 = vrot.slane %v6244_v14, 1 }
 0x161   : > { %v1092_v39 = vpop.permute.xlu0 %1091  ;;  %4831 = vmatprep.subr.bf16.mxu1 %v5260_v53  ;;  %4884 = vmatpush3.bf16.msra.mxu0 %v5265_v31 }
 0x162   : > { %v1197_v52 = vmul.f32 %v1092_v39, %v6199_v24  ;;  %4801 = vmatprep.mubr.bf16.mxu1 %v1224_v17  ;;  %4885 = vmatprep.subr.bf16.mxu0 %v5267_v61  ;;  %v5271_v17 = vld [vmem:[#allocation11 + $0x30] sm:$0xff]   ;;  %v7312_v39 = vmov 3  }
 0x163   : > { %v916_v38 = vpop.permute.xlu1 %915  ;;  %4832 = vmatpush3.bf16.msra.mxu1 %v5260_v53 }
 0x164   : > { %v1225_v35 = vpack.c.bf16 %v1197_v52, %v1196_v29  ;;  %v1021_v23 = vmul.f32 %v916_v38, %v877_v47  ;;  %1007 = vperm.xlu1 %5199, %v6537_v15   ;;  %4833 = vmatprep.subr.bf16.mxu1 %v5262_v60  ;;  %v5268_v29 = vld [vmem:[#allocation9 + $0xa8] sm:$0xff]   ;;  %v875_v52 = vsel %vm853_vm1, %v830_v28, %v831_v32 }
 0x165   : > { %v1096_v8 = vpop.permute.xlu0 %1095  ;;  %4886 = vmatpush3.bf16.msra.mxu0 %v5267_v61 }
 0x166   : > { %v1049_v31 = vpack.c.bf16 %v1021_v23, %v1020_v45  ;;  %4802 = vmatmul.mubr.bf16.gmra.mrb[20].mxu1 %v1225_v35  ;;  %4887 = vmatprep.subr.bf16.mxu0 %v5269_v63  ;;  %v1198_v43 = vmul.f32 %v1096_v8, %v6211_v44  ;;  %v5309_v45 = vld [vmem:[%s7221_s1 + $0x8] sm:$0xff]  ;;  %v876_v35 = vsel %vm853_vm1, %v829_v5, %v830_v28  ;;  %v5270_v8 = vld [vmem:[#allocation9 + $0xb0] sm:$0xff]   ;;  %v833_v5 = vrot.slane %v6259_v16, 1  ;;  %v5311_v28 = vld [vmem:[%s7221_s1 + $0x20] sm:$0xff] }
 0x167   : > { %4834 = vmatpush3.bf16.msra.mxu1 %v5262_v60  ;;  %v1023_v23 = vmul.f32 %v6462_v25, %v875_v52  ;;  %v5272_v25 = vld [vmem:[#allocation9 + $0xb8] sm:$0xff]  }
 0x168   : > { %1011 = vperm.xlu1 %5199, %v5308_v42   ;;  %v1100_v53 = vpop.permute.xlu1 %1099  ;;  %4706 = vmatmul.mubr.bf16.gmra.mrb[4].mxu0 %v1049_v31  ;;  %v5310_v31 = vld [vmem:[%s7221_s1 + $0x10] sm:$0xff] }
 0x169   : > { %v1199_v61 = vmul.f32 %v1100_v53, %v6214_v46  ;;  %v1108_v50 = vpop.permute.xlu0 %1107  ;;  %4835 = vmatprep.subr.bf16.mxu1 %v5264_v49  ;;  %4888 = vmatpush3.bf16.msra.mxu0 %v5269_v63  ;;  %v832_v53 = vrot.slane %v6247_v0, 1 }
 0x16a   : > { %v1201_v60 = vmul.f32 %v1108_v50, %v6232_v2  ;;  %4889 = vmatprep.subr.bf16.mxu0 %v5271_v17 }
 0x16b   : > { %v1226_v62 = vpack.c.bf16 %v1199_v61, %v1198_v43  ;;  %4836 = vmatpush3.bf16.msra.mxu1 %v5264_v49  ;;  %v5273_v49 = vld [vmem:[#allocation11 + $0x38] sm:$0xff]   ;;  %v874_v50 = vsel %vm853_vm1, %v831_v32, %v832_v53  ;;  %v5313_v32 = vld [vmem:[%s7221_s1 + $0x40] sm:$0xff] }
 0x16c   : > { %5201 = vset.pattern.permute.xlu1 %v7312_v39  ;;  %v1104_v47 = vpop.permute.xlu1 %1103  ;;  %4837 = vmatprep.subr.bf16.mxu1 %v5266_v54 }
 0x16d   : > { %v1200_v38 = vmul.f32 %v1104_v47, %v6227_v6  ;;  %1243 = vperm.xlu1 %5201, %v5309_v45   ;;  %4805 = vmatprep.mubr.bf16.mxu1 %v1226_v62  ;;  %v1112_v62 = vpop.permute.xlu0 %1111 }
 0x16e   : > { %4890 = vmatpush3.bf16.msra.mxu0 %v5271_v17  ;;  %v873_v17 = vsel %vm853_vm1, %v832_v53, %v833_v5 }
 0x16f   : > { %v1227_v63 = vpack.c.bf16 %v1201_v60, %v1200_v38  ;;  %4838 = vmatpush3.bf16.msra.mxu1 %v5266_v54  ;;  %4891 = vmatprep.subr.bf16.mxu0 %v5273_v49  ;;  %v5312_v60 = vld [vmem:[%s7221_s1 + $0x30] sm:$0xff]  ;;  %v1202_v38 = vmul.f32 %v1112_v62, %v6244_v14 }
 0x170   : > { %4839 = vmatprep.subr.bf16.mxu1 %v5268_v29 }
 0x171   : > { %1247 = vperm.xlu1 %5201, %v5310_v31   ;;  %v920_v43 = vpop.permute.xlu1 %919  ;;  %4806 = vmatmul.mubr.bf16.gmra.mrb[24].mxu1 %v1227_v63  ;;  %v1124_v63 = vpop.permute.xlu0 %1123  ;;  %v5314_v31 = vld [vmem:[%s7221_s1 + $0x50] sm:$0xff] }
 0x172   : > { %v1022_v42 = vmul.f32 %v920_v43, %v876_v35  ;;  %4892 = vmatpush3.bf16.msra.mxu0 %v5273_v49  ;;  %v834_v35 = vrot.slane %v6262_v1, 1  ;;  %v1205_v43 = vmul.f32 %v1124_v63, %v6262_v1 }
 0x173   : > { %4840 = vmatpush3.bf16.msra.mxu1 %v5268_v29 }
 0x174   : > { %v1050_v54 = vpack.c.bf16 %v1023_v23, %v1022_v42  ;;  %4841 = vmatprep.subr.bf16.mxu1 %v5270_v8  ;;  %v835_v23 = vrot.slane %v6274_v37, 1 }
 0x175   : > { %1255 = vperm.xlu1 %5201, %v5311_v28   ;;  %v928_v61 = vpop.permute.xlu1 %927  ;;  %v5315_v28 = vld [vmem:[%s7221_s1 + $0x60] sm:$0xff] }
 0x176   : > { %4709 = vmatprep.mubr.bf16.mxu0 %v1050_v54  ;;  %v1024_v47 = vmul.f32 %v928_v61, %v874_v50  ;;  %v871_v53 = vsel %vm853_vm1, %v834_v35, %v835_v23  ;;  %v872_v61 = vsel %vm853_vm1, %v833_v5, %v834_v35 }
 0x177   : > { %4842 = vmatpush3.bf16.msra.mxu1 %v5270_v8  ;;  %v1027_v50 = vmul.f32 %v6470_v56, %v871_v53  ;;  %v5317_v56 = vld [vmem:[%s7221_s1 + $0x80] sm:$0xff]  ;;  %v838_v53 = vrot.slane %v6291_v30, 1 }
 0x178   : > { %4843 = vmatprep.subr.bf16.mxu1 %v5272_v25 }
 0x179   : > { %1263 = vperm.xlu1 %5201, %v5312_v60   ;;  %v932_v39 = vpop.permute.xlu1 %931  ;;  %v5316_v60 = vld [vmem:[%s7221_s1 + $0x70] sm:$0xff] }
 0x17a   : > { %v1025_v29 = vmul.f32 %v932_v39, %v873_v17  ;;  %v836_v39 = vrot.slane %v6277_v3, 1 }
 0x17b   : > { %4844 = vmatpush3.bf16.msra.mxu1 %v5272_v25 }
 0x17c   : > { %v1051_v52 = vpack.c.bf16 %v1025_v29, %v1024_v47  ;;  %v837_v47 = vrot.slane %v6288_v22, 1  ;;  %v870_v5 = vsel %vm853_vm1, %v835_v23, %v836_v39 }
 0x17d   : > { %1271 = vperm.xlu1 %5201, %v5313_v32  }
 0x17e   : > { %v1116_v45 = vpop.permute.xlu1 %1115  ;;  %4710 = vmatmul.mubr.bf16.gmra.mrb[8].mxu0 %v1051_v52  ;;  %v869_v32 = vsel %vm853_vm1, %v836_v39, %v837_v47 }
 0x17f   : > { %v1203_v8 = vmul.f32 %v1116_v45, %v6247_v0  ;;  %v1128_v45 = vpop.permute.xlu0 %1127 }
 0x180   : > { %v1206_v23 = vmul.f32 %v1128_v45, %v6274_v37  ;;  %v5320_v45 = vld [vmem:[%s7221_s1 + $0xd0] sm:$0xff] }
 0x181   : > { %v1228_v49 = vpack.c.bf16 %v1203_v8, %v1202_v38  ;;  %1279 = vperm.xlu1 %5201, %v5314_v31   ;;  %v5318_v8 = vld [vmem:[%s7221_s1 + $0x90] sm:$0xff] }
 0x182   : > { %v1120_v42 = vpop.permute.xlu1 %1119 }
 0x183   : > { %v1204_v54 = vmul.f32 %v1120_v42, %v6259_v16  ;;  %4809 = vmatprep.mubr.bf16.mxu1 %v1228_v49  ;;  %v1140_v42 = vpop.permute.xlu0 %1139 }
 0x185   : > { %v1229_v25 = vpack.c.bf16 %v1205_v43, %v1204_v54  ;;  %1287 = vperm.xlu1 %5201, %v5315_v28   ;;  %v839_v54 = vrot.slane %v6302_v21, 1 }
 0x187   : > { %v936_v17 = vpop.permute.xlu1 %935  ;;  %4810 = vmatmul.mubr.bf16.gmra.mrb[28].mxu1 %v1229_v25  ;;  %v1209_v25 = vmul.f32 %v1140_v42, %v6291_v30 }
 0x188   : > { %v1026_v62 = vmul.f32 %v936_v17, %v872_v61  ;;  %v5319_v17 = vld [vmem:[%s7221_s1 + $0xb0] sm:$0xff] }
 0x189   : > { %1295 = vperm.xlu1 %5201, %v5316_v60   ;;  %v868_v60 = vsel %vm853_vm1, %v837_v47, %v838_v53 }
 0x18a   : > { %v1052_v29 = vpack.c.bf16 %v1027_v50, %v1026_v62 }
 0x18b   : > { %v944_v52 = vpop.permute.xlu1 %943 }
 0x18c   : > { %4713 = vmatprep.mubr.bf16.mxu0 %v1052_v29  ;;  %v1028_v63 = vmul.f32 %v944_v52, %v870_v5  ;;  %v1144_v52 = vpop.permute.xlu0 %1143 }
 0x18d   : > { %1303 = vperm.xlu1 %5201, %v5317_v56   ;;  %v840_v56 = vrot.slane %v6305_v34, 1 }
 0x18f   : > { %v948_v38 = vpop.permute.xlu1 %947 }
 0x190   : > { %v1029_v35 = vmul.f32 %v948_v38, %v869_v32  ;;  %v841_v32 = vrot.slane %v6318_v18, 1  ;;  %v1156_v47 = vpop.permute.xlu0 %1155 }
 0x191   : > { %1311 = vperm.xlu1 %5201, %v5318_v8   ;;  %v6636_v8 = vpop.f32.mrb[0].mxu1 }
 0x192   : > { %v1053_v49 = vpack.c.bf16 %v1029_v35, %v1028_v63 }
 0x194   : > { %v1132_v31 = vpop.permute.xlu1 %1131  ;;  %4714 = vmatmul.mubr.bf16.gmra.mrb[12].mxu0 %v1053_v49 }
 0x195   : > { %v1207_v43 = vmul.f32 %v1132_v31, %v6277_v3  ;;  %1319 = vperm.xlu1 %5201, %v6420_v58   ;;  %v867_v58 = vsel %vm853_vm1, %v838_v53, %v839_v54  ;;  %v6638_v31 = vpop.f32.mrb[1].mxu1 }
 0x196   : > { %v1031_v29 = vmul.f32 %v6486_v26, %v867_v58  ;;  %v865_v26 = vsel %vm853_vm1, %v840_v56, %v841_v32 }
 0x197   : > { %v1230_v28 = vpack.c.bf16 %v1207_v43, %v1206_v23  ;;  %v6640_v43 = vpop.f32.mrb[2].mxu1 }
 0x198   : > { %v1136_v61 = vpop.permute.xlu1 %1135  ;;  %v6642_v53 = vpop.f32.mrb[3].mxu1 }
 0x199   : > { %v1208_v50 = vmul.f32 %v1136_v61, %v6288_v22  ;;  %1327 = vperm.xlu1 %5201, %v5319_v17   ;;  %4813 = vmatprep.mubr.bf16.mxu1 %v1230_v28  ;;  %v1210_v28 = vmul.f32 %v1144_v52, %v6302_v21  ;;  %v842_v61 = vrot.slane %v6321_v20, 1  ;;  %v6649_v58 = vpop.f32.mrb[4].mxu1 }
 0x19b   : > { %v1231_v62 = vpack.c.bf16 %v1209_v25, %v1208_v50  ;;  %v843_v50 = vrot.slane %v6331_v41, 1 }
 0x19d   : > { %1335 = vperm.xlu1 %5201, %v6479_v9   ;;  %v952_v39 = vpop.permute.xlu1 %951  ;;  %4814 = vmatmul.mubr.bf16.gmra.mrb[32].mxu1 %v1231_v62  ;;  %v866_v9 = vsel %vm853_vm1, %v839_v54, %v840_v56  ;;  %v1160_v54 = vpop.permute.xlu0 %1159  ;;  %v863_v56 = vsel %vm853_vm1, %v842_v61, %v843_v50 }
 0x19e   : > { %v1030_v5 = vmul.f32 %v952_v39, %v868_v60  ;;  %v6651_v60 = vpop.f32.mrb[5].mxu1  ;;  %v1213_v39 = vmul.f32 %v1156_v47, %v6321_v20  ;;  %v1035_v47 = vmul.f32 %v6489_v33, %v863_v56 }
 0x1a0   : > { %v1054_v38 = vpack.c.bf16 %v1031_v29, %v1030_v5  ;;  %v6655_v29 = vpop.f32.mrb[6].mxu1 }
 0x1a1   : > { %1343 = vperm.xlu1 %5201, %v5320_v45   ;;  %v960_v63 = vpop.permute.xlu1 %959  ;;  %v1172_v52 = vpop.permute.xlu0 %1171  ;;  %v864_v45 = vsel %vm853_vm1, %v841_v32, %v842_v61 }
 0x1a2   : > { %4717 = vmatprep.mubr.bf16.mxu0 %v1054_v38  ;;  %v1032_v49 = vmul.f32 %v960_v63, %v866_v9  ;;  %v6657_v5 = vpop.f32.mrb[7].mxu1 }
 0x1a3   : > { %v6663_v63 = vpop.f32.mrb[8].mxu1 }
 0x1a4   : > { %7313 = vst [vmem:[#allocation43_spill] sm:$0xff] %v6663_v63  ;;  %v6665_v9 = vpop.f32.mrb[9].mxu1 }
 0x1a5   : > { %1351 = vperm.xlu1 %5201, %v6523_v27   ;;  %v964_v35 = vpop.permute.xlu1 %963  ;;  %7314 = vst [vmem:[#allocation44_spill] sm:$0xff] %v6665_v9 }
 0x1a6   : > { %v1033_v23 = vmul.f32 %v964_v35, %v865_v26 }
 0x1a8   : > { %v1055_v42 = vpack.c.bf16 %v1033_v23, %v1032_v49  ;;  %v6668_v49 = vpop.f32.mrb[10].mxu1  ;;  %v844_v23 = vrot.slane %v6335_v40, 1 }
 0x1a9   : > { %1359 = vperm.xlu1 %5201, %v6537_v15   ;;  %7315 = vst [vmem:[#allocation45_spill] sm:$0xff] %v6668_v49 }
 0x1aa   : > { %v1148_v25 = vpop.permute.xlu1 %1147  ;;  %4718 = vmatmul.mubr.bf16.gmra.mrb[16].mxu0 %v1055_v42  ;;  %v845_v42 = vrot.slane %v6347_v36, 1  ;;  %v862_v61 = vsel %vm853_vm1, %v843_v50, %v844_v23  ;;  %v846_v50 = vrot.slane %v6350_v19, 1 }
 0x1ab   : > { %v1211_v27 = vmul.f32 %v1148_v25, %v6305_v34  ;;  %v6672_v25 = vpop.f32.mrb[11].mxu1 }
 0x1ac   : > { %7316 = vst [vmem:[#allocation46_spill] sm:$0xff] %v6672_v25  ;;  %v6678_v56 = vpop.f32.mrb[12].mxu1 }
 0x1ad   : > { %v1232_v17 = vpack.c.bf16 %v1211_v27, %v1210_v28  ;;  %v1176_v28 = vpop.permute.xlu0 %1175  ;;  %7317 = vst [vmem:[#allocation47_spill] sm:$0xff] %v6678_v56 }
 0x1ae   : > { %v1152_v62 = vpop.permute.xlu1 %1151 }
 0x1af   : > { %v1212_v15 = vmul.f32 %v1152_v62, %v6318_v18  ;;  %4817 = vmatprep.mubr.bf16.mxu1 %v1232_v17  ;;  %v861_v17 = vsel %vm853_vm1, %v844_v23, %v845_v42  ;;  %v847_v23 = vrot.slane %v6363_v59, 1 }
 0x1b1   : > { %v1233_v38 = vpack.c.bf16 %v1213_v39, %v1212_v15  ;;  %v1188_v62 = vpop.permute.xlu0 %1187 }
 0x1b3   : > { %v968_v26 = vpop.permute.xlu1 %967  ;;  %4818 = vmatmul.mubr.bf16.gmra.mrb[36].mxu1 %v1233_v38 }
 0x1b4   : > { %v1034_v35 = vmul.f32 %v968_v26, %v864_v45  ;;  %v6680_v45 = vpop.f32.mrb[13].mxu1 }
 0x1b5   : > { %7318 = vst [vmem:[#allocation48_spill] sm:$0xff] %v6680_v45  ;;  %v6682_v26 = vpop.f32.mrb[14].mxu1 }
 0x1b6   : > { %v1056_v27 = vpack.c.bf16 %v1035_v47, %v1034_v35  ;;  %7319 = vst [vmem:[#allocation49_spill] sm:$0xff] %v6682_v26  ;;  %v988_v47 = vpop.permute.xlu0 %987  ;;  %v860_v26 = vsel %vm853_vm1, %v845_v42, %v846_v50 }
 0x1b7   : > { %v976_v32 = vpop.permute.xlu1 %975 }
 0x1b8   : > { %4721 = vmatprep.mubr.bf16.mxu0 %v1056_v27  ;;  %v1036_v39 = vmul.f32 %v976_v32, %v862_v61  ;;  %v1214_v27 = vmul.f32 %v1160_v54, %v6331_v41  ;;  %v6688_v32 = vpop.f32.mrb[15].mxu1 }
 0x1b9   : > { %7320 = vst [vmem:[#allocation50_spill] sm:$0xff] %v6688_v32 }
 0x1bb   : > { %v980_v33 = vpop.permute.xlu1 %979 }
 0x1bc   : > { %v1037_v15 = vmul.f32 %v980_v33, %v861_v17  ;;  %v1217_v33 = vmul.f32 %v1172_v52, %v6350_v19 }
 0x1be   : > { %v1057_v38 = vpack.c.bf16 %v1037_v15, %v1036_v39  ;;  %v859_v39 = vsel %vm853_vm1, %v846_v50, %v847_v23 }
 0x1bf   : > { %v1039_v45 = vmul.f32 %v988_v47, %v859_v39 }
 0x1c0   : > { %v1164_v35 = vpop.permute.xlu1 %1163  ;;  %4722 = vmatmul.mubr.bf16.gmra.mrb[20].mxu0 %v1057_v38  ;;  %v1004_v38 = vpop.permute.xlu0 %1003 }
 0x1c1   : > { %v1215_v25 = vmul.f32 %v1164_v35, %v6335_v40 }
 0x1c3   : > { %v1234_v61 = vpack.c.bf16 %v1215_v25, %v1214_v27  ;;  %v848_v25 = vrot.slane %v6366_v51, 1  ;;  %v849_v27 = vrot.slane %v6379_v48, 1 }
 0x1c4   : > { %v1168_v17 = vpop.permute.xlu1 %1167  ;;  %v1240_v52 = vpop.permute.xlu0 %1239 }
 0x1c5   : > { %v1216_v15 = vmul.f32 %v1168_v17, %v6347_v36  ;;  %4821 = vmatprep.mubr.bf16.mxu1 %v1234_v61  ;;  %v858_v61 = vsel %vm853_vm1, %v847_v23, %v848_v25  ;;  %v857_v17 = vsel %vm853_vm1, %v848_v25, %v849_v27  ;;  %v1221_v25 = vmul.f32 %v1188_v62, %v6382_v10 }
 0x1c7   : > { %v1235_v54 = vpack.c.bf16 %v1217_v33, %v1216_v15  ;;  %v850_v15 = vrot.slane %v6382_v10, 1 }
 0x1c8   : > { %v1252_v42 = vpop.permute.xlu0 %1251 }
 0x1c9   : > { %v984_v56 = vpop.permute.xlu1 %983  ;;  %4822 = vmatmul.mubr.bf16.gmra.mrb[40].mxu1 %v1235_v54 }
 0x1ca   : > { %v1038_v35 = vmul.f32 %v984_v56, %v860_v26  ;;  %v1218_v26 = vmul.f32 %v1176_v28, %v6363_v59  ;;  %v856_v28 = vsel %vm853_vm1, %v849_v27, %v850_v15 }
 0x1cc   : > { %v1058_v32 = vpack.c.bf16 %v1039_v45, %v1038_v35  ;;  %v851_v45 = vrot.slane %v6396_v4, 1  ;;  %v1260_v54 = vpop.permute.xlu0 %1259 }
 0x1cd   : > { %v992_v49 = vpop.permute.xlu1 %991 }
 0x1ce   : > { %4725 = vmatprep.mubr.bf16.mxu0 %v1058_v32  ;;  %v1040_v47 = vmul.f32 %v992_v49, %v858_v61  ;;  %v855_v49 = vsel %vm853_vm1, %v850_v15, %v851_v45 }
 0x1d1   : > { %v996_v33 = vpop.permute.xlu1 %995 }
 0x1d2   : > { %v1041_v50 = vmul.f32 %v996_v33, %v857_v17  ;;  %v1043_v33 = vmul.f32 %v1004_v38, %v855_v49 }
 0x1d4   : > { %v1059_v39 = vpack.c.bf16 %v1041_v50, %v1040_v47  ;;  %v1268_v47 = vpop.permute.xlu0 %1267 }
 0x1d6   : > { %v1180_v56 = vpop.permute.xlu1 %1179  ;;  %4726 = vmatmul.mubr.bf16.gmra.mrb[24].mxu0 %v1059_v39 }
 0x1d7   : > { %v1219_v32 = vmul.f32 %v1180_v56, %v6366_v51  ;;  %v7321_v56 = vld [vmem:[#allocation42_spill] sm:$0xff] }
 0x1d8   : > { %v1276_v62 = vpop.permute.xlu0 %1275 }
 0x1d9   : > { %v1236_v23 = vpack.c.bf16 %v1219_v32, %v1218_v26  ;;  %v852_v26 = vrot.slane %v7321_v56, 1 }
 0x1da   : > { %v1184_v35 = vpop.permute.xlu1 %1183 }
 0x1db   : > { %v1220_v61 = vmul.f32 %v1184_v35, %v6379_v48  ;;  %4825 = vmatprep.mubr.bf16.mxu1 %v1236_v23  ;;  %v854_v63 = vsel %vm853_vm1, %v851_v45, %v852_v26  ;;  %v7322_v23 = vrot.slane %v6172_v7, 1 }
 0x1dd   : > { %v1237_v17 = vpack.c.bf16 %v1221_v25, %v1220_v61  ;;  %v885_v35 = vsel %vm853_vm1, %v852_v26, %v7322_v23  ;;  %v1284_v25 = vpop.permute.xlu0 %1283  ;;  %v1366_v61 = vmul.f32 %v1240_v52, %v6181_v55  ;;  %v7324_v26 = vld [vmem:[#allocation28_spill] sm:$0xff]  ;;  %v1371_v55 = vmul.f32 %v1260_v54, %v6214_v46  ;;  %v7327_v54 = vld [vmem:[#allocation33_spill] sm:$0xff] }
 0x1de   : > { %v1375_v46 = vmul.f32 %v1276_v62, %v6247_v0 }
 0x1df   : > { %v1000_v50 = vpop.permute.xlu1 %999  ;;  %4826 = vmatmul.mubr.bf16.gmra.mrb[44].mxu1 %v1237_v17 }
 0x1e0   : > { %v1042_v39 = vmul.f32 %v1000_v50, %v856_v28 }
 0x1e1   : > { %v1292_v45 = vpop.permute.xlu0 %1291 }
 0x1e2   : > { %v1060_v32 = vpack.c.bf16 %v1043_v33, %v1042_v39  ;;  %v7323_v33 = vld [vmem:[#allocation26_spill] sm:$0xff] }
 0x1e3   : > { %v1008_v9 = vpop.permute.xlu1 %1007 }
 0x1e4   : > { %4729 = vmatprep.mubr.bf16.mxu0 %v1060_v32  ;;  %v1044_v38 = vmul.f32 %v1008_v9, %v854_v63  ;;  %v1369_v32 = vmul.f32 %v1252_v42, %v6199_v24 }
 0x1e5   : > { %v1300_v23 = vpop.permute.xlu0 %1299 }
 0x1e7   : > { %v1012_v27 = vpop.permute.xlu1 %1011 }
 0x1e8   : > { %v1045_v15 = vmul.f32 %v1012_v27, %v885_v35 }
 0x1e9   : > { %v1308_v42 = vpop.permute.xlu0 %1307 }
 0x1ea   : > { %v1061_v49 = vpack.c.bf16 %v1045_v15, %v1044_v38  ;;  %v1373_v38 = vmul.f32 %v1268_v47, %v6232_v2 }
 0x1ec   : > { %v1244_v17 = vpop.permute.xlu1 %1243  ;;  %4730 = vmatmul.mubr.bf16.gmra.mrb[28].mxu0 %v1061_v49  ;;  %v7326_v49 = vld [vmem:[#allocation32_spill] sm:$0xff] }
 0x1ed   : > { %v1367_v28 = vmul.f32 %v1244_v17, %v6184_v57  ;;  %4893 = vmatprep.mubr.bf16.mxu0 %v7323_v33  ;;  %v7325_v57 = vld [vmem:[#allocation30_spill] sm:$0xff] }
 0x1ef   : > { %v1398_v50 = vpack.c.bf16 %v1367_v28, %v1366_v61  ;;  %v1377_v28 = vmul.f32 %v1284_v25, %v6262_v1  ;;  %v1381_v1 = vmul.f32 %v1300_v23, %v6291_v30 }
 0x1f0   : > { %v1248_v39 = vpop.permute.xlu1 %1247 }
 0x1f1   : > { %v1368_v12 = vmul.f32 %v1248_v39, %v6196_v13  ;;  %4845 = vmatprep.mubr.bf16.mxu1 %v1398_v50  ;;  %v7328_v50 = vld [vmem:[#allocation36_spill] sm:$0xff]  ;;  %v1379_v39 = vmul.f32 %v1292_v45, %v6277_v3 }
 0x1f3   : > { %v1399_v63 = vpack.c.bf16 %v1369_v32, %v1368_v12 }
 0x1f4   : > { %v1256_v9 = vpop.permute.xlu1 %1255  ;;  %4894 = vmatmul.mubr.bf16.vlgmr.msra.gmra.mrb[32].mxu0 %v7324_v26  ;;  %v1383_v26 = vmul.f32 %v1308_v42, %v6305_v34 }
 0x1f5   : > { %v1370_v52 = vmul.f32 %v1256_v9, %v6211_v44  ;;  %4846 = vmatmul.mubr.bf16.vlgmr.msra.gmra.mrb[16].mxu1 %v1399_v63  ;;  %4897 = vmatprep.mubr.bf16.mxu0 %v7325_v57  ;;  %v7330_v9 = vld [vmem:[#allocation40_spill] sm:$0xff] }
 0x1f7   : > { %v1400_v35 = vpack.c.bf16 %v1371_v55, %v1370_v52 }
 0x1f8   : > { %v1264_v27 = vpop.permute.xlu1 %1263 }
 0x1f9   : > { %v1372_v24 = vmul.f32 %v1264_v27, %v6227_v6  ;;  %4849 = vmatprep.mubr.bf16.mxu1 %v1400_v35  ;;  %v1316_v6 = vpop.permute.xlu0 %1315  ;;  %v7332_v27 = vld [vmem:[#allocation29_spill] sm:$0xff] }
 0x1fa   : > { %v1385_v57 = vmul.f32 %v1316_v6, %v6321_v20  ;;  %v7336_v6 = vld [vmem:[#allocation38_spill] sm:$0xff] }
 0x1fb   : > { %v1401_v13 = vpack.c.bf16 %v1373_v38, %v1372_v24  ;;  %v7333_v38 = vld [vmem:[#allocation31_spill] sm:$0xff] }
 0x1fc   : > { %v1272_v15 = vpop.permute.xlu1 %1271  ;;  %4898 = vmatmul.mubr.bf16.gmra.mrb[36].mxu0 %v7326_v49 }
 0x1fd   : > { %v1374_v44 = vmul.f32 %v1272_v15, %v6244_v14  ;;  %4850 = vmatmul.mubr.bf16.gmra.mrb[20].mxu1 %v1401_v13  ;;  %4901 = vmatprep.mubr.bf16.mxu0 %v7327_v54  ;;  %v7329_v14 = vld [vmem:[#allocation37_spill] sm:$0xff]  ;;  %v1324_v32 = vpop.permute.xlu0 %1323 }
 0x1fe   : > { %v1387_v34 = vmul.f32 %v1324_v32, %v6335_v40 }
 0x1ff   : > { %v1402_v61 = vpack.c.bf16 %v1375_v46, %v1374_v44  ;;  %v7334_v46 = vld [vmem:[#allocation34_spill] sm:$0xff] }
 0x200   : > { %v1280_v17 = vpop.permute.xlu1 %1279 }
 0x201   : > { %v1376_v2 = vmul.f32 %v1280_v17, %v6259_v16  ;;  %4853 = vmatprep.mubr.bf16.mxu1 %v1402_v61  ;;  %v1332_v45 = vpop.permute.xlu0 %1331 }
 0x202   : > { %v1389_v42 = vmul.f32 %v1332_v45, %v6350_v19 }
 0x203   : > { %v1403_v47 = vpack.c.bf16 %v1377_v28, %v1376_v2  ;;  %v6763_v2 = vld [vmem:[%s7225_s5] ss:$0 sm:$0xff] }
 0x204   : > { %v1288_v33 = vpop.permute.xlu1 %1287  ;;  %4902 = vmatmul.mubr.bf16.gmra.mrb[40].mxu0 %v7328_v50 }
 0x205   : > { %v1378_v0 = vmul.f32 %v1288_v33, %v6274_v37  ;;  %4854 = vmatmul.mubr.bf16.gmra.mrb[24].mxu1 %v1403_v47  ;;  %4905 = vmatprep.mubr.bf16.mxu0 %v7329_v14  ;;  %v7331_v37 = vld [vmem:[#allocation27_spill] sm:$0xff]  ;;  %v1340_v23 = vpop.permute.xlu0 %1339 }
 0x206   : > { %v1391_v44 = vmul.f32 %v1340_v23, %v6366_v51 }
 0x207   : > { %v1404_v62 = vpack.c.bf16 %v1379_v39, %v1378_v0 }
 0x208   : > { %v1296_v12 = vpop.permute.xlu1 %1295 }
 0x209   : > { %v1380_v16 = vmul.f32 %v1296_v12, %v6288_v22  ;;  %4857 = vmatprep.mubr.bf16.mxu1 %v1404_v62 }
 0x20b   : > { %v1405_v25 = vpack.c.bf16 %v1381_v1, %v1380_v16 }
 0x20c   : > { %v1304_v63 = vpop.permute.xlu1 %1303  ;;  %4906 = vmatmul.mubr.bf16.gmra.mrb[44].mxu0 %v7330_v9 }
 0x20d   : > { %v1382_v3 = vmul.f32 %v1304_v63, %v6302_v21  ;;  %4858 = vmatmul.mubr.bf16.gmra.mrb[28].mxu1 %v1405_v25  ;;  %4909 = vmatprep.mubr.bf16.mxu0 %v7331_v37 }
 0x20f   : > { %v1406_v55 = vpack.c.bf16 %v1383_v26, %v1382_v3 }
 0x210   : > { %v1312_v52 = vpop.permute.xlu1 %1311 }
 0x211   : > { %v1384_v30 = vmul.f32 %v1312_v52, %v6318_v18  ;;  %4861 = vmatprep.mubr.bf16.mxu1 %v1406_v55  ;;  %v1348_v18 = vpop.permute.xlu0 %1347  ;;  %v7338_v52 = vld [vmem:[#allocation41_spill] sm:$0xff] }
 0x212   : > { %v1393_v19 = vmul.f32 %v1348_v18, %v6382_v10  ;;  %v6771_v10 = vld [vmem:[%s7226_s6] ss:$0 sm:$0xff] }
 0x213   : > { %v1407_v22 = vpack.c.bf16 %v1385_v57, %v1384_v30 }
 0x214   : > { %v1320_v35 = vpop.permute.xlu1 %1319  ;;  %4910 = vmatmul.mubr.bf16.gmra.mrb[48].mxu0 %v7332_v27 }
 0x215   : > { %v1386_v21 = vmul.f32 %v1320_v35, %v6331_v41  ;;  %4862 = vmatmul.mubr.bf16.gmra.mrb[32].mxu1 %v1407_v22  ;;  %4913 = vmatprep.mubr.bf16.mxu0 %v7333_v38  ;;  %v7335_v41 = vld [vmem:[#allocation35_spill] sm:$0xff]  ;;  %v1356_v61 = vpop.permute.xlu0 %1355 }
 0x217   : > { %v1408_v24 = vpack.c.bf16 %v1387_v34, %v1386_v21 }
 0x218   : > { %v1328_v13 = vpop.permute.xlu1 %1327 }
 0x219   : > { %v1388_v20 = vmul.f32 %v1328_v13, %v6347_v36  ;;  %4865 = vmatprep.mubr.bf16.mxu1 %v1408_v24  ;;  %v1364_v50 = vpop.permute.xlu0 %1363 }
 0x21a   : > { %v1397_v16 = vmul.f32 %v1364_v50, %v6178_v11 }
 0x21b   : > { %v1409_v15 = vpack.c.bf16 %v1389_v42, %v1388_v20 }
 0x21c   : > { %v1336_v49 = vpop.permute.xlu1 %1335  ;;  %4914 = vmatmul.mubr.bf16.gmra.mrb[52].mxu0 %v7334_v46 }
 0x21d   : > { %v1390_v40 = vmul.f32 %v1336_v49, %v6363_v59  ;;  %4866 = vmatmul.mubr.bf16.gmra.mrb[36].mxu1 %v1409_v15  ;;  %4917 = vmatprep.mubr.bf16.mxu0 %v7335_v41  ;;  %v1395_v59 = vmul.f32 %v1356_v61, %v7321_v56 }
 0x21f   : > { %v1410_v54 = vpack.c.bf16 %v1391_v44, %v1390_v40 }
 0x220   : > { %v1344_v17 = vpop.permute.xlu1 %1343 }
 0x221   : > { %v1392_v36 = vmul.f32 %v1344_v17, %v6379_v48  ;;  %4869 = vmatprep.mubr.bf16.mxu1 %v1410_v54  ;;  %v7337_v48 = vld [vmem:[#allocation39_spill] sm:$0xff] }
 0x223   : > { %v1411_v28 = vpack.c.bf16 %v1393_v19, %v1392_v36 }
 0x224   : > { %v1352_v51 = vpop.permute.xlu1 %1351  ;;  %4918 = vmatmul.mubr.bf16.gmra.mrb[56].mxu0 %v7336_v6 }
 0x225   : > { %v1394_v47 = vmul.f32 %v1352_v51, %v6396_v4  ;;  %v4703_v33 = vpop.f32.mrb[0].mxu0  ;;  %4870 = vmatmul.mubr.bf16.gmra.mrb[40].mxu1 %v1411_v28  ;;  %4921 = vmatprep.mubr.bf16.mxu0 %v7337_v48 }
 0x226   : > { %v2228_v39 = vmul.f32 %v4703_v33, %v6763_v2  ;;  %v2060_v0 = vpop.f32.mrb[1].mxu0 }
 0x227   : > { %v1412_v14 = vpack.c.bf16 %v1395_v59, %v1394_v47  ;;  %v2226_v62 = vmul.f32 %v6763_v2, %v2060_v0  ;;  %v4704_v32 = vpop.f32.mrb[2].mxu0 }
 0x228   : > { %v2267_v56 = vadd.f32 %v6771_v10, %v2228_v39  ;;  %v2229_v4 = vmul.f32 %v4704_v32, %v6763_v2  ;;  %v1360_v12 = vpop.permute.xlu1 %1359  ;;  %v2063_v1 = vpop.f32.mrb[3].mxu0 }
 0x229   : > { %v2265_v25 = vadd.f32 %v6771_v10, %v2226_v62  ;;  %v1396_v63 = vmul.f32 %v1360_v12, %v6172_v7  ;;  %v2227_v9 = vmul.f32 %v6763_v2, %v2063_v1  ;;  %4873 = vmatprep.mubr.bf16.mxu1 %v1412_v14 }
 0x22a   : > { %v2268_v26 = vadd.f32 %v6771_v10, %v2229_v4  ;;  %v2299_v45 = vmax.f32 %v2267_v56, 0.0 }
 0x22b   : > { %v1413_v3 = vpack.c.bf16 %v1397_v16, %v1396_v63  ;;  %v2266_v37 = vadd.f32 %v6771_v10, %v2227_v9  ;;  %v2297_v57 = vmax.f32 %v2265_v25, 0.0 }
 0x22c   : > { %v2300_v55 = vmax.f32 %v2268_v26, 0.0  ;;  %4922 = vmatmul.mubr.bf16.gmra.mrb[60].mxu0 %v7338_v52 }
 0x22d   : > { %v2298_v30 = vmax.f32 %v2266_v37, 0.0  ;;  %4874 = vmatmul.mubr.bf16.gmra.mrb[44].mxu1 %v1413_v3 }
 0x22e   : > { %v3381_v11 = vpack.c.bf16 %v2300_v55, %v2299_v45 }
 0x22f   : > { %v3380_v22 = vpack.c.bf16 %v2298_v30, %v2297_v57 }
 0x230   : > { %3397 = vst [vmem:[#allocation2 + $0x8] sm:$0xff] %v3381_v11 }
 0x231   : > { %3396 = vst [vmem:[#allocation2] sm:$0xff] %v3380_v22 }
 0x23b   : > { %v4707_v7 = vpop.f32.mrb[4].mxu0 }
 0x23c   : > { %v2232_v23 = vmul.f32 %v4707_v7, %v6763_v2  ;;  %v2076_v35 = vpop.f32.mrb[5].mxu0 }
 0x23d   : > { %v2230_v27 = vmul.f32 %v6763_v2, %v2076_v35  ;;  %v4708_v34 = vpop.f32.mrb[6].mxu0 }
 0x23e   : > { %v2271_v21 = vadd.f32 %v6771_v10, %v2232_v23  ;;  %v2233_v38 = vmul.f32 %v4708_v34, %v6763_v2  ;;  %v2079_v24 = vpop.f32.mrb[7].mxu0 }
 0x23f   : > { %v2269_v13 = vadd.f32 %v6771_v10, %v2230_v27  ;;  %v2231_v42 = vmul.f32 %v6763_v2, %v2079_v24 }
 0x240   : > { %v2272_v20 = vadd.f32 %v6771_v10, %v2233_v38  ;;  %v2303_v15 = vmax.f32 %v2271_v21, 0.0 }
 0x241   : > { %v2270_v18 = vadd.f32 %v6771_v10, %v2231_v42  ;;  %v2301_v46 = vmax.f32 %v2269_v13, 0.0 }
 0x242   : > { %v2304_v49 = vmax.f32 %v2272_v20, 0.0 }
 0x243   : > { %v2302_v44 = vmax.f32 %v2270_v18, 0.0 }
 0x244   : > { %v3383_v40 = vpack.c.bf16 %v2304_v49, %v2303_v15 }
 0x245   : > { %v3382_v41 = vpack.c.bf16 %v2302_v44, %v2301_v46 }
 0x246   : > { %3399 = vst [vmem:[#allocation2 + $0x18] sm:$0xff] %v3383_v40 }
 0x247   : > { %3398 = vst [vmem:[#allocation2 + $0x10] sm:$0xff] %v3382_v41 }
 0x251   : > { %v4711_v54 = vpop.f32.mrb[8].mxu0 }
 0x252   : > { %v2236_v61 = vmul.f32 %v4711_v54, %v6763_v2  ;;  %v2092_v17 = vpop.f32.mrb[9].mxu0 }
 0x253   : > { %v2234_v19 = vmul.f32 %v6763_v2, %v2092_v17  ;;  %v4712_v36 = vpop.f32.mrb[10].mxu0 }
 0x254   : > { %v2275_v28 = vadd.f32 %v6771_v10, %v2236_v61  ;;  %v2237_v51 = vmul.f32 %v4712_v36, %v6763_v2  ;;  %v2095_v6 = vpop.f32.mrb[11].mxu0 }
 0x255   : > { %v2273_v59 = vadd.f32 %v6771_v10, %v2234_v19  ;;  %v2235_v47 = vmul.f32 %v6763_v2, %v2095_v6 }
 0x256   : > { %v2276_v33 = vadd.f32 %v6771_v10, %v2237_v51  ;;  %v2307_v50 = vmax.f32 %v2275_v28, 0.0 }
 0x257   : > { %v2274_v48 = vadd.f32 %v6771_v10, %v2235_v47  ;;  %v2305_v0 = vmax.f32 %v2273_v59, 0.0 }
 0x258   : > { %v2308_v39 = vmax.f32 %v2276_v33, 0.0 }
 0x259   : > { %v2306_v14 = vmax.f32 %v2274_v48, 0.0 }
 0x25a   : > { %v3385_v62 = vpack.c.bf16 %v2308_v39, %v2307_v50 }
 0x25b   : > { %v3384_v32 = vpack.c.bf16 %v2306_v14, %v2305_v0 }
 0x25c   : > { %3401 = vst [vmem:[#allocation2 + $0x28] sm:$0xff] %v3385_v62 }
 0x25d   : > { %3400 = vst [vmem:[#allocation2 + $0x20] sm:$0xff] %v3384_v32 }
 0x267   : > { %v4715_v56 = vpop.f32.mrb[12].mxu0 }
 0x268   : > { %v2240_v4 = vmul.f32 %v4715_v56, %v6763_v2  ;;  %v2108_v12 = vpop.f32.mrb[13].mxu0 }
 0x269   : > { %v2238_v1 = vmul.f32 %v6763_v2, %v2108_v12  ;;  %v4716_v16 = vpop.f32.mrb[14].mxu0 }
 0x26a   : > { %v2279_v25 = vadd.f32 %v6771_v10, %v2240_v4  ;;  %v2241_v63 = vmul.f32 %v4716_v16, %v6763_v2  ;;  %v2111_v9 = vpop.f32.mrb[15].mxu0  ;;  %v7339_v4 = vld [vmem:[#allocation43_spill] sm:$0xff]  ;;  %v7340_v16 = vld [vmem:[#allocation44_spill] sm:$0xff] }
 0x26b   : > { %v2277_v26 = vadd.f32 %v6771_v10, %v2238_v1  ;;  %v2239_v3 = vmul.f32 %v6763_v2, %v2111_v9 }
 0x26c   : > { %v2280_v37 = vadd.f32 %v6771_v10, %v2241_v63  ;;  %v2311_v55 = vmax.f32 %v2279_v25, 0.0 }
 0x26d   : > { %v2278_v45 = vadd.f32 %v6771_v10, %v2239_v3  ;;  %v2309_v57 = vmax.f32 %v2277_v26, 0.0  ;;  %v7341_v26 = vld [vmem:[#allocation45_spill] sm:$0xff] }
 0x26e   : > { %v2312_v52 = vmax.f32 %v2280_v37, 0.0 }
 0x26f   : > { %v2310_v30 = vmax.f32 %v2278_v45, 0.0 }
 0x270   : > { %v3387_v11 = vpack.c.bf16 %v2312_v52, %v2311_v55  ;;  %v7342_v55 = vld [vmem:[#allocation46_spill] sm:$0xff] }
 0x271   : > { %v3386_v22 = vpack.c.bf16 %v2310_v30, %v2309_v57 }
 0x272   : > { %3403 = vst [vmem:[#allocation2 + $0x38] sm:$0xff] %v3387_v11 }
 0x273   : > { %3402 = vst [vmem:[#allocation2 + $0x30] sm:$0xff] %v3386_v22 }
 0x27d   : > { %v4719_v7 = vpop.f32.mrb[16].mxu0 }
 0x27e   : > { %v4941_v23 = vadd.f32 %v4719_v7, %v6636_v8  ;;  %v2124_v35 = vpop.f32.mrb[17].mxu0 }
 0x27f   : > { %v4942_v27 = vadd.f32 %v2124_v35, %v6638_v31  ;;  %v4720_v34 = vpop.f32.mrb[18].mxu0 }
 0x280   : > { %v2244_v21 = vmul.f32 %v4941_v23, %v6763_v2  ;;  %v4943_v38 = vadd.f32 %v4720_v34, %v6640_v43  ;;  %v2127_v24 = vpop.f32.mrb[19].mxu0 }
 0x281   : > { %v2242_v13 = vmul.f32 %v4942_v27, %v6763_v2  ;;  %v4944_v42 = vadd.f32 %v2127_v24, %v6642_v53 }
 0x282   : > { %v2283_v20 = vadd.f32 %v6771_v10, %v2244_v21  ;;  %v2245_v18 = vmul.f32 %v4943_v38, %v6763_v2 }
 0x283   : > { %v2281_v15 = vadd.f32 %v6771_v10, %v2242_v13  ;;  %v2243_v8 = vmul.f32 %v4944_v42, %v6763_v2  ;;  %v7343_v42 = vld [vmem:[#allocation47_spill] sm:$0xff] }
 0x284   : > { %v2284_v31 = vadd.f32 %v6771_v10, %v2245_v18  ;;  %v2315_v46 = vmax.f32 %v2283_v20, 0.0 }
 0x285   : > { %v2282_v49 = vadd.f32 %v6771_v10, %v2243_v8  ;;  %v2313_v43 = vmax.f32 %v2281_v15, 0.0  ;;  %v7344_v15 = vld [vmem:[#allocation48_spill] sm:$0xff] }
 0x286   : > { %v2316_v44 = vmax.f32 %v2284_v31, 0.0 }
 0x287   : > { %v2314_v40 = vmax.f32 %v2282_v49, 0.0 }
 0x288   : > { %v3389_v41 = vpack.c.bf16 %v2316_v44, %v2315_v46  ;;  %v7345_v46 = vld [vmem:[#allocation49_spill] sm:$0xff] }
 0x289   : > { %v3388_v54 = vpack.c.bf16 %v2314_v40, %v2313_v43 }
 0x28a   : > { %3405 = vst [vmem:[#allocation2 + $0x48] sm:$0xff] %v3389_v41  ;;  %v7346_v41 = vld [vmem:[#allocation50_spill] sm:$0xff] }
 0x28b   : > { %3404 = vst [vmem:[#allocation2 + $0x40] sm:$0xff] %v3388_v54 }
 0x293   : > { %v4723_v53 = vpop.f32.mrb[20].mxu0 }
 0x294   : > { %v4945_v61 = vadd.f32 %v4723_v53, %v6649_v58  ;;  %v2140_v17 = vpop.f32.mrb[21].mxu0 }
 0x295   : > { %v4946_v19 = vadd.f32 %v2140_v17, %v6651_v60  ;;  %v4724_v36 = vpop.f32.mrb[22].mxu0 }
 0x296   : > { %v2248_v28 = vmul.f32 %v4945_v61, %v6763_v2  ;;  %v4947_v51 = vadd.f32 %v4724_v36, %v6655_v29  ;;  %v2143_v6 = vpop.f32.mrb[23].mxu0  ;;  %v6858_v36 = vld [vmem:[%s7229_s9] ss:$0 sm:$0xff] }
 0x297   : > { %v2246_v59 = vmul.f32 %v4946_v19, %v6763_v2  ;;  %v4948_v47 = vadd.f32 %v2143_v6, %v6657_v5 }
 0x298   : > { %v2287_v33 = vadd.f32 %v6771_v10, %v2248_v28  ;;  %v2249_v48 = vmul.f32 %v4947_v51, %v6763_v2  ;;  %v6864_v51 = vld [vmem:[%s7227_s7] ss:$0 sm:$0xff] }
 0x299   : > { %v2285_v50 = vadd.f32 %v6771_v10, %v2246_v59  ;;  %v2247_v58 = vmul.f32 %v4948_v47, %v6763_v2 }
 0x29a   : > { %v2288_v60 = vadd.f32 %v6771_v10, %v2249_v48  ;;  %v2319_v0 = vmax.f32 %v2287_v33, 0.0 }
 0x29b   : > { %v2286_v39 = vadd.f32 %v6771_v10, %v2247_v58  ;;  %v2317_v29 = vmax.f32 %v2285_v50, 0.0 }
 0x29c   : > { %v2320_v14 = vmax.f32 %v2288_v60, 0.0 }
 0x29d   : > { %v2318_v62 = vmax.f32 %v2286_v39, 0.0 }
 0x29e   : > { %v3391_v32 = vpack.c.bf16 %v2320_v14, %v2319_v0 }
 0x29f   : > { %v3390_v56 = vpack.c.bf16 %v2318_v62, %v2317_v29 }
 0x2a0   : > { %3407 = vst [vmem:[#allocation2 + $0x58] sm:$0xff] %v3391_v32 }
 0x2a1   : > { %3406 = vst [vmem:[#allocation2 + $0x50] sm:$0xff] %v3390_v56 }
 0x2a9   : > { %v4727_v5 = vpop.f32.mrb[24].mxu0 }
 0x2aa   : > { %v4949_v12 = vadd.f32 %v4727_v5, %v7339_v4  ;;  %v2156_v1 = vpop.f32.mrb[25].mxu0 }
 0x2ab   : > { %v4950_v25 = vadd.f32 %v2156_v1, %v7340_v16  ;;  %v4728_v63 = vpop.f32.mrb[26].mxu0 }
 0x2ac   : > { %v2252_v9 = vmul.f32 %v4949_v12, %v6763_v2  ;;  %v4951_v3 = vadd.f32 %v4728_v63, %v7341_v26  ;;  %v2159_v37 = vpop.f32.mrb[27].mxu0 }
 0x2ad   : > { %v2250_v45 = vmul.f32 %v4950_v25, %v6763_v2  ;;  %v4952_v52 = vadd.f32 %v2159_v37, %v7342_v55 }
 0x2ae   : > { %v2291_v57 = vadd.f32 %v6771_v10, %v2252_v9  ;;  %v2253_v30 = vmul.f32 %v4951_v3, %v6763_v2 }
 0x2af   : > { %v2289_v11 = vadd.f32 %v6771_v10, %v2250_v45  ;;  %v2251_v22 = vmul.f32 %v4952_v52, %v6763_v2 }
 0x2b0   : > { %v2292_v7 = vadd.f32 %v6771_v10, %v2253_v30  ;;  %v2323_v35 = vmax.f32 %v2291_v57, 0.0 }
 0x2b1   : > { %v2290_v23 = vadd.f32 %v6771_v10, %v2251_v22  ;;  %v2321_v34 = vmax.f32 %v2289_v11, 0.0 }
 0x2b2   : > { %v2324_v27 = vmax.f32 %v2292_v7, 0.0 }
 0x2b3   : > { %v2322_v21 = vmax.f32 %v2290_v23, 0.0 }
 0x2b4   : > { %v3393_v38 = vpack.c.bf16 %v2324_v27, %v2323_v35 }
 0x2b5   : > { %v3392_v24 = vpack.c.bf16 %v2322_v21, %v2321_v34 }
 0x2b6   : > { %3409 = vst [vmem:[#allocation2 + $0x68] sm:$0xff] %v3393_v38 }
 0x2b7   : > { %3408 = vst [vmem:[#allocation2 + $0x60] sm:$0xff] %v3392_v24 }
 0x2bf   : > { %v4731_v13 = vpop.f32.mrb[28].mxu0 }
 0x2c0   : > { %v4953_v20 = vadd.f32 %v4731_v13, %v7343_v42  ;;  %v2172_v18 = vpop.f32.mrb[29].mxu0 }
 0x2c1   : > { %v4954_v8 = vadd.f32 %v2172_v18, %v7344_v15  ;;  %v4732_v31 = vpop.f32.mrb[30].mxu0 }
 0x2c2   : > { %v2256_v49 = vmul.f32 %v4953_v20, %v6763_v2  ;;  %v4955_v44 = vadd.f32 %v4732_v31, %v7345_v46  ;;  %v2175_v43 = vpop.f32.mrb[31].mxu0 }
 0x2c3   : > { %v2254_v40 = vmul.f32 %v4954_v8, %v6763_v2  ;;  %v4956_v54 = vadd.f32 %v2175_v43, %v7346_v41 }
 0x2c4   : > { %v2295_v53 = vadd.f32 %v6771_v10, %v2256_v49  ;;  %v2257_v61 = vmul.f32 %v4955_v44, %v6763_v2 }
 0x2c5   : > { %v2293_v17 = vadd.f32 %v6771_v10, %v2254_v40  ;;  %v2255_v19 = vmul.f32 %v4956_v54, %v6763_v2  ;;  %v6870_v2 = vld [vmem:[%s7228_s8] ss:$0 sm:$0xff] }
 0x2c6   : > { %v2296_v28 = vadd.f32 %v6771_v10, %v2257_v61  ;;  %v2327_v47 = vmax.f32 %v2295_v53, 0.0 }
 0x2c7   : > { %v2294_v6 = vadd.f32 %v6771_v10, %v2255_v19  ;;  %v4895_v59 = vpop.f32.mrb[32].mxu0  ;;  %v2325_v60 = vmax.f32 %v2293_v17, 0.0 }
 0x2c8   : > { %v2328_v33 = vmax.f32 %v2296_v28, 0.0  ;;  %v4847_v48 = vpop.f32.mrb[16].mxu1  ;;  %v3262_v50 = vadd.f32 %v4895_v59, %v6858_v36  ;;  %v3253_v58 = vpop.f32.mrb[33].mxu0 }
 0x2c9   : > { %v2326_v39 = vmax.f32 %v2294_v6, 0.0  ;;  %v3047_v0 = vmul.f32 %v4847_v48, %v6864_v51  ;;  %v2879_v14 = vpop.f32.mrb[17].mxu1  ;;  %v3254_v29 = vadd.f32 %v6858_v36, %v3253_v58  ;;  %v4896_v10 = vpop.f32.mrb[34].mxu0 }
 0x2ca   : > { %v3395_v62 = vpack.c.bf16 %v2328_v33, %v2327_v47  ;;  %v3045_v32 = vmul.f32 %v6864_v51, %v2879_v14  ;;  %v4848_v56 = vpop.f32.mrb[18].mxu1  ;;  %v3265_v5 = vadd.f32 %v4896_v10, %v6858_v36  ;;  %v3256_v4 = vpop.f32.mrb[35].mxu0 }
 0x2cb   : > { %v3394_v12 = vpack.c.bf16 %v2326_v39, %v2325_v60  ;;  %v3086_v1 = vadd.f32 %v6870_v2, %v3047_v0  ;;  %v3048_v16 = vmul.f32 %v4848_v56, %v6864_v51  ;;  %v2882_v25 = vpop.f32.mrb[19].mxu1  ;;  %v3257_v63 = vadd.f32 %v6858_v36, %v3256_v4 }
 0x2cc   : > { %3411 = vst [vmem:[#allocation2 + $0x78] sm:$0xff] %v3395_v62  ;;  %v3084_v9 = vadd.f32 %v6870_v2, %v3045_v32  ;;  %v3046_v26 = vmul.f32 %v6864_v51, %v2882_v25  ;;  %v3445_v3 = vpack.c.bf16 %v3265_v5, %v3262_v50 }
 0x2cd   : > { %3410 = vst [vmem:[#allocation2 + $0x70] sm:$0xff] %v3394_v12  ;;  %v3087_v37 = vadd.f32 %v6870_v2, %v3048_v16  ;;  %v3444_v45 = vpack.c.bf16 %v3257_v63, %v3254_v29  ;;  %v3118_v52 = vmax.f32 %v3086_v1, 0.0 }
 0x2ce   : > { %v3085_v55 = vadd.f32 %v6870_v2, %v3046_v26  ;;  %3461 = vst [vmem:[#allocation4 + $0x8] sm:$0xff] %v3445_v3  ;;  %v3116_v11 = vmax.f32 %v3084_v9, 0.0 }
 0x2cf   : > { %v3119_v57 = vmax.f32 %v3087_v37, 0.0  ;;  %3460 = vst [vmem:[#allocation4] sm:$0xff] %v3444_v45  ;;  %v4899_v30 = vpop.f32.mrb[36].mxu0 }
 0x2d0   : > { %v3117_v22 = vmax.f32 %v3085_v55, 0.0  ;;  %v4851_v7 = vpop.f32.mrb[20].mxu1  ;;  %v3278_v23 = vadd.f32 %v4899_v30, %v6858_v36  ;;  %v3269_v35 = vpop.f32.mrb[37].mxu0 }
 0x2d1   : > { %v3413_v27 = vpack.c.bf16 %v3119_v57, %v3118_v52  ;;  %v3051_v34 = vmul.f32 %v4851_v7, %v6864_v51  ;;  %v2895_v21 = vpop.f32.mrb[21].mxu1  ;;  %v3270_v38 = vadd.f32 %v6858_v36, %v3269_v35  ;;  %v4900_v24 = vpop.f32.mrb[38].mxu0 }
 0x2d2   : > { %v3412_v13 = vpack.c.bf16 %v3117_v22, %v3116_v11  ;;  %v3049_v42 = vmul.f32 %v6864_v51, %v2895_v21  ;;  %v4852_v20 = vpop.f32.mrb[22].mxu1  ;;  %v3281_v18 = vadd.f32 %v4900_v24, %v6858_v36  ;;  %v3272_v15 = vpop.f32.mrb[39].mxu0 }
 0x2d3   : > { %3429 = vst [vmem:[#allocation3 + $0x8] sm:$0xff] %v3413_v27  ;;  %v3090_v8 = vadd.f32 %v6870_v2, %v3051_v34  ;;  %v3052_v31 = vmul.f32 %v4852_v20, %v6864_v51  ;;  %v2898_v49 = vpop.f32.mrb[23].mxu1  ;;  %v3273_v46 = vadd.f32 %v6858_v36, %v3272_v15 }
 0x2d4   : > { %3428 = vst [vmem:[#allocation3] sm:$0xff] %v3412_v13  ;;  %v3088_v44 = vadd.f32 %v6870_v2, %v3049_v42  ;;  %v3050_v43 = vmul.f32 %v6864_v51, %v2898_v49  ;;  %v3447_v40 = vpack.c.bf16 %v3281_v18, %v3278_v23 }
 0x2d5   : > { %v3091_v41 = vadd.f32 %v6870_v2, %v3052_v31  ;;  %v3446_v54 = vpack.c.bf16 %v3273_v46, %v3270_v38  ;;  %v3122_v61 = vmax.f32 %v3090_v8, 0.0 }
 0x2d6   : > { %v3089_v53 = vadd.f32 %v6870_v2, %v3050_v43  ;;  %3463 = vst [vmem:[#allocation4 + $0x18] sm:$0xff] %v3447_v40  ;;  %v3120_v28 = vmax.f32 %v3088_v44, 0.0 }
 0x2d7   : > { %v3123_v17 = vmax.f32 %v3091_v41, 0.0  ;;  %3462 = vst [vmem:[#allocation4 + $0x10] sm:$0xff] %v3446_v54  ;;  %v4903_v19 = vpop.f32.mrb[40].mxu0 }
 0x2d8   : > { %v3121_v6 = vmax.f32 %v3089_v53, 0.0  ;;  %v4855_v59 = vpop.f32.mrb[24].mxu1  ;;  %v3294_v47 = vadd.f32 %v4903_v19, %v6858_v36  ;;  %v3285_v33 = vpop.f32.mrb[41].mxu0 }
 0x2d9   : > { %v3415_v48 = vpack.c.bf16 %v3123_v17, %v3122_v61  ;;  %v3055_v50 = vmul.f32 %v4855_v59, %v6864_v51  ;;  %v2911_v58 = vpop.f32.mrb[25].mxu1  ;;  %v3286_v60 = vadd.f32 %v6858_v36, %v3285_v33  ;;  %v4904_v39 = vpop.f32.mrb[42].mxu0 }
 0x2da   : > { %v3414_v0 = vpack.c.bf16 %v3121_v6, %v3120_v28  ;;  %v3053_v14 = vmul.f32 %v6864_v51, %v2911_v58  ;;  %v4856_v29 = vpop.f32.mrb[26].mxu1  ;;  %v3297_v10 = vadd.f32 %v4904_v39, %v6858_v36  ;;  %v3288_v62 = vpop.f32.mrb[43].mxu0 }
 0x2db   : > { %3431 = vst [vmem:[#allocation3 + $0x18] sm:$0xff] %v3415_v48  ;;  %v3094_v32 = vadd.f32 %v6870_v2, %v3055_v50  ;;  %v3056_v56 = vmul.f32 %v4856_v29, %v6864_v51  ;;  %v2914_v5 = vpop.f32.mrb[27].mxu1  ;;  %v3289_v4 = vadd.f32 %v6858_v36, %v3288_v62 }
 0x2dc   : > { %3430 = vst [vmem:[#allocation3 + $0x10] sm:$0xff] %v3414_v0  ;;  %v3092_v12 = vadd.f32 %v6870_v2, %v3053_v14  ;;  %v3054_v1 = vmul.f32 %v6864_v51, %v2914_v5  ;;  %v3449_v16 = vpack.c.bf16 %v3297_v10, %v3294_v47 }
 0x2dd   : > { %v3095_v25 = vadd.f32 %v6870_v2, %v3056_v56  ;;  %v3448_v63 = vpack.c.bf16 %v3289_v4, %v3286_v60  ;;  %v3126_v26 = vmax.f32 %v3094_v32, 0.0 }
 0x2de   : > { %v3093_v9 = vadd.f32 %v6870_v2, %v3054_v1  ;;  %3465 = vst [vmem:[#allocation4 + $0x28] sm:$0xff] %v3449_v16  ;;  %v3124_v45 = vmax.f32 %v3092_v12, 0.0 }
 0x2df   : > { %v3127_v3 = vmax.f32 %v3095_v25, 0.0  ;;  %3464 = vst [vmem:[#allocation4 + $0x20] sm:$0xff] %v3448_v63  ;;  %v4907_v37 = vpop.f32.mrb[44].mxu0 }
 0x2e0   : > { %v3125_v55 = vmax.f32 %v3093_v9, 0.0  ;;  %v4859_v52 = vpop.f32.mrb[28].mxu1  ;;  %v3310_v57 = vadd.f32 %v4907_v37, %v6858_v36  ;;  %v3301_v30 = vpop.f32.mrb[45].mxu0 }
 0x2e1   : > { %v3417_v11 = vpack.c.bf16 %v3127_v3, %v3126_v26  ;;  %v3059_v22 = vmul.f32 %v4859_v52, %v6864_v51  ;;  %v2927_v7 = vpop.f32.mrb[29].mxu1  ;;  %v3302_v23 = vadd.f32 %v6858_v36, %v3301_v30  ;;  %v4908_v35 = vpop.f32.mrb[46].mxu0 }
 0x2e2   : > { %v3416_v27 = vpack.c.bf16 %v3125_v55, %v3124_v45  ;;  %v3057_v34 = vmul.f32 %v6864_v51, %v2927_v7  ;;  %v4860_v21 = vpop.f32.mrb[30].mxu1  ;;  %v3313_v38 = vadd.f32 %v4908_v35, %v6858_v36  ;;  %v3304_v24 = vpop.f32.mrb[47].mxu0 }
 0x2e3   : > { %3433 = vst [vmem:[#allocation3 + $0x28] sm:$0xff] %v3417_v11  ;;  %v3098_v13 = vadd.f32 %v6870_v2, %v3059_v22  ;;  %v3060_v42 = vmul.f32 %v4860_v21, %v6864_v51  ;;  %v2930_v20 = vpop.f32.mrb[31].mxu1  ;;  %v3305_v18 = vadd.f32 %v6858_v36, %v3304_v24 }
 0x2e4   : > { %3432 = vst [vmem:[#allocation3 + $0x20] sm:$0xff] %v3416_v27  ;;  %v3096_v15 = vadd.f32 %v6870_v2, %v3057_v34  ;;  %v3058_v8 = vmul.f32 %v6864_v51, %v2930_v20  ;;  %v3451_v31 = vpack.c.bf16 %v3313_v38, %v3310_v57 }
 0x2e5   : > { %v3099_v49 = vadd.f32 %v6870_v2, %v3060_v42  ;;  %v3450_v46 = vpack.c.bf16 %v3305_v18, %v3302_v23  ;;  %v3130_v43 = vmax.f32 %v3098_v13, 0.0 }
 0x2e6   : > { %v3097_v44 = vadd.f32 %v6870_v2, %v3058_v8  ;;  %3467 = vst [vmem:[#allocation4 + $0x38] sm:$0xff] %v3451_v31  ;;  %v3128_v54 = vmax.f32 %v3096_v15, 0.0 }
 0x2e7   : > { %v3131_v40 = vmax.f32 %v3099_v49, 0.0  ;;  %3466 = vst [vmem:[#allocation4 + $0x30] sm:$0xff] %v3450_v46  ;;  %v4911_v41 = vpop.f32.mrb[48].mxu0 }
 0x2e8   : > { %v3129_v53 = vmax.f32 %v3097_v44, 0.0  ;;  %v4863_v61 = vpop.f32.mrb[32].mxu1  ;;  %v3326_v17 = vadd.f32 %v4911_v41, %v6858_v36  ;;  %v3317_v19 = vpop.f32.mrb[49].mxu0 }
 0x2e9   : > { %v3419_v28 = vpack.c.bf16 %v3131_v40, %v3130_v43  ;;  %v3063_v6 = vmul.f32 %v4863_v61, %v6864_v51  ;;  %v2943_v59 = vpop.f32.mrb[33].mxu1  ;;  %v3318_v47 = vadd.f32 %v6858_v36, %v3317_v19  ;;  %v4912_v33 = vpop.f32.mrb[50].mxu0 }
 0x2ea   : > { %v3418_v48 = vpack.c.bf16 %v3129_v53, %v3128_v54  ;;  %v3061_v50 = vmul.f32 %v6864_v51, %v2943_v59  ;;  %v4864_v58 = vpop.f32.mrb[34].mxu1  ;;  %v3329_v60 = vadd.f32 %v4912_v33, %v6858_v36  ;;  %v3320_v39 = vpop.f32.mrb[51].mxu0 }
 0x2eb   : > { %3435 = vst [vmem:[#allocation3 + $0x38] sm:$0xff] %v3419_v28  ;;  %v3102_v0 = vadd.f32 %v6870_v2, %v3063_v6  ;;  %v3064_v14 = vmul.f32 %v4864_v58, %v6864_v51  ;;  %v2946_v29 = vpop.f32.mrb[35].mxu1  ;;  %v3321_v10 = vadd.f32 %v6858_v36, %v3320_v39 }
 0x2ec   : > { %3434 = vst [vmem:[#allocation3 + $0x30] sm:$0xff] %v3418_v48  ;;  %v3100_v62 = vadd.f32 %v6870_v2, %v3061_v50  ;;  %v3062_v32 = vmul.f32 %v6864_v51, %v2946_v29  ;;  %v3453_v56 = vpack.c.bf16 %v3329_v60, %v3326_v17 }
 0x2ed   : > { %v3103_v5 = vadd.f32 %v6870_v2, %v3064_v14  ;;  %v3452_v4 = vpack.c.bf16 %v3321_v10, %v3318_v47  ;;  %v3134_v1 = vmax.f32 %v3102_v0, 0.0 }
 0x2ee   : > { %v3101_v12 = vadd.f32 %v6870_v2, %v3062_v32  ;;  %3469 = vst [vmem:[#allocation4 + $0x48] sm:$0xff] %v3453_v56  ;;  %v3132_v63 = vmax.f32 %v3100_v62, 0.0 }
 0x2ef   : > { %v3135_v16 = vmax.f32 %v3103_v5, 0.0  ;;  %3468 = vst [vmem:[#allocation4 + $0x40] sm:$0xff] %v3452_v4  ;;  %v4915_v25 = vpop.f32.mrb[52].mxu0 }
 0x2f0   : > { %v3133_v9 = vmax.f32 %v3101_v12, 0.0  ;;  %v4867_v26 = vpop.f32.mrb[36].mxu1  ;;  %v3342_v3 = vadd.f32 %v4915_v25, %v6858_v36  ;;  %v3333_v37 = vpop.f32.mrb[53].mxu0 }
 0x2f1   : > { %v3421_v45 = vpack.c.bf16 %v3135_v16, %v3134_v1  ;;  %v3067_v55 = vmul.f32 %v4867_v26, %v6864_v51  ;;  %v2959_v52 = vpop.f32.mrb[37].mxu1  ;;  %v3334_v57 = vadd.f32 %v6858_v36, %v3333_v37  ;;  %v4916_v30 = vpop.f32.mrb[54].mxu0 }
 0x2f2   : > { %v3420_v11 = vpack.c.bf16 %v3133_v9, %v3132_v63  ;;  %v3065_v22 = vmul.f32 %v6864_v51, %v2959_v52  ;;  %v4868_v7 = vpop.f32.mrb[38].mxu1  ;;  %v3345_v23 = vadd.f32 %v4916_v30, %v6858_v36  ;;  %v3336_v35 = vpop.f32.mrb[55].mxu0 }
 0x2f3   : > { %3437 = vst [vmem:[#allocation3 + $0x48] sm:$0xff] %v3421_v45  ;;  %v3106_v27 = vadd.f32 %v6870_v2, %v3067_v55  ;;  %v3068_v34 = vmul.f32 %v4868_v7, %v6864_v51  ;;  %v2962_v21 = vpop.f32.mrb[39].mxu1  ;;  %v3337_v38 = vadd.f32 %v6858_v36, %v3336_v35 }
 0x2f4   : > { %3436 = vst [vmem:[#allocation3 + $0x40] sm:$0xff] %v3420_v11  ;;  %v3104_v24 = vadd.f32 %v6870_v2, %v3065_v22  ;;  %v3066_v13 = vmul.f32 %v6864_v51, %v2962_v21  ;;  %v3455_v42 = vpack.c.bf16 %v3345_v23, %v3342_v3 }
 0x2f5   : > { %v3107_v20 = vadd.f32 %v6870_v2, %v3068_v34  ;;  %v3454_v18 = vpack.c.bf16 %v3337_v38, %v3334_v57  ;;  %v3138_v8 = vmax.f32 %v3106_v27, 0.0 }
 0x2f6   : > { %v3105_v15 = vadd.f32 %v6870_v2, %v3066_v13  ;;  %3471 = vst [vmem:[#allocation4 + $0x58] sm:$0xff] %v3455_v42  ;;  %v3136_v46 = vmax.f32 %v3104_v24, 0.0 }
 0x2f7   : > { %v3139_v31 = vmax.f32 %v3107_v20, 0.0  ;;  %3470 = vst [vmem:[#allocation4 + $0x50] sm:$0xff] %v3454_v18  ;;  %v4919_v49 = vpop.f32.mrb[56].mxu0 }
 0x2f8   : > { %v3137_v44 = vmax.f32 %v3105_v15, 0.0  ;;  %v4871_v43 = vpop.f32.mrb[40].mxu1  ;;  %v3358_v40 = vadd.f32 %v4919_v49, %v6858_v36  ;;  %v3349_v41 = vpop.f32.mrb[57].mxu0 }
 0x2f9   : > { %v3423_v54 = vpack.c.bf16 %v3139_v31, %v3138_v8  ;;  %v3071_v53 = vmul.f32 %v4871_v43, %v6864_v51  ;;  %v2975_v61 = vpop.f32.mrb[41].mxu1  ;;  %v3350_v17 = vadd.f32 %v6858_v36, %v3349_v41  ;;  %v4920_v19 = vpop.f32.mrb[58].mxu0 }
 0x2fa   : > { %v3422_v28 = vpack.c.bf16 %v3137_v44, %v3136_v46  ;;  %v3069_v6 = vmul.f32 %v6864_v51, %v2975_v61  ;;  %v4872_v59 = vpop.f32.mrb[42].mxu1  ;;  %v3361_v47 = vadd.f32 %v4920_v19, %v6858_v36  ;;  %v3352_v33 = vpop.f32.mrb[59].mxu0 }
 0x2fb   : > { %3439 = vst [vmem:[#allocation3 + $0x58] sm:$0xff] %v3423_v54  ;;  %v3110_v48 = vadd.f32 %v6870_v2, %v3071_v53  ;;  %v3072_v50 = vmul.f32 %v4872_v59, %v6864_v51  ;;  %v2978_v58 = vpop.f32.mrb[43].mxu1  ;;  %v3353_v60 = vadd.f32 %v6858_v36, %v3352_v33 }
 0x2fc   : > { %3438 = vst [vmem:[#allocation3 + $0x50] sm:$0xff] %v3422_v28  ;;  %v3108_v39 = vadd.f32 %v6870_v2, %v3069_v6  ;;  %v3070_v0 = vmul.f32 %v6864_v51, %v2978_v58  ;;  %v3457_v14 = vpack.c.bf16 %v3361_v47, %v3358_v40 }
 0x2fd   : > { %v3111_v29 = vadd.f32 %v6870_v2, %v3072_v50  ;;  %v3456_v10 = vpack.c.bf16 %v3353_v60, %v3350_v17  ;;  %v3142_v32 = vmax.f32 %v3110_v48, 0.0 }
 0x2fe   : > { %v3109_v62 = vadd.f32 %v6870_v2, %v3070_v0  ;;  %3473 = vst [vmem:[#allocation4 + $0x68] sm:$0xff] %v3457_v14  ;;  %v3140_v4 = vmax.f32 %v3108_v39, 0.0 }
 0x2ff   : > { %v3143_v56 = vmax.f32 %v3111_v29, 0.0  ;;  %3472 = vst [vmem:[#allocation4 + $0x60] sm:$0xff] %v3456_v10  ;;  %v4923_v5 = vpop.f32.mrb[60].mxu0 }
 0x300   : > { %v3141_v12 = vmax.f32 %v3109_v62, 0.0  ;;  %v4875_v1 = vpop.f32.mrb[44].mxu1  ;;  %v3374_v16 = vadd.f32 %v4923_v5, %v6858_v36  ;;  %v3365_v25 = vpop.f32.mrb[61].mxu0 }
 0x301   : > { %v3425_v63 = vpack.c.bf16 %v3143_v56, %v3142_v32  ;;  %v3075_v9 = vmul.f32 %v4875_v1, %v6864_v51  ;;  %v2991_v26 = vpop.f32.mrb[45].mxu1  ;;  %v3366_v3 = vadd.f32 %v6858_v36, %v3365_v25  ;;  %v4924_v37 = vpop.f32.mrb[62].mxu0 }
 0x302   : > { %v3424_v45 = vpack.c.bf16 %v3141_v12, %v3140_v4  ;;  %v3073_v55 = vmul.f32 %v6864_v51, %v2991_v26  ;;  %v4876_v52 = vpop.f32.mrb[46].mxu1  ;;  %v3377_v57 = vadd.f32 %v4924_v37, %v6858_v36  ;;  %v3368_v30 = vpop.f32.mrb[63].mxu0 }
 0x303   : > { %3441 = vst [vmem:[#allocation3 + $0x68] sm:$0xff] %v3425_v63  ;;  %v3114_v11 = vadd.f32 %v6870_v2, %v3075_v9  ;;  %v3076_v22 = vmul.f32 %v4876_v52, %v6864_v51  ;;  %v2994_v7 = vpop.f32.mrb[47].mxu1  ;;  %v3369_v23 = vadd.f32 %v6858_v36, %v3368_v30 }
 0x304   : > { %3440 = vst [vmem:[#allocation3 + $0x60] sm:$0xff] %v3424_v45  ;;  %v3112_v35 = vadd.f32 %v6870_v2, %v3073_v55  ;;  %v3074_v27 = vmul.f32 %v6864_v51, %v2994_v7  ;;  %v3459_v34 = vpack.c.bf16 %v3377_v57, %v3374_v16 }
 0x305   : > { %v3115_v21 = vadd.f32 %v6870_v2, %v3076_v22  ;;  %v3458_v38 = vpack.c.bf16 %v3369_v23, %v3366_v3  ;;  %v3146_v13 = vmax.f32 %v3114_v11, 0.0 }
 0x306   : > { %v3113_v24 = vadd.f32 %v6870_v2, %v3074_v27  ;;  %3475 = vst [vmem:[#allocation4 + $0x78] sm:$0xff] %v3459_v34  ;;  %v3144_v20 = vmax.f32 %v3112_v35, 0.0 }
 0x307   : > { %v3147_v42 = vmax.f32 %v3115_v21, 0.0  ;;  %3474 = vst [vmem:[#allocation4 + $0x70] sm:$0xff] %v3458_v38 }
 0x308   : > { %v3145_v18 = vmax.f32 %v3113_v24, 0.0 }
 0x309   : > { %v3427_v15 = vpack.c.bf16 %v3147_v42, %v3146_v13 }
 0x30a   : > { %v3426_v8 = vpack.c.bf16 %v3145_v18, %v3144_v20 }
 0x30b   : > { %3443 = vst [vmem:[#allocation3 + $0x78] sm:$0xff] %v3427_v15 }
 0x30c   : > { %3442 = vst [vmem:[#allocation3 + $0x70] sm:$0xff] %v3426_v8 }
 0x30d PF: > { %v3497_v36 = vld [vmem:[#allocation3 + $0x40] sm:$0xff]  ;;  %v3498_v31 = vld [vmem:[#allocation3 + $0x48] sm:$0xff]  ;;  %s4276_s13 = sshll.u32 %s5587_s22, 7  ;;  %v3499_v46 = vld [vmem:[#allocation3 + $0x50] sm:$0xff]  ;;  %s4007_s12 = sld [smem:[#allocation5]] }
 0x30e   : > { %v3489_v51 = vld [vmem:[#allocation3] sm:$0xff]  ;;  %4493 = vmatprep.subr.bf16.mxu0 %v3497_v36  ;;  %s3477_s16 = sshra.s32 %s4276_s13, 4  ;;  %v3490_v49 = vld [vmem:[#allocation3 + $0x8] sm:$0xff]  ;;  %v3491_v44 = vld [vmem:[#allocation3 + $0x10] sm:$0xff]  ;;  %s3971_s27 = sshra.s32 %s4276_s13, 3 }
 0x30f   : > { %4494 = vmatpush3.bf16.xpose.msra.mxu0 %v3489_v51  ;;  %s4277_s10 = sshll.u32 %s3477_s16, 3  ;;  %v3500_v43 = vld [vmem:[#allocation3 + $0x58] sm:$0xff]  ;;  %v3501_v41 = vld [vmem:[#allocation3 + $0x60] sm:$0xff]  ;;  %v3502_v53 = vld [vmem:[#allocation3 + $0x68] sm:$0xff]  ;;  %s4278_s15 = sshll.u32 %s3971_s27, 2 }
 0x310   : > { %4495 = vmatprep.subr.bf16.mxu0 %v3498_v31  ;;  %s6971_s29 = scalar_lea.vmem [#allocation2], %s4277_s10  ;;  %v3492_v40 = vld [vmem:[#allocation3 + $0x18] sm:$0xff]  ;;  %v3493_v54 = vld [vmem:[#allocation3 + $0x20] sm:$0xff]  ;;  %v3494_v61 = vld [vmem:[#allocation3 + $0x28] sm:$0xff]  ;;  %s7112_s21 = scalar_lea.vmem %s5861_s19, %s4278_s15 }
 0x311   : > { %v3481_v2 = vld [vmem:[%s6971_s29] sm:$0xff]  ;;  %v3495_v19 = vld [vmem:[#allocation3 + $0x30] sm:$0xff]  ;;  %v3496_v6 = vld [vmem:[#allocation3 + $0x38] sm:$0xff]  ;;  %s4280_s19 = sshll.u32 %s5587_s22, 4  ;;  %s4281_s11 = sshll.u32 %s5591_s23, 5 }
 0x312   : > { %4509 = vmatprep.mubr.bf16.mxu0 %v3481_v2  ;;  %v3504_v28 = vld [vmem:[#allocation3 + $0x78] sm:$0xff]  ;;  %v3482_v59 = vld [vmem:[%s6971_s29 + $0x8] sm:$0xff]  ;;  %v3483_v47 = vld [vmem:[%s6971_s29 + $0x10] sm:$0xff]  ;;  %s4070_s14 = sadd.s32 %s4281_s11, %s4280_s19  ;;  %s7347_s22 = sld [smem:[#allocation22_spill]] }
 0x313   : > { %v3503_v17 = vld [vmem:[#allocation3 + $0x70] sm:$0xff]  ;;  %v3484_v33 = vld [vmem:[%s6971_s29 + $0x18] sm:$0xff]  ;;  %v3485_v48 = vld [vmem:[%s6971_s29 + $0x20] sm:$0xff]  ;;  %s4282_s23 = sshll.u32 %s4070_s14, 7  ;;  %s4073_s17 = sshll.u32 %s5863_s26, 4  ;;  %s7162_s17 = int_to_ptr.vmem [resolvable:$true] %s4073_s17 }
 0x314   : > { %v3486_v50 = vld [vmem:[%s6971_s29 + $0x28] sm:$0xff]  ;;  %v3487_v58 = vld [vmem:[%s6971_s29 + $0x30] sm:$0xff]  ;;  %v3488_v60 = vld [vmem:[%s6971_s29 + $0x38] sm:$0xff]  ;;  %s7348_s25 = sld [smem:[#allocation51_spill]]  ;;  %s7168_s16 = scalar_lea.sflag [#allocation8], %s436_s28 }
 0x315   : > { %v3834_v39 = vld [vmem:[#allocation4 + $0x40] sm:$0xff]  ;;  %v3835_v14 = vld [vmem:[#allocation4 + $0x48] sm:$0xff]  ;;  %v3836_v10 = vld [vmem:[#allocation4 + $0x50] sm:$0xff]  ;;  %s5501_s10 = scalar_lea.vmem %s7162_s17, 2048  ;;  %s5614_s29 = smov [#allocation12]  }
 0x316   : > { %v3826_v0 = vld [vmem:[#allocation4] sm:$0xff]  ;;  %4525 = vmatprep.subr.bf16.mxu1 %v3834_v39  ;;  %v3827_v29 = vld [vmem:[#allocation4 + $0x8] sm:$0xff]  ;;  %v3828_v62 = vld [vmem:[#allocation4 + $0x10] sm:$0xff]  ;;  %p5502_p10 = scmp.ne.s32.totalorder %s7162_s17, %s5501_s10  ;;  %s5505_s27 = sshll.u32 %s5614_s29, 4  ;;  %s5506_s27 = int_to_ptr.vmem [resolvable:$false] %s5505_s27 }
 0x317   : > { %4496 = vmatpush3.bf16.xpose.msra.mxu0 %v3490_v49  ;;  %4526 = vmatpush3.bf16.msra.mxu1 %v3826_v0  ;;  %v3837_v11 = vld [vmem:[#allocation4 + $0x58] sm:$0xff]  ;;  %v3838_v23 = vld [vmem:[#allocation4 + $0x60] sm:$0xff]  ;;  %v3839_v13 = vld [vmem:[#allocation4 + $0x68] sm:$0xff]  ;;  %s5507_s15 = scalar_lea.vmem %s5506_s27, 4096  ;;  %p5508_p5 = scmp.lt.s32.totalorder %s7162_s17, %s5506_s27 }
 0x318   : > { %4497 = vmatprep.subr.bf16.mxu0 %v3499_v46  ;;  %4527 = vmatprep.subr.bf16.mxu1 %v3835_v14  ;;  %v3829_v22 = vld [vmem:[#allocation4 + $0x18] sm:$0xff]  ;;  %v3830_v27 = vld [vmem:[#allocation4 + $0x20] sm:$0xff]  ;;  %v3831_v42 = vld [vmem:[#allocation4 + $0x28] sm:$0xff]  ;;  %p7350_p12 = scmp.ne.s32.totalorder %s7347_s22, 0  ;;  %p5509_p6 = scmp.lt.s32.totalorder %s5507_s15, %s5501_s10 }
 0x319   : > { %v3840_v18 = vld [vmem:[#allocation4 + $0x70] sm:$0xff]  ;;  %v3841_v49 = vld [vmem:[#allocation4 + $0x78] sm:$0xff] }
 0x31a   : > { %v3832_v8 = vld [vmem:[#allocation4 + $0x30] sm:$0xff]  ;;  %v3833_v46 = vld [vmem:[#allocation4 + $0x38] sm:$0xff]  ;;  %s7349_s18 = smov %s7348_s25  ;;  %s7160_s13 = scalar_lea.hbm %s7348_s25, %s4282_s23 }
 0x31b   : > { %4528 = vmatpush3.bf16.msra.mxu1 %v3827_v29  ;;  %p5503_p1 = pnand %p5502_p10, %p7350_p12  ;;  %p5510_p7 = por %p5509_p6, %p5508_p5 }
 0x31c   : > { %4529 = vmatprep.subr.bf16.mxu1 %v3836_v10 }
 0x31d   : > { %p5504_p4 = pneg %p5503_p1 }
 0x31f   : > { %4498 = vmatpush3.bf16.xpose.msra.mxu0 %v3491_v44  ;;  %4530 = vmatpush3.bf16.msra.mxu1 %v3828_v62  ;;  %p5511_p9 = pnand %p5510_p7, %p5504_p4 }
 0x320   : > { %4499 = vmatprep.subr.bf16.mxu0 %v3500_v43  ;;  %4531 = vmatprep.subr.bf16.mxu1 %v3837_v11 }
 0x323   : > { %4532 = vmatpush3.bf16.msra.mxu1 %v3829_v22 }
 0x324   : > { %4533 = vmatprep.subr.bf16.mxu1 %v3838_v23 }
 0x327   : > { %4500 = vmatpush3.bf16.xpose.msra.mxu0 %v3492_v40  ;;  %4534 = vmatpush3.bf16.msra.mxu1 %v3830_v27 }
 0x328   : > { %4501 = vmatprep.subr.bf16.mxu0 %v3501_v41  ;;  %4535 = vmatprep.subr.bf16.mxu1 %v3839_v13 }
 0x32b   : > { %4536 = vmatpush3.bf16.msra.mxu1 %v3831_v42 }
 0x32c   : > { %4537 = vmatprep.subr.bf16.mxu1 %v3840_v18 }
 0x32f   : > { %4502 = vmatpush3.bf16.xpose.msra.mxu0 %v3493_v54  ;;  %4538 = vmatpush3.bf16.msra.mxu1 %v3832_v8 }
 0x330   : > { %4503 = vmatprep.subr.bf16.mxu0 %v3502_v53  ;;  %4539 = vmatprep.subr.bf16.mxu1 %v3841_v49 }
 0x333   : > { %4540 = vmatpush3.bf16.msra.mxu1 %v3833_v46 }
 0x337   : > { %4504 = vmatpush3.bf16.xpose.msra.mxu0 %v3494_v61 }
 0x338   : > { %4505 = vmatprep.subr.bf16.mxu0 %v3503_v17 }
 0x33f   : > { %4506 = vmatpush3.bf16.xpose.msra.mxu0 %v3495_v19 }
 0x340   : > { %4507 = vmatprep.subr.bf16.mxu0 %v3504_v28 }
 0x347   : > { %4508 = vmatpush3.bf16.xpose.msra.mxu0 %v3496_v6 }
 0x34e   : > { %4510 = vmatmul.mubr.bf16.vlgmr.msra.gmra.mrb[0].mxu0 %v3481_v2 }
 0x34f   : > { %4511 = vmatprep.mubr.bf16.mxu0 %v3482_v59 }
 0x356   : > { %4512 = vmatmul.mubr.bf16.gmra.mrb[4].mxu0 %v3482_v59 }
 0x357   : > { %4513 = vmatprep.mubr.bf16.mxu0 %v3483_v47 }
 0x35e   : > { %4514 = vmatmul.mubr.bf16.gmra.mrb[8].mxu0 %v3483_v47 }
 0x35f   : > { %4515 = vmatprep.mubr.bf16.mxu0 %v3484_v33 }
 0x366   : > { %4516 = vmatmul.mubr.bf16.gmra.mrb[12].mxu0 %v3484_v33 }
 0x367   : > { %4517 = vmatprep.mubr.bf16.mxu0 %v3485_v48 }
 0x36e   : > { %4518 = vmatmul.mubr.bf16.gmra.mrb[16].mxu0 %v3485_v48 }
 0x36f   : > { %4519 = vmatprep.mubr.bf16.mxu0 %v3486_v50 }
 0x376   : > { %4520 = vmatmul.mubr.bf16.gmra.mrb[20].mxu0 %v3486_v50 }
 0x377   : > { %4521 = vmatprep.mubr.bf16.mxu0 %v3487_v58 }
 0x37e   : > { %4522 = vmatmul.mubr.bf16.gmra.mrb[24].mxu0 %v3487_v58 }
 0x37f   : > { %4523 = vmatprep.mubr.bf16.mxu0 %v3488_v60 }
 0x386   : > { %4524 = vmatmul.mubr.bf16.gmra.mrb[28].mxu0 %v3488_v60 }
 0x421   : > { %v6981_v32 = vpop.f32.mrb[0].mxu0 }
 0x422   : > { %v6983_v56 = vpop.f32.mrb[1].mxu0 }
 0x423   : > { %v6985_v5 = vpop.f32.mrb[2].mxu0  ;;  %v3618_v4 = vmax.f32 %v6981_v32, %v6983_v56 }
 0x424   : > { %v6989_v12 = vpop.f32.mrb[3].mxu0 }
 0x425   : > { %3619 = vmax.xlane.f32.xlu0 %v3618_v4  ;;  %v3621_v1 = vmax.f32 %v6985_v5, %v6989_v12 }
 0x429   : > { %3622 = vmax.xlane.f32.xlu0 %v3621_v1  ;;  %v6993_v16 = vpop.f32.mrb[4].mxu0 }
 0x42a   : > { %v6995_v25 = vpop.f32.mrb[5].mxu0 }
 0x42b   : > { %v6997_v63 = vpop.f32.mrb[6].mxu0  ;;  %v3624_v9 = vmax.f32 %v6993_v16, %v6995_v25 }
 0x42c   : > { %v7001_v26 = vpop.f32.mrb[7].mxu0 }
 0x42d   : > { %3625 = vmax.xlane.f32.xlu1 %v3624_v9  ;;  %v3627_v3 = vmax.f32 %v6997_v63, %v7001_v26 }
 0x431   : > { %3628 = vmax.xlane.f32.xlu1 %v3627_v3  ;;  %v7005_v37 = vpop.f32.mrb[8].mxu0 }
 0x432   : > { %v7007_v45 = vpop.f32.mrb[9].mxu0 }
 0x433   : > { %v7009_v55 = vpop.f32.mrb[10].mxu0  ;;  %v3630_v52 = vmax.f32 %v7005_v37, %v7007_v45 }
 0x434   : > { %v7013_v57 = vpop.f32.mrb[11].mxu0 }
 0x435   : > { %3631 = vmax.xlane.f32.xlu0 %v3630_v52  ;;  %v3633_v30 = vmax.f32 %v7009_v55, %v7013_v57 }
 0x437   : > { %3634 = vmax.xlane.f32.xlu1 %v3633_v30 }
 0x439   : > { %v7017_v7 = vpop.f32.mrb[12].mxu0 }
 0x43a   : > { %v7019_v35 = vpop.f32.mrb[13].mxu0 }
 0x43b   : > { %v7021_v34 = vpop.f32.mrb[14].mxu0  ;;  %v3636_v21 = vmax.f32 %v7017_v7, %v7019_v35 }
 0x43c   : > { %v7025_v38 = vpop.f32.mrb[15].mxu0 }
 0x43d   : > { %3637 = vmax.xlane.f32.xlu0 %v3636_v21  ;;  %v3639_v24 = vmax.f32 %v7021_v34, %v7025_v38 }
 0x43f   : > { %3640 = vmax.xlane.f32.xlu1 %v3639_v24 }
 0x441   : > { %v7029_v20 = vpop.f32.mrb[16].mxu0 }
 0x442   : > { %v7031_v15 = vpop.f32.mrb[17].mxu0 }
 0x443   : > { %v7033_v36 = vpop.f32.mrb[18].mxu0  ;;  %v3642_v51 = vmax.f32 %v7029_v20, %v7031_v15 }
 0x444   : > { %v7037_v31 = vpop.f32.mrb[19].mxu0 }
 0x445   : > { %3643 = vmax.xlane.f32.xlu0 %v3642_v51  ;;  %v3645_v2 = vmax.f32 %v7033_v36, %v7037_v31 }
 0x447   : > { %3646 = vmax.xlane.f32.xlu1 %v3645_v2 }
 0x449   : > { %v7041_v44 = vpop.f32.mrb[20].mxu0 }
 0x44a   : > { %v7043_v43 = vpop.f32.mrb[21].mxu0 }
 0x44b   : > { %v7045_v40 = vpop.f32.mrb[22].mxu0  ;;  %v3648_v41 = vmax.f32 %v7041_v44, %v7043_v43 }
 0x44c   : > { %v7049_v54 = vpop.f32.mrb[23].mxu0 }
 0x44d   : > { %3649 = vmax.xlane.f32.xlu0 %v3648_v41  ;;  %v3651_v53 = vmax.f32 %v7045_v40, %v7049_v54 }
 0x44f   : > { %3652 = vmax.xlane.f32.xlu1 %v3651_v53 }
 0x451   : > { %v7053_v61 = vpop.f32.mrb[24].mxu0 }
 0x452   : > { %v7055_v17 = vpop.f32.mrb[25].mxu0 }
 0x453   : > { %v7057_v19 = vpop.f32.mrb[26].mxu0  ;;  %v3654_v28 = vmax.f32 %v7053_v61, %v7055_v17 }
 0x454   : > { %v7061_v6 = vpop.f32.mrb[27].mxu0 }
 0x455   : > { %3655 = vmax.xlane.f32.xlu0 %v3654_v28  ;;  %v3657_v59 = vmax.f32 %v7057_v19, %v7061_v6 }
 0x457   : > { %3658 = vmax.xlane.f32.xlu1 %v3657_v59 }
 0x459   : > { %v7065_v47 = vpop.f32.mrb[28].mxu0 }
 0x45a   : > { %v7067_v33 = vpop.f32.mrb[29].mxu0 }
 0x45b   : > { %v7069_v48 = vpop.f32.mrb[30].mxu0  ;;  %v3660_v50 = vmax.f32 %v7065_v47, %v7067_v33 }
 0x45c   : > { %v7073_v58 = vpop.f32.mrb[31].mxu0 }
 0x45d   : > { %v3663_v60 = vmax.f32 %v7069_v48, %v7073_v58  ;;  %3661 = vmax.xlane.f32.xlu0 %v3660_v50 }
 0x45f   : > { %3664 = vmax.xlane.f32.xlu1 %v3663_v60 }
 0x4b2   : > { %v3620_v39 = vpop.xlane.xlu0 %3619 }
 0x4b3   : > { %v3666_v0 = vsub.f32 %v6981_v32, %v3620_v39  ;;  %v3667_v14 = vsub.f32 %v6983_v56, %v3620_v39 }
 0x4b5   : > { %v3698_v29 = vmul.f32 1.442695, %v3666_v0  ;;  %v3700_v10 = vmul.f32 1.442695, %v3667_v14 }
 0x4b6   : > { %v3623_v62 = vpop.xlane.xlu0 %3622 }
 0x4b7   : > { %5321 = vpow2.f32 %v3698_v29  ;;  %v3668_v4 = vsub.f32 %v6985_v5, %v3623_v62  ;;  %v3669_v1 = vsub.f32 %v6989_v12, %v3623_v62 }
 0x4b8   : > { %5323 = vpow2.f32 %v3700_v10 }
 0x4b9   : > { %v3702_v9 = vmul.f32 1.442695, %v3668_v4  ;;  %v3704_v3 = vmul.f32 1.442695, %v3669_v1 }
 0x4ba   : > { %v3626_v52 = vpop.xlane.xlu1 %3625 }
 0x4bb   : > { %5325 = vpow2.f32 %v3702_v9  ;;  %v3670_v30 = vsub.f32 %v6993_v16, %v3626_v52  ;;  %v3671_v11 = vsub.f32 %v6995_v25, %v3626_v52 }
 0x4bc   : > { %5327 = vpow2.f32 %v3704_v3 }
 0x4bd   : > { %v3706_v32 = vmul.f32 1.442695, %v3670_v30  ;;  %v3708_v56 = vmul.f32 1.442695, %v3671_v11 }
 0x4be   : > { %v3629_v22 = vpop.xlane.xlu1 %3628 }
 0x4bf   : > { %5329 = vpow2.f32 %v3706_v32  ;;  %v3672_v23 = vsub.f32 %v6997_v63, %v3629_v22  ;;  %v3673_v5 = vsub.f32 %v7001_v26, %v3629_v22 }
 0x4c0   : > { %5331 = vpow2.f32 %v3708_v56 }
 0x4c1   : > { %v5322_v12 = vpop.eup %5321  ;;  %v3710_v27 = vmul.f32 1.442695, %v3672_v23  ;;  %v3712_v21 = vmul.f32 1.442695, %v3673_v5 }
 0x4c2   : > { %v5324_v24 = vpop.eup %5323  ;;  %v3632_v13 = vpop.xlane.xlu0 %3631 }
 0x4c3   : > { %5333 = vpow2.f32 %v3710_v27  ;;  %v3674_v16 = vsub.f32 %v7005_v37, %v3632_v13  ;;  %v3675_v25 = vsub.f32 %v7007_v45, %v3632_v13  ;;  %v3762_v42 = vadd.f32 %v5324_v24, %v5322_v12 }
 0x4c4   : > { %5335 = vpow2.f32 %v3712_v21  ;;  %v3635_v18 = vpop.xlane.xlu1 %3634 }
 0x4c5   : > { %v5326_v8 = vpop.eup %5325  ;;  %v3714_v51 = vmul.f32 1.442695, %v3674_v16  ;;  %v3716_v2 = vmul.f32 1.442695, %v3675_v25  ;;  %v3676_v63 = vsub.f32 %v7009_v55, %v3635_v18  ;;  %v3677_v26 = vsub.f32 %v7013_v57, %v3635_v18  ;;  %3763 = vadd.xlane.f32.xlu0 %v3762_v42 }
 0x4c6   : > { %v5328_v49 = vpop.eup %5327  ;;  %v3810_v46 = vpack.c.bf16 %v5326_v8, %v5322_v12 }
 0x4c7   : > { %5337 = vpow2.f32 %v3714_v51  ;;  %v3718_v41 = vmul.f32 1.442695, %v3676_v63  ;;  %v3720_v53 = vmul.f32 1.442695, %v3677_v26  ;;  %v3811_v28 = vpack.c.bf16 %v5328_v49, %v5324_v24 }
 0x4c8   : > { %5339 = vpow2.f32 %v3716_v2  ;;  %v3765_v37 = vadd.f32 %v5328_v49, %v5326_v8 }
 0x4c9   : > { %v5330_v45 = vpop.eup %5329  ;;  %5341 = vpow2.f32 %v3718_v41  ;;  %3874 = vmatprep.mubr.bf16.mxu1 %v3811_v28 }
 0x4ca   : > { %v5332_v59 = vpop.eup %5331  ;;  %5343 = vpow2.f32 %v3720_v53  ;;  %3766 = vadd.xlane.f32.xlu1 %v3765_v37  ;;  %3875 = vmatmul.mubr.bf16.vlgmr.msra.gmra.mrb[0].mxu1 %v3810_v46  ;;  %v3638_v50 = vpop.xlane.xlu0 %3637 }
 0x4cb   : > { %v3678_v55 = vsub.f32 %v7017_v7, %v3638_v50  ;;  %v3679_v57 = vsub.f32 %v7019_v35, %v3638_v50  ;;  %v3768_v60 = vadd.f32 %v5332_v59, %v5330_v45 }
 0x4cc   : > { %v3641_v39 = vpop.xlane.xlu1 %3640 }
 0x4cd   : > { %v5334_v0 = vpop.eup %5333  ;;  %v3722_v14 = vmul.f32 1.442695, %v3678_v55  ;;  %v3724_v29 = vmul.f32 1.442695, %v3679_v57  ;;  %v3680_v10 = vsub.f32 %v7021_v34, %v3641_v39  ;;  %v3681_v62 = vsub.f32 %v7025_v38, %v3641_v39  ;;  %3769 = vadd.xlane.f32.xlu0 %v3768_v60 }
 0x4ce   : > { %v5336_v4 = vpop.eup %5335  ;;  %v3812_v1 = vpack.c.bf16 %v5334_v0, %v5330_v45 }
 0x4cf   : > { %5345 = vpow2.f32 %v3722_v14  ;;  %v3726_v9 = vmul.f32 1.442695, %v3680_v10  ;;  %v3728_v3 = vmul.f32 1.442695, %v3681_v62  ;;  %v3813_v52 = vpack.c.bf16 %v5336_v4, %v5332_v59 }
 0x4d0   : > { %5347 = vpow2.f32 %v3724_v29  ;;  %v3771_v7 = vadd.f32 %v5336_v4, %v5334_v0 }
 0x4d1   : > { %v5338_v30 = vpop.eup %5337  ;;  %5349 = vpow2.f32 %v3726_v9  ;;  %3882 = vmatprep.mubr.bf16.mxu1 %v3813_v52 }
 0x4d2   : > { %v5340_v35 = vpop.eup %5339  ;;  %5351 = vpow2.f32 %v3728_v3  ;;  %3772 = vadd.xlane.f32.xlu1 %v3771_v7  ;;  %3883 = vmatmul.mubr.bf16.gmra.mrb[4].mxu1 %v3812_v1  ;;  %v3644_v11 = vpop.xlane.xlu0 %3643 }
 0x4d3   : > { %v5342_v34 = vpop.eup %5341  ;;  %v3682_v38 = vsub.f32 %v7029_v20, %v3644_v11  ;;  %v3683_v32 = vsub.f32 %v7031_v15, %v3644_v11  ;;  %v3774_v56 = vadd.f32 %v5340_v35, %v5338_v30 }
 0x4d4   : > { %v5344_v22 = vpop.eup %5343  ;;  %v3647_v23 = vpop.xlane.xlu1 %3646  ;;  %v3814_v5 = vpack.c.bf16 %v5342_v34, %v5338_v30 }
 0x4d5   : > { %v3730_v12 = vmul.f32 1.442695, %v3682_v38  ;;  %v3732_v27 = vmul.f32 1.442695, %v3683_v32  ;;  %v3684_v21 = vsub.f32 %v7033_v36, %v3647_v23  ;;  %v3685_v24 = vsub.f32 %v7037_v31, %v3647_v23  ;;  %3775 = vadd.xlane.f32.xlu0 %v3774_v56 }
 0x4d6   : > { %v3815_v13 = vpack.c.bf16 %v5344_v22, %v5340_v35  ;;  %v3777_v16 = vadd.f32 %v5344_v22, %v5342_v34 }
 0x4d7   : > { %5353 = vpow2.f32 %v3730_v12  ;;  %v3734_v25 = vmul.f32 1.442695, %v3684_v21  ;;  %v3736_v42 = vmul.f32 1.442695, %v3685_v24 }
 0x4d8   : > { %5355 = vpow2.f32 %v3732_v27  ;;  %3890 = vmatprep.mubr.bf16.mxu1 %v3815_v13  ;;  %3778 = vadd.xlane.f32.xlu1 %v3777_v16 }
 0x4d9   : > { %v5346_v20 = vpop.eup %5345  ;;  %5357 = vpow2.f32 %v3734_v25 }
 0x4da   : > { %v5348_v15 = vpop.eup %5347  ;;  %5359 = vpow2.f32 %v3736_v42  ;;  %3891 = vmatmul.mubr.bf16.gmra.mrb[8].mxu1 %v3814_v5  ;;  %v3650_v18 = vpop.xlane.xlu0 %3649 }
 0x4db   : > { %v5350_v8 = vpop.eup %5349  ;;  %v3686_v36 = vsub.f32 %v7041_v44, %v3650_v18  ;;  %v3687_v31 = vsub.f32 %v7043_v43, %v3650_v18  ;;  %v3780_v51 = vadd.f32 %v5348_v15, %v5346_v20 }
 0x4dc   : > { %v5352_v2 = vpop.eup %5351  ;;  %v3653_v63 = vpop.xlane.xlu1 %3652  ;;  %v3816_v26 = vpack.c.bf16 %v5350_v8, %v5346_v20 }
 0x4dd   : > { %v3738_v49 = vmul.f32 1.442695, %v3686_v36  ;;  %v3740_v46 = vmul.f32 1.442695, %v3687_v31  ;;  %v3688_v41 = vsub.f32 %v7045_v40, %v3653_v63  ;;  %v3689_v53 = vsub.f32 %v7049_v54, %v3653_v63  ;;  %3781 = vadd.xlane.f32.xlu0 %v3780_v51 }
 0x4de   : > { %v3817_v28 = vpack.c.bf16 %v5352_v2, %v5348_v15  ;;  %v3783_v37 = vadd.f32 %v5352_v2, %v5350_v8 }
 0x4df   : > { %5361 = vpow2.f32 %v3738_v49  ;;  %v3742_v45 = vmul.f32 1.442695, %v3688_v41  ;;  %v3744_v59 = vmul.f32 1.442695, %v3689_v53  ;;  %v4287_v41 = vld [vmem:[%s7112_s21] sm:$0xff]  }
 0x4e0   : > { %5363 = vpow2.f32 %v3740_v46  ;;  %3898 = vmatprep.mubr.bf16.mxu1 %v3817_v28  ;;  %3784 = vadd.xlane.f32.xlu1 %v3783_v37 }
 0x4e1   : > { %v5354_v44 = vpop.eup %5353  ;;  %5365 = vpow2.f32 %v3742_v45  ;;  %v7115_v45 = vstv %s4007_s12 }
 0x4e2   : > { %v5356_v43 = vpop.eup %5355  ;;  %5367 = vpow2.f32 %v3744_v59  ;;  %3899 = vmatmul.mubr.bf16.gmra.mrb[12].mxu1 %v3816_v26  ;;  %v3656_v50 = vpop.xlane.xlu0 %3655 }
 0x4e3   : > { %v5358_v55 = vpop.eup %5357  ;;  %v3690_v40 = vsub.f32 %v7053_v61, %v3656_v50  ;;  %v3691_v54 = vsub.f32 %v7055_v17, %v3656_v50  ;;  %v3786_v57 = vadd.f32 %v5356_v43, %v5354_v44 }
 0x4e4   : > { %v5360_v60 = vpop.eup %5359  ;;  %v3659_v39 = vpop.xlane.xlu1 %3658  ;;  %v3818_v0 = vpack.c.bf16 %v5358_v55, %v5354_v44 }
 0x4e5   : > { %v3746_v14 = vmul.f32 1.442695, %v3690_v40  ;;  %v3748_v29 = vmul.f32 1.442695, %v3691_v54  ;;  %v3692_v10 = vsub.f32 %v7057_v19, %v3659_v39  ;;  %v3693_v62 = vsub.f32 %v7061_v6, %v3659_v39  ;;  %3787 = vadd.xlane.f32.xlu0 %v3786_v57 }
 0x4e6   : > { %v3819_v4 = vpack.c.bf16 %v5360_v60, %v5356_v43  ;;  %v3789_v1 = vadd.f32 %v5360_v60, %v5358_v55  ;;  %v4288_v43 = vunpack.c.l.bf16 %v4287_v41  ;;  %v4289_v60 = vunpack.c.h.bf16 %v4287_v41 }
 0x4e7   : > { %5369 = vpow2.f32 %v3746_v14  ;;  %v3750_v9 = vmul.f32 1.442695, %v3692_v10  ;;  %v3752_v3 = vmul.f32 1.442695, %v3693_v62  ;;  %v4318_v62 = vld [vmem:[%s7112_s21 + $0x8] sm:$0xff]  }
 0x4e8   : > { %5371 = vpow2.f32 %v3748_v29  ;;  %3906 = vmatprep.mubr.bf16.mxu1 %v3819_v4  ;;  %3790 = vadd.xlane.f32.xlu1 %v3789_v1 }
 0x4e9   : > { %v5362_v61 = vpop.eup %5361  ;;  %5373 = vpow2.f32 %v3750_v9 }
 0x4ea   : > { %v5364_v17 = vpop.eup %5363  ;;  %5375 = vpow2.f32 %v3752_v3  ;;  %3907 = vmatmul.mubr.bf16.gmra.mrb[16].mxu1 %v3818_v0  ;;  %v3662_v52 = vpop.xlane.xlu0 %3661 }
 0x4eb   : > { %v5366_v7 = vpop.eup %5365  ;;  %v3694_v19 = vsub.f32 %v7065_v47, %v3662_v52  ;;  %v3695_v6 = vsub.f32 %v7067_v33, %v3662_v52  ;;  %v3792_v30 = vadd.f32 %v5364_v17, %v5362_v61  ;;  %v4292_v52 = vunpack.c.l.bf16 %v4318_v62 }
 0x4ec   : > { %v5368_v35 = vpop.eup %5367  ;;  %v3665_v11 = vpop.xlane.xlu1 %3664  ;;  %v3820_v34 = vpack.c.bf16 %v5366_v7, %v5362_v61 }
 0x4ed   : > { %v3754_v38 = vmul.f32 1.442695, %v3694_v19  ;;  %v3756_v32 = vmul.f32 1.442695, %v3695_v6  ;;  %3793 = vadd.xlane.f32.xlu0 %v3792_v30  ;;  %v3696_v56 = vsub.f32 %v7069_v48, %v3665_v11  ;;  %v3697_v22 = vsub.f32 %v7073_v58, %v3665_v11 }
 0x4ee   : > { %v3821_v23 = vpack.c.bf16 %v5368_v35, %v5364_v17  ;;  %v3795_v5 = vadd.f32 %v5368_v35, %v5366_v7  ;;  %v4293_v11 = vunpack.c.h.bf16 %v4318_v62 }
 0x4ef   : > { %5377 = vpow2.f32 %v3754_v38  ;;  %v3758_v12 = vmul.f32 1.442695, %v3696_v56  ;;  %v3760_v27 = vmul.f32 1.442695, %v3697_v22 }
 0x4f0   : > { %5379 = vpow2.f32 %v3756_v32  ;;  %3914 = vmatprep.mubr.bf16.mxu1 %v3821_v23  ;;  %3796 = vadd.xlane.f32.xlu1 %v3795_v5  ;;  %v4319_v23 = vld [vmem:[%s7112_s21 + $0x10] sm:$0xff]  }
 0x4f1   : > { %v5370_v47 = vpop.eup %5369  ;;  %5381 = vpow2.f32 %v3758_v12 }
 0x4f2   : > { %v5372_v33 = vpop.eup %5371  ;;  %5383 = vpow2.f32 %v3760_v27  ;;  %3915 = vmatmul.mubr.bf16.gmra.mrb[20].mxu1 %v3820_v34 }
 0x4f3   : > { %v5374_v21 = vpop.eup %5373  ;;  %v3798_v24 = vadd.f32 %v5372_v33, %v5370_v47 }
 0x4f4   : > { %v5376_v13 = vpop.eup %5375  ;;  %v3822_v16 = vpack.c.bf16 %v5374_v21, %v5370_v47 }
 0x4f5   : > { %3799 = vadd.xlane.f32.xlu0 %v3798_v24  ;;  %v3823_v48 = vpack.c.bf16 %v5376_v13, %v5372_v33  ;;  %v3801_v58 = vadd.f32 %v5376_v13, %v5374_v21  ;;  %v4296_v24 = vunpack.c.l.bf16 %v4319_v23 }
 0x4f7   : > { %3922 = vmatprep.mubr.bf16.mxu1 %v3823_v48  ;;  %3802 = vadd.xlane.f32.xlu1 %v3801_v58 }
 0x4f9   : > { %v5378_v25 = vpop.eup %5377 }
 0x4fa   : > { %v5380_v42 = vpop.eup %5379  ;;  %3923 = vmatmul.mubr.bf16.gmra.mrb[24].mxu1 %v3822_v16 }
 0x4fb   : > { %v5382_v20 = vpop.eup %5381  ;;  %v3804_v15 = vadd.f32 %v5380_v42, %v5378_v25 }
 0x4fc   : > { %v5384_v18 = vpop.eup %5383  ;;  %v3824_v8 = vpack.c.bf16 %v5382_v20, %v5378_v25 }
 0x4fd   : > { %3805 = vadd.xlane.f32.xlu0 %v3804_v15  ;;  %v3825_v36 = vpack.c.bf16 %v5384_v18, %v5380_v42  ;;  %v3807_v31 = vadd.f32 %v5384_v18, %v5382_v20  ;;  %v4297_v42 = vunpack.c.h.bf16 %v4319_v23 }
 0x4ff   : > { %3930 = vmatprep.mubr.bf16.mxu1 %v3825_v36  ;;  %3808 = vadd.xlane.f32.xlu1 %v3807_v31  ;;  %v4320_v31 = vld [vmem:[%s7112_s21 + $0x18] sm:$0xff]  }
 0x500   : > { %v4300_v41 = vunpack.c.l.bf16 %v4320_v31 }
 0x502   : > { %3931 = vmatmul.mubr.bf16.gmra.mrb[28].mxu1 %v3824_v8 }
 0x552   : > { %v3764_v51 = vpop.xlane.xlu0 %3763 }
 0x553   : > { %5385 = vrcp.f32 %v3764_v51 }
 0x557   : > { %v3767_v2 = vpop.xlane.xlu1 %3766 }
 0x558   : > { %5387 = vrcp.f32 %v3767_v2 }
 0x55a   : > { %v3770_v63 = vpop.xlane.xlu0 %3769 }
 0x55b   : > { %5389 = vrcp.f32 %v3770_v63 }
 0x55d   : > { %v5386_v37 = vpop.eup %5385 }
 0x55f   : > { %v3773_v26 = vpop.xlane.xlu1 %3772 }
 0x560   : > { %5391 = vrcp.f32 %v3773_v26 }
 0x562   : > { %v5388_v55 = vpop.eup %5387  ;;  %v3776_v40 = vpop.xlane.xlu0 %3775 }
 0x563   : > { %5393 = vrcp.f32 %v3776_v40 }
 0x565   : > { %v3779_v39 = vpop.xlane.xlu1 %3778  ;;  %v5390_v3 = vpop.eup %5389 }
 0x566   : > { %5395 = vrcp.f32 %v3779_v39 }
 0x56a   : > { %v5392_v19 = vpop.eup %5391  ;;  %v3782_v6 = vpop.xlane.xlu0 %3781 }
 0x56b   : > { %5397 = vrcp.f32 %v3782_v6 }
 0x56d   : > { %v3785_v34 = vpop.xlane.xlu1 %3784  ;;  %v5394_v47 = vpop.eup %5393 }
 0x56e   : > { %5399 = vrcp.f32 %v3785_v34 }
 0x570   : > { %v5396_v16 = vpop.eup %5395 }
 0x572   : > { %v3788_v48 = vpop.xlane.xlu0 %3787 }
 0x573   : > { %5401 = vrcp.f32 %v3788_v48 }
 0x575   : > { %v3791_v20 = vpop.xlane.xlu1 %3790  ;;  %v5398_v26 = vpop.eup %5397 }
 0x576   : > { %5403 = vrcp.f32 %v3791_v20 }
 0x59d   : > { %v4541_v49 = vpop.f32.mrb[0].mxu1 }
 0x59e   : > { %v4542_v46 = vpop.f32.mrb[1].mxu1 }
 0x59f   : > { %v4543_v53 = vadd.f32 %v4542_v46, %v4541_v49  ;;  %v4544_v28 = vpop.f32.mrb[2].mxu1 }
 0x5a0   : > { %v4545_v59 = vpop.f32.mrb[3].mxu1 }
 0x5a1   : > { %v3955_v44 = vmul.f32 %v5386_v37, %v4543_v53  ;;  %v4546_v50 = vadd.f32 %v4545_v59, %v4544_v28  ;;  %v5400_v28 = vpop.eup %5399  ;;  %v3794_v37 = vpop.xlane.xlu0 %3793 }
 0x5a2   : > { %5405 = vrcp.f32 %v3794_v37 }
 0x5a3   : > { %v4009_v54 = vmul.f32 %v7115_v45, %v3955_v44  ;;  %v3956_v57 = vmul.f32 %v5388_v55, %v4546_v50  ;;  %v3797_v50 = vpop.xlane.xlu1 %3796 }
 0x5a4   : > { %5407 = vrcp.f32 %v3797_v50 }
 0x5a5   : > { %v4025_v0 = vadd.f32 %v4288_v43, %v4009_v54  ;;  %v4010_v14 = vmul.f32 %v7115_v45, %v3956_v57  ;;  %v4547_v29 = vpop.f32.mrb[4].mxu1  ;;  %v4301_v43 = vunpack.c.h.bf16 %v4320_v31 }
 0x5a6   : > { %v4548_v10 = vpop.f32.mrb[5].mxu1 }
 0x5a7   : > { %4041 = vst [vmem:[%s5863_s26] sm:$0xff] %v4025_v0  ;;  %v4026_v4 = vadd.f32 %v4289_v60, %v4010_v14  ;;  %v4549_v1 = vadd.f32 %v4548_v10, %v4547_v29  ;;  %v4550_v9 = vpop.f32.mrb[6].mxu1  ;;  %v4321_v60 = vld [vmem:[%s7112_s21 + $0x20] sm:$0xff]   ;;  %v5402_v29 = vpop.eup %5401 }
 0x5a8   : > { %v4551_v61 = vpop.f32.mrb[7].mxu1 }
 0x5a9   : > { %4042 = vst [vmem:[%s5863_s26 + $0x8] sm:$0xff] %v4026_v4  ;;  %v3957_v17 = vmul.f32 %v5390_v3, %v4549_v1  ;;  %v4552_v7 = vadd.f32 %v4551_v61, %v4550_v9  ;;  %v4304_v4 = vunpack.c.l.bf16 %v4321_v60  ;;  %v5404_v9 = vpop.eup %5403  ;;  %v3800_v3 = vpop.xlane.xlu0 %3799 }
 0x5aa   : > { %5409 = vrcp.f32 %v3800_v3 }
 0x5ab   : > { %v4011_v30 = vmul.f32 %v7115_v45, %v3957_v17  ;;  %v3958_v35 = vmul.f32 %v5392_v19, %v4552_v7  ;;  %v3803_v7 = vpop.xlane.xlu1 %3802 }
 0x5ac   : > { %5411 = vrcp.f32 %v3803_v7 }
 0x5ad   : > { %v4027_v38 = vadd.f32 %v4292_v52, %v4011_v30  ;;  %v4012_v32 = vmul.f32 %v7115_v45, %v3958_v35  ;;  %v4553_v56 = vpop.f32.mrb[8].mxu1  ;;  %v4305_v52 = vunpack.c.h.bf16 %v4321_v60 }
 0x5ae   : > { %v4554_v22 = vpop.f32.mrb[9].mxu1 }
 0x5af   : > { %4043 = vst [vmem:[%s5863_s26 + $0x10] sm:$0xff] %v4027_v38  ;;  %v4028_v5 = vadd.f32 %v4293_v11, %v4012_v32  ;;  %v4555_v12 = vadd.f32 %v4554_v22, %v4553_v56  ;;  %v4556_v27 = vpop.f32.mrb[10].mxu1  ;;  %v4322_v11 = vld [vmem:[%s7112_s21 + $0x28] sm:$0xff]   ;;  %v5406_v56 = vpop.eup %5405 }
 0x5b0   : > { %v4557_v33 = vpop.f32.mrb[11].mxu1 }
 0x5b1   : > { %4044 = vst [vmem:[%s5863_s26 + $0x18] sm:$0xff] %v4028_v5  ;;  %v3959_v21 = vmul.f32 %v5394_v47, %v4555_v12  ;;  %v4558_v13 = vadd.f32 %v4557_v33, %v4556_v27  ;;  %v4308_v5 = vunpack.c.l.bf16 %v4322_v11  ;;  %v5408_v27 = vpop.eup %5407  ;;  %v3806_v47 = vpop.xlane.xlu0 %3805 }
 0x5b2   : > { %5413 = vrcp.f32 %v3806_v47 }
 0x5b3   : > { %v4013_v58 = vmul.f32 %v7115_v45, %v3959_v21  ;;  %v3960_v25 = vmul.f32 %v5396_v16, %v4558_v13  ;;  %v3809_v13 = vpop.xlane.xlu1 %3808 }
 0x5b4   : > { %5415 = vrcp.f32 %v3809_v13 }
 0x5b5   : > { %v4029_v15 = vadd.f32 %v4296_v24, %v4013_v58  ;;  %v4014_v18 = vmul.f32 %v7115_v45, %v3960_v25  ;;  %v4559_v8 = vpop.f32.mrb[12].mxu1  ;;  %v4309_v24 = vunpack.c.h.bf16 %v4322_v11 }
 0x5b6   : > { %v4560_v36 = vpop.f32.mrb[13].mxu1 }
 0x5b7   : > { %4045 = vst [vmem:[%s5863_s26 + $0x20] sm:$0xff] %v4029_v15  ;;  %v4030_v51 = vadd.f32 %v4297_v42, %v4014_v18  ;;  %v4561_v2 = vadd.f32 %v4560_v36, %v4559_v8  ;;  %v4562_v63 = vpop.f32.mrb[14].mxu1  ;;  %v4323_v42 = vld [vmem:[%s7112_s21 + $0x30] sm:$0xff]   ;;  %v5410_v8 = vpop.eup %5409 }
 0x5b8   : > { %v4563_v49 = vpop.f32.mrb[15].mxu1 }
 0x5b9   : > { %4046 = vst [vmem:[%s5863_s26 + $0x28] sm:$0xff] %v4030_v51  ;;  %v3961_v46 = vmul.f32 %v5398_v26, %v4561_v2  ;;  %v4564_v53 = vadd.f32 %v4563_v49, %v4562_v63  ;;  %v4312_v51 = vunpack.c.l.bf16 %v4323_v42  ;;  %v5412_v63 = vpop.eup %5411 }
 0x5bb   : > { %v4015_v59 = vmul.f32 %v7115_v45, %v3961_v46  ;;  %v3962_v44 = vmul.f32 %v5400_v28, %v4564_v53  ;;  %v4313_v46 = vunpack.c.h.bf16 %v4323_v42 }
 0x5bd   : > { %v4031_v55 = vadd.f32 %v4300_v41, %v4015_v59  ;;  %v4016_v40 = vmul.f32 %v7115_v45, %v3962_v44  ;;  %v4565_v54 = vpop.f32.mrb[16].mxu1  ;;  %v4324_v59 = vld [vmem:[%s7112_s21 + $0x38] sm:$0xff]  }
 0x5be   : > { %v4566_v57 = vpop.f32.mrb[17].mxu1 }
 0x5bf   : > { %4047 = vst [vmem:[%s5863_s26 + $0x30] sm:$0xff] %v4031_v55  ;;  %v4032_v39 = vadd.f32 %v4301_v43, %v4016_v40  ;;  %v4567_v0 = vadd.f32 %v4566_v57, %v4565_v54  ;;  %v4568_v14 = vpop.f32.mrb[18].mxu1  ;;  %v5414_v55 = vpop.eup %5413  ;;  %v4316_v57 = vunpack.c.l.bf16 %v4324_v59 }
 0x5c0   : > { %v4569_v10 = vpop.f32.mrb[19].mxu1 }
 0x5c1   : > { %4048 = vst [vmem:[%s5863_s26 + $0x38] sm:$0xff] %v4032_v39  ;;  %v3963_v62 = vmul.f32 %v5402_v29, %v4567_v0  ;;  %v4570_v1 = vadd.f32 %v4569_v10, %v4568_v14  ;;  %v5416_v39 = vpop.eup %5415  ;;  %v4317_v29 = vunpack.c.h.bf16 %v4324_v59 }
 0x5c3   : > { %v4017_v61 = vmul.f32 %v7115_v45, %v3963_v62  ;;  %v3964_v17 = vmul.f32 %v5404_v9, %v4570_v1 }
 0x5c5   : > { %v4033_v19 = vadd.f32 %v4304_v4, %v4017_v61  ;;  %v4018_v6 = vmul.f32 %v7115_v45, %v3964_v17  ;;  %v4571_v30 = vpop.f32.mrb[20].mxu1 }
 0x5c6   : > { %v4572_v35 = vpop.f32.mrb[21].mxu1 }
 0x5c7   : > { %4049 = vst [vmem:[%s5863_s26 + $0x40] sm:$0xff] %v4033_v19  ;;  %v4034_v34 = vadd.f32 %v4305_v52, %v4018_v6  ;;  %v4573_v38 = vadd.f32 %v4572_v35, %v4571_v30  ;;  %v4574_v32 = vpop.f32.mrb[22].mxu1 }
 0x5c8   : > { %v4575_v22 = vpop.f32.mrb[23].mxu1 }
 0x5c9   : > { %4050 = vst [vmem:[%s5863_s26 + $0x48] sm:$0xff] %v4034_v34  ;;  %v3965_v23 = vmul.f32 %v5406_v56, %v4573_v38  ;;  %v4576_v12 = vadd.f32 %v4575_v22, %v4574_v32 }
 0x5cb   : > { %v4019_v33 = vmul.f32 %v7115_v45, %v3965_v23  ;;  %v3966_v21 = vmul.f32 %v5408_v27, %v4576_v12 }
 0x5cd   : > { %v4035_v16 = vadd.f32 %v4308_v5, %v4019_v33  ;;  %v4020_v48 = vmul.f32 %v7115_v45, %v3966_v21  ;;  %v4577_v58 = vpop.f32.mrb[24].mxu1 }
 0x5ce   : > { %v4578_v25 = vpop.f32.mrb[25].mxu1 }
 0x5cf   : > { %4051 = vst [vmem:[%s5863_s26 + $0x50] sm:$0xff] %v4035_v16  ;;  %v4036_v20 = vadd.f32 %v4309_v24, %v4020_v48  ;;  %v4579_v15 = vadd.f32 %v4578_v25, %v4577_v58  ;;  %v4580_v18 = vpop.f32.mrb[26].mxu1 }
 0x5d0   : > { %v4581_v36 = vpop.f32.mrb[27].mxu1 }
 0x5d1   : > { %4052 = vst [vmem:[%s5863_s26 + $0x58] sm:$0xff] %v4036_v20  ;;  %v3967_v31 = vmul.f32 %v5410_v8, %v4579_v15  ;;  %v4582_v2 = vadd.f32 %v4581_v36, %v4580_v18 }
 0x5d3   : > { %v4021_v26 = vmul.f32 %v7115_v45, %v3967_v31  ;;  %v3968_v49 = vmul.f32 %v5412_v63, %v4582_v2 }
 0x5d5   : > { %v4037_v41 = vadd.f32 %v4312_v51, %v4021_v26  ;;  %v4022_v53 = vmul.f32 %v7115_v45, %v3968_v49  ;;  %v4583_v28 = vpop.f32.mrb[28].mxu1 }
 0x5d6   : > { %v4584_v37 = vpop.f32.mrb[29].mxu1 }
 0x5d7   : > { %4053 = vst [vmem:[%s5863_s26 + $0x60] sm:$0xff] %v4037_v41  ;;  %v4038_v44 = vadd.f32 %v4313_v46, %v4022_v53  ;;  %v4585_v43 = vadd.f32 %v4584_v37, %v4583_v28  ;;  %v4586_v50 = vpop.f32.mrb[30].mxu1 }
 0x5d8   : > { %v4587_v40 = vpop.f32.mrb[31].mxu1 }
 0x5d9   : > { %4054 = vst [vmem:[%s5863_s26 + $0x68] sm:$0xff] %v4038_v44  ;;  %v3969_v54 = vmul.f32 %v5414_v55, %v4585_v43  ;;  %v4588_v60 = vadd.f32 %v4587_v40, %v4586_v50 }
 0x5db   : > { %v4023_v0 = vmul.f32 %v7115_v45, %v3969_v54  ;;  %v3970_v14 = vmul.f32 %v5416_v39, %v4588_v60 }
 0x5dd   : > { %v4039_v10 = vadd.f32 %v4316_v57, %v4023_v0  ;;  %v4024_v62 = vmul.f32 %v7115_v45, %v3970_v14 }
 0x5df   : > { %4055 = vst [vmem:[%s5863_s26 + $0x70] sm:$0xff] %v4039_v10  ;;  %v4040_v4 = vadd.f32 %v4317_v29, %v4024_v62 }
 0x5e1   : > { %4056 = vst [vmem:[%s5863_s26 + $0x78] sm:$0xff] %v4040_v4 }
 0x5e2   : > { %5514 = shalt.err (!%p5511_p9)
}
 0x5e3   : > { %s5515_s28 = scalar_lea.hbm %s7160_s13, 2048  ;;  %s5519_s21 = scalar_lea.hbm %s7349_s18, 8192 }
 0x5e4   : > { %p5516_p11 = scmp.ne.s32.totalorder %s7160_s13, %s5515_s28  ;;  %p5520_p2 = scmp.lt.u32.totalorder %s7160_s13, %s7349_s18 }
 0x5e5   : > { %p5521_p0 = scmp.lt.u32.totalorder %s5519_s21, %s5515_s28  ;;  %p5523_p10 = scmp.lt.u32.totalorder %s5515_s28, %s7160_s13 }
 0x5e6   : > { %p5517_p13 = pnand %p5516_p11, %p7350_p12 }
 0x5e7   : > { %p5522_p8 = por %p5521_p0, %p5520_p2 }
 0x5e8   : > { %p5518_p3 = pneg %p5517_p13 }
 0x5e9   : > { %p5524_p1 = por %p5523_p10, %p5522_p8 }
 0x5eb   : > { %p5525_p4 = pnand %p5524_p1, %p5518_p3 }
 0x5ed   : > { %5528 = shalt.err (!%p5525_p4)
}
 0x5ee   : > { %s5615_s14 = smov 128   ;;  %s5616_s23 = smov 8  }
 0x5ef   : > { %5081 = dma.vmem_to_hbm [thread:$0]  (%p7350_p12), %s7162_s17, 2048, %s7160_s13, %s7168_s16, %s5615_s14, %s5615_s14, %s5616_s23  }
 0x5f0 PF: > { %s7351_s30 = sld [smem:[#allocation20_spill]]  ;;  %s7352_s24 = sld [smem:[#allocation16_spill]] }
 0x5f1   : > { %s7353_s25 = sld [smem:[#allocation24_spill]] }
 0x5f6   : > { %p5103_p5 = scmp.ge.s32.totalorder %s7351_s30, 2  ;;  %s4088_s10 = sand.u32 1, %s7352_s24  }
 0x5f7   : > { %p7354_p6 = scmp.ne.s32.totalorder %s7353_s25, 0  ;;  %s4089_s29 = scalar_lea.sflag [#allocation8], %s4088_s10 }
 0x5f9   : > { %p5094_p7 = pnand %p5103_p5, %p7354_p6 }
 0x5fb   : > { %5570 = dma.done.wait (!%p5094_p7), %s4089_s29, 2048  }
 0x5fc   : > { %5572 = vsyncadd (!%p5094_p7), %s4089_s29, 4294965248  ;;  %s27_s26 = sadd.s32 1, %s7351_s30   ;;  %s7355_s27 = sld [smem:[#allocation17_spill]] }
 0x5fd   : > { %p24_p9 = scmp.ge.s32.totalorder %s27_s26, 6   ;;  %s7356_s21 = sld [smem:[#allocation25_spill]] }
 0x5fe   : > { %s7357_s22 = sld [smem:[#allocation18_spill]]  ;;  %s7358_s23 = sld [smem:[#allocation19_spill]] }
 0x5ff   : > { %s7359_s24 = sld [smem:[#allocation21_spill]]  ;;  %s7360_s25 = sld [smem:[#allocation23_spill]] }
 0x600   : > { %s7361_s19 = smov %s5579_s20  ;;  %26 = sbr.rel (!%p24_p9) target bundleno = 10 (0xa), region = 122 }
 0x602   : > { %s7362_s20 = smov %s7355_s27 }
 0x607   :  { %4094 = vsyncpa [#allocation7], 1 }
 0x608   :  { %4096 = vsyncpa [#allocation7 + $0x1], 1 }
 0x609   :  { %4097 = vsyncpa [#allocation10], 1 }
 0x60a   :  { %4098 = vsyncpa [#allocation8], 1 }
 0x60b   :  { %4100 = vsyncpa [#allocation8 + $0x1], 1 }

</bundles_post_ra>
